<compile_context>
chip_gen: v6e
topology: v6e:2x2x1
jax: 0.10.0
libtpu: 0.0.40
codegen_flags: <defaults>
</compile_context>

<pallas_src>
import numpy as np
import jax
import jax.numpy as jnp
from jax import lax
from jax.experimental import pallas as pl
from jax.experimental.pallas import tpu as pltpu


def _round_up(x, m):
    return (x + m - 1) // m * m


def _pad_to(x, axis, new_size):
    if new_size == x.shape[axis]:
        return x
    pad = [(0, 0)] * x.ndim
    pad[axis] = (0, new_size - x.shape[axis])
    return jnp.pad(x, pad)


# ---------------------------------------------------------------------------
# Pallas kernels
# ---------------------------------------------------------------------------
def _mm_bn_stats_kernel(a_ref, b_ref, y_ref, s1_ref, s2_ref, acc_ref):
    """Batched tiled matmul with f32 accumulator; epilogue emits per-tile
    column sums of y and y^2 (BatchNorm partial statistics)."""
    k = pl.program_id(3)

    @pl.when(k == 0)
    def _():
        acc_ref[...] = jnp.zeros_like(acc_ref)

    acc_ref[...] += jnp.dot(a_ref[...], b_ref[...],
                            preferred_element_type=jnp.float32)

    @pl.when(k == pl.num_programs(3) - 1)
    def _():
        y = acc_ref[...]
        y_ref[...] = y
        ssum = jnp.sum(y, axis=0, keepdims=True)      # (1, tn)
        ssq = jnp.sum(y * y, axis=0, keepdims=True)   # (1, tn)
        # stats block is (8, tn) to satisfy layout rules; row 0 is read back.
        s1_ref[...] = jnp.broadcast_to(ssum, s1_ref.shape)
        s2_ref[...] = jnp.broadcast_to(ssq, s2_ref.shape)


def _mm_tanh_kernel(a_ref, b_ref, y_ref, acc_ref):
    """Batched tiled matmul with tanh fused into the epilogue (final conv)."""
    k = pl.program_id(3)

    @pl.when(k == 0)
    def _():
        acc_ref[...] = jnp.zeros_like(acc_ref)

    acc_ref[...] += jnp.dot(a_ref[...], b_ref[...],
                            preferred_element_type=jnp.float32)

    @pl.when(k == pl.num_programs(3) - 1)
    def _():
        y_ref[...] = jnp.tanh(acc_ref[...])


def _affine_relu_kernel(x_ref, a_ref, b_ref, o_ref):
    # fused per-channel affine (folded BatchNorm) + ReLU
    o_ref[...] = jnp.maximum(x_ref[...] * a_ref[...] + b_ref[...], 0.0)


# ---------------------------------------------------------------------------
# Matmul wrapper: (P, M, K) @ (P, K, Nc) with tiling, bf16 inputs, f32 out
# ---------------------------------------------------------------------------
# Tile sizes fit comfortably inside scoped VMEM on every generation
# (v5e/v6e: 128 MiB, v7x: 64 MiB).  At toy sizes the n/k grid collapses to a
# single step; at production conv_dims=2048 the same code tiles K and N.
# TODO(synk): per-generation tile sweep (larger tk/tm on v5e/v6e headroom).
_TM = 256
_TN_MAX = 256
_TK_MAX = 512


def _mm_tiling(M, K, Nc):
    tm = _TM
    Mp = _round_up(M, tm)
    if K <= _TK_MAX:
        Kp, tk = K, K
    else:
        Kp, tk = _round_up(K, _TK_MAX), _TK_MAX
    assert Nc % 128 == 0, "output channels must be pre-padded to 128 lanes"
    tn = _TN_MAX if Nc % _TN_MAX == 0 else 128
    return Mp, Kp, tm, tk, tn


def _mm_call(kernel, a, b, n_extra_outs):
    """a: (P, M, K), b: (P, K, Nc), Nc a multiple of 128.
    Returns (y,) or (y, s1, s2); y is (P, Mp, Nc) f32."""
    P, M, K = a.shape
    Nc = b.shape[2]
    Mp, Kp, tm, tk, tn = _mm_tiling(M, K, Nc)

    a = _pad_to(_pad_to(a, 1, Mp), 2, Kp).astype(jnp.bfloat16)
    b = _pad_to(b, 1, Kp).astype(jnp.bfloat16)
    gm, gn, gk = Mp // tm, Nc // tn, Kp // tk

    out_shape = [jax.ShapeDtypeStruct((P, Mp, Nc), jnp.float32)]
    out_specs = [pl.BlockSpec((None, tm, tn), lambda p, i, j, k: (p, i, j))]
    for _ in range(n_extra_outs):
        out_shape.append(jax.ShapeDtypeStruct((P, gm * 8, Nc), jnp.float32))
        out_specs.append(pl.BlockSpec((None, 8, tn), lambda p, i, j, k: (p, i, j)))

    return pl.pallas_call(
        kernel,
        out_shape=tuple(out_shape),
        grid_spec=pltpu.PrefetchScalarGridSpec(
            num_scalar_prefetch=0,
            grid=(P, gm, gn, gk),
            in_specs=[
                pl.BlockSpec((None, tm, tk), lambda p, i, j, k: (p, i, k)),
                pl.BlockSpec((None, tk, tn), lambda p, i, j, k: (p, k, j)),
            ],
            out_specs=tuple(out_specs),
            scratch_shapes=[pltpu.VMEM((tm, tn), jnp.float32)],
        ),
        compiler_params=pltpu.CompilerParams(
            dimension_semantics=("parallel", "parallel", "parallel", "arbitrary"),
            vmem_limit_bytes=48 * 1024 * 1024),
    )(a, b)


# ---------------------------------------------------------------------------
# Fused affine (folded BatchNorm) + ReLU, 512-row tiles
# ---------------------------------------------------------------------------
_TROW = 512


def pallas_affine_relu(x, a, b):
    """relu(x * a + b) with per-channel a, b.  x: (R, C) f32, C multiple of 128."""
    R, C = x.shape
    Rp = _round_up(R, _TROW)
    xp = _pad_to(x, 0, Rp)
    a2 = a.reshape(1, C).astype(jnp.float32)
    b2 = b.reshape(1, C).astype(jnp.float32)
    out = pl.pallas_call(
        _affine_relu_kernel,
        out_shape=jax.ShapeDtypeStruct((Rp, C), jnp.float32),
        grid_spec=pltpu.PrefetchScalarGridSpec(
            num_scalar_prefetch=0,
            grid=(Rp // _TROW,),
            in_specs=[
                pl.BlockSpec((_TROW, C), lambda i: (i, 0)),
                pl.BlockSpec((1, C), lambda i: (0, 0)),
                pl.BlockSpec((1, C), lambda i: (0, 0)),
            ],
            out_specs=pl.BlockSpec((_TROW, C), lambda i: (i, 0)),
        ),
        compiler_params=pltpu.CompilerParams(dimension_semantics=("parallel",)),
    )(xp, a2, b2)
    return out[:R]


# ---------------------------------------------------------------------------
# Layer wrappers (JAX glue)
# ---------------------------------------------------------------------------
def conv_transpose2x_bn_relu(x, w_t, gamma, beta, eps=1e-5):
    """ConvTranspose2d(Cin,Cout,4,stride=2,pad=1,bias=False) + BN(train) + ReLU.
    x: (N,H,W,Cin) NHWC; w_t: torch layout (Cin,Cout,4,4).
    Sub-pixel decomposition: one 2x2 conv per output parity (oh%2, ow%2)."""
    N, H, W, Cin = x.shape
    Cout = w_t.shape[1]
    M = N * H * W

    xb = x.astype(jnp.bfloat16)
    wb = w_t.astype(jnp.bfloat16)
    xp = jnp.pad(xb, ((0, 0), (1, 1), (1, 1), (0, 0)))

    A_list, B_list = [], []
    for ph in (0, 1):
        for pw in (0, 1):
            taps, wblk = [], []
            for dh in (0, 1):
                for dw in (0, 1):
                    taps.append(xp[:, ph + dh:ph + dh + H, pw + dw:pw + dw + W, :])
                    # flipped-kernel tap (kh, kw) = (ph + 2*dh, pw + 2*dw)
                    wblk.append(wb[:, :, 3 - (ph + 2 * dh), 3 - (pw + 2 * dw)])
            A_list.append(jnp.concatenate(taps, axis=-1).reshape(M, 4 * Cin))
            B_list.append(jnp.concatenate(wblk, axis=0))          # (4*Cin, Cout)
    A = jnp.stack(A_list, axis=0)                                  # (4, M, 4*Cin)
    B = jnp.stack(B_list, axis=0)                                  # (4, 4*Cin, Cout)

    Np = _round_up(Cout, 128)                 # lane-dense output channels
    B = _pad_to(B, 2, Np)

    y, s1, s2 = _mm_call(_mm_bn_stats_kernel, A, B, n_extra_outs=2)
    Mp = y.shape[1]

    # BatchNorm training-mode statistics over all N*(2H)*(2W) real positions.
    count = 4.0 * M
    mean = jnp.sum(s1[:, ::8, :], axis=(0, 1)) / count
    ex2 = jnp.sum(s2[:, ::8, :], axis=(0, 1)) / count
    var = jnp.maximum(ex2 - mean * mean, 0.0)          # biased variance
    gamma_p = jnp.pad(gamma, (0, Np - Cout), constant_values=1.0)
    beta_p = jnp.pad(beta, (0, Np - Cout))
    a = gamma_p * lax.rsqrt(var + eps)
    b = beta_p - mean * a

    yact = pallas_affine_relu(y.reshape(4 * Mp, Np), a, b)
    yact = yact.reshape(4, Mp, Np)[:, :M, :Cout]       # drop padded rows/lanes
    out = yact.reshape(2, 2, N, H, W, Cout)            # (ph, pw, n, h, w, c)
    out = out.transpose(2, 3, 0, 4, 1, 5).reshape(N, 2 * H, 2 * W, Cout)
    return out


def _im2col(x_pad, K, Hout, Wout):
    cols = []
    for kh in range(K):
        for kw in range(K):
            cols.append(x_pad[:, kh:kh + Hout, kw:kw + Wout, :])
    return jnp.concatenate(cols, axis=-1)


def conv7_tanh(x, w):
    """Conv2d(Cin,3,7,stride=1,pad=3,bias=False) + Tanh fused in the matmul epilogue.
    Output channels padded to 128 lanes in-kernel; the 3 real channels sliced here."""
    # TODO(synk): at production scale, move the 7x7 taps onto a grid reduction axis
    #             (shifted-window loads) instead of materializing the 49x im2col in HBM.
    N, H, W, Cin = x.shape
    Cout = w.shape[0]
    K = 7
    xb = x.astype(jnp.bfloat16)
    x_pad = jnp.pad(xb, ((0, 0), (3, 3), (3, 3), (0, 0)))
    A = _im2col(x_pad, K, H, W).reshape(1, N * H * W, K * K * Cin)
    B = jnp.transpose(w.astype(jnp.bfloat16), (2, 3, 1, 0)).reshape(K * K * Cin, Cout)
    Np = _round_up(Cout, 128)
    B = _pad_to(B, 1, Np).reshape(1, K * K * Cin, Np)

    (y,) = _mm_call(_mm_tanh_kernel, A, B, n_extra_outs=0)
    M = N * H * W
    return y[0, :M, :Cout].reshape(N, H, W, Cout)


def decoder_ir_forward(x_nchw, params):
    x = jnp.transpose(x_nchw, (0, 2, 3, 1))            # NCHW -> NHWC
    for (w_t, gamma, beta) in params["deconv"]:
        x = conv_transpose2x_bn_relu(x, w_t, gamma, beta)
    x = conv7_tanh(x, params["final_w"])
    return jnp.transpose(x, (0, 3, 1, 2))              # NHWC -> NCHW


# ---------------------------------------------------------------------------
# Pure-JAX (XLA conv) reference for a numerical sanity check.
# It emulates the kernels' bf16 input rounding (f32 math otherwise) so the
# comparison validates the structure, not the bf16 quantization itself.
# ---------------------------------------------------------------------------
def reference_forward(x_nchw, params, eps=1e-5):
    def r(t):
        return t.astype(jnp.bfloat16).astype(jnp.float32)

    x = x_nchw
    for (w_t, gamma, beta) in params["deconv"]:
        w_conv = jnp.flip(jnp.transpose(w_t, (1, 0, 2, 3)), axis=(2, 3))  # (Cout,Cin,4,4)
        y = lax.conv_general_dilated(
            r(x), r(w_conv), window_strides=(1, 1), padding=((2, 2), (2, 2)),
            lhs_dilation=(2, 2), dimension_numbers=("NCHW", "OIHW", "NCHW"),
            precision=lax.Precision.HIGHEST)
        mean = jnp.mean(y, axis=(0, 2, 3), keepdims=True)
        var = jnp.mean((y - mean) ** 2, axis=(0, 2, 3), keepdims=True)
        y = (y - mean) / jnp.sqrt(var + eps)
        y = y * gamma.reshape(1, -1, 1, 1) + beta.reshape(1, -1, 1, 1)
        x = jnp.maximum(y, 0.0)
    y = lax.conv_general_dilated(
        r(x), r(params["final_w"]), window_strides=(1, 1), padding=((3, 3), (3, 3)),
        dimension_numbers=("NCHW", "OIHW", "NCHW"), precision=lax.Precision.HIGHEST)
    return jnp.tanh(y)


# ---------------------------------------------------------------------------
# Deterministic parameter construction (shapes from Decoder_ir.__init__)
# ---------------------------------------------------------------------------
def init_params(conv_dims, key):
    params = {"deconv": []}
    c = conv_dims
    for _ in range(5):
        key, k1 = jax.random.split(key)
        w = jax.random.normal(k1, (c, c // 2, 4, 4), jnp.float32) / np.sqrt(c * 16.0)
        gamma = jnp.ones((c // 2,), jnp.float32)   # torch BatchNorm2d default init
        beta = jnp.zeros((c // 2,), jnp.float32)
        params["deconv"].append((w, gamma, beta))
        c //= 2
    key, k1 = jax.random.split(key)
    params["final_w"] = jax.random.normal(k1, (3, c, 7, 7), jnp.float32) / np.sqrt(c * 49.0)
    return params


if __name__ == "__main__":
    key = jax.random.PRNGKey(0)
    key, kx, kp = jax.random.split(key, 3)

    conv_dims = 32                       # scaled-down stand-in for the original 2048
    x = jax.random.normal(kx, (2, conv_dims, 4, 4), jnp.float32)  # NCHW input
    params = init_params(conv_dims, kp)

    fwd = jax.jit(decoder_ir_forward)
    out = jax.block_until_ready(fwd(x, params))
    assert out.shape == (2, 3, 4 * 32, 4 * 32), out.shape         # (2, 3, 128, 128)

    ref = jax.block_until_ready(jax.jit(reference_forward)(x, params))
    np.testing.assert_allclose(np.asarray(out), np.asarray(ref), rtol=1e-2, atol=1e-2)

    print("KERNEL_OK")
</pallas_src>

<mosaic_0001>
module attributes {stable_mosaic.version = 11 : i64} {
  func.func @_mm_bn_stats_kernel(%arg0: i32, %arg1: i32, %arg2: i32, %arg3: i32, %arg4: memref<1x256x128xbf16, #tpu.memory_space<vmem>>, %arg5: memref<1x128x128xbf16, #tpu.memory_space<vmem>>, %arg6: memref<1x256x128xf32, #tpu.memory_space<vmem>>, %arg7: memref<1x8x128xf32, #tpu.memory_space<vmem>>, %arg8: memref<1x8x128xf32, #tpu.memory_space<vmem>>, %arg9: memref<256x128xf32, #tpu.memory_space<vmem>>) attributes {dimension_semantics = [#tpu.dimension_semantics<parallel>, #tpu.dimension_semantics<parallel>, #tpu.dimension_semantics<parallel>, #tpu.dimension_semantics<arbitrary>], iteration_bounds = array<i64: 4, 1, 1, 1>, scalar_prefetch = 0 : i64, scratch_operands = 1 : i64, tpu.core_type = #tpu.core_type<tc>, window_params = [{transform_indices = @transform_0, window_bounds = array<i64: 1, 256, 128>}, {transform_indices = @transform_1, window_bounds = array<i64: 1, 128, 128>}, {transform_indices = @transform_2, window_bounds = array<i64: 1, 256, 128>}, {transform_indices = @transform_3, window_bounds = array<i64: 1, 8, 128>}, {transform_indices = @transform_4, window_bounds = array<i64: 1, 8, 128>}]} {
    %c0_i32 = arith.constant 0 : i32
    %0 = arith.cmpi eq, %arg3, %c0_i32 : i32
    %1 = arith.extui %0 : i1 to i32
    %c0_i32_0 = arith.constant 0 : i32
    %2 = arith.cmpi ne, %1, %c0_i32_0 : i32
    scf.if %2 {
      %cst_12 = arith.constant 0.000000e+00 : f32
      %14 = vector.broadcast %cst_12 : f32 to vector<256x128xf32>
      %c0_13 = arith.constant 0 : index
      %c0_14 = arith.constant 0 : index
      %15 = vector.load %arg9[%c0_13, %c0_14] : memref<256x128xf32, #tpu.memory_space<vmem>>, vector<256x128xf32>
      tpu.vector_store %arg9[%c0_13, %c0_14], %14 {strides = array<i32>} : memref<256x128xf32, #tpu.memory_space<vmem>>, vector<256x128xf32>,
    } else {
    }
    %c0 = arith.constant 0 : index
    %c0_1 = arith.constant 0 : index
    %3 = vector.load %arg9[%c0, %c0_1] : memref<256x128xf32, #tpu.memory_space<vmem>>, vector<256x128xf32>
    %c0_2 = arith.constant 0 : index
    %c0_3 = arith.constant 0 : index
    %c0_4 = arith.constant 0 : index
    %4 = vector.load %arg4[%c0_2, %c0_3, %c0_4] : memref<1x256x128xbf16, #tpu.memory_space<vmem>>, vector<1x256x128xbf16>
    %5 = vector.shape_cast %4 : vector<1x256x128xbf16> to vector<256x128xbf16>
    %c0_5 = arith.constant 0 : index
    %c0_6 = arith.constant 0 : index
    %c0_7 = arith.constant 0 : index
    %6 = vector.load %arg5[%c0_5, %c0_6, %c0_7] : memref<1x128x128xbf16, #tpu.memory_space<vmem>>, vector<1x128x128xbf16>
    %7 = vector.shape_cast %6 : vector<1x128x128xbf16> to vector<128x128xbf16>
    %cst = arith.constant dense<0.000000e+00> : vector<256x128xf32>
    %8 = tpu.matmul %5, %7, %cst {dimension_numbers = #tpu.dot_dimension_numbers<[1], [0], [0], [1], [0, 0, 1, 1], [], []>} : vector<256x128xbf16>, vector<128x128xbf16>, vector<256x128xf32> -> vector<256x128xf32>
    %9 = arith.addf %3, %8 : vector<256x128xf32>
    %c0_8 = arith.constant 0 : index
    %c0_9 = arith.constant 0 : index
    %10 = vector.load %arg9[%c0_8, %c0_9] : memref<256x128xf32, #tpu.memory_space<vmem>>, vector<256x128xf32>
    tpu.vector_store %arg9[%c0_8, %c0_9], %9 {strides = array<i32>} : memref<256x128xf32, #tpu.memory_space<vmem>>, vector<256x128xf32>,
    %c0_i32_10 = arith.constant 0 : i32
    %11 = arith.cmpi eq, %arg3, %c0_i32_10 : i32
    %12 = arith.extui %11 : i1 to i32
    %c0_i32_11 = arith.constant 0 : i32
    %13 = arith.cmpi ne, %12, %c0_i32_11 : i32
    scf.if %13 {
      %c0_12 = arith.constant 0 : index
      %c0_13 = arith.constant 0 : index
      %14 = vector.load %arg9[%c0_12, %c0_13] : memref<256x128xf32, #tpu.memory_space<vmem>>, vector<256x128xf32>
      %c0_14 = arith.constant 0 : index
      %c0_15 = arith.constant 0 : index
      %c0_16 = arith.constant 0 : index
      %15 = vector.load %arg6[%c0_14, %c0_15, %c0_16] : memref<1x256x128xf32, #tpu.memory_space<vmem>>, vector<1x256x128xf32>
      %16 = vector.shape_cast %15 : vector<1x256x128xf32> to vector<256x128xf32>
      %17 = vector.shape_cast %14 : vector<256x128xf32> to vector<1x256x128xf32>
      tpu.vector_store %arg6[%c0_14, %c0_15, %c0_16], %17 {strides = array<i32>} : memref<1x256x128xf32, #tpu.memory_space<vmem>>, vector<1x256x128xf32>,
      %cst_17 = arith.constant dense<0.000000e+00> : vector<128xf32>
      %18 = vector.multi_reduction <add>, %14, %cst_17 [0] : vector<256x128xf32> to vector<128xf32>
      %19 = vector.shape_cast %18 : vector<128xf32> to vector<1x128xf32>
      %20 = arith.mulf %14, %14 : vector<256x128xf32>
      %cst_18 = arith.constant dense<0.000000e+00> : vector<128xf32>
      %21 = vector.multi_reduction <add>, %20, %cst_18 [0] : vector<256x128xf32> to vector<128xf32>
      %22 = vector.shape_cast %21 : vector<128xf32> to vector<1x128xf32>
      %23 = vector.shape_cast %19 : vector<1x128xf32> to vector<1x128xf32>
      %24 = vector.broadcast %23 : vector<1x128xf32> to vector<8x128xf32>
      %c0_19 = arith.constant 0 : index
      %c0_20 = arith.constant 0 : index
      %c0_21 = arith.constant 0 : index
      %25 = vector.load %arg7[%c0_19, %c0_20, %c0_21] : memref<1x8x128xf32, #tpu.memory_space<vmem>>, vector<1x8x128xf32>
      %26 = vector.shape_cast %25 : vector<1x8x128xf32> to vector<8x128xf32>
      %27 = vector.shape_cast %24 : vector<8x128xf32> to vector<1x8x128xf32>
      tpu.vector_store %arg7[%c0_19, %c0_20, %c0_21], %27 {strides = array<i32>} : memref<1x8x128xf32, #tpu.memory_space<vmem>>, vector<1x8x128xf32>,
      %28 = vector.shape_cast %22 : vector<1x128xf32> to vector<1x128xf32>
      %29 = vector.broadcast %28 : vector<1x128xf32> to vector<8x128xf32>
      %c0_22 = arith.constant 0 : index
      %c0_23 = arith.constant 0 : index
      %c0_24 = arith.constant 0 : index
      %30 = vector.load %arg8[%c0_22, %c0_23, %c0_24] : memref<1x8x128xf32, #tpu.memory_space<vmem>>, vector<1x8x128xf32>
      %31 = vector.shape_cast %30 : vector<1x8x128xf32> to vector<8x128xf32>
      %32 = vector.shape_cast %29 : vector<8x128xf32> to vector<1x8x128xf32>
      tpu.vector_store %arg8[%c0_22, %c0_23, %c0_24], %32 {strides = array<i32>} : memref<1x8x128xf32, #tpu.memory_space<vmem>>, vector<1x8x128xf32>,
    } else {
    }
    return
  }
  func.func @transform_0(%arg0: i32, %arg1: i32, %arg2: i32, %arg3: i32) -> (i32, i32, i32) {
    %c0_i32 = arith.constant 0 : i32
    return %arg0, %arg1, %arg3 : i32, i32, i32
  }
  func.func @transform_1(%arg0: i32, %arg1: i32, %arg2: i32, %arg3: i32) -> (i32, i32, i32) {
    %c0_i32 = arith.constant 0 : i32
    return %arg0, %arg3, %arg2 : i32, i32, i32
  }
  func.func @transform_2(%arg0: i32, %arg1: i32, %arg2: i32, %arg3: i32) -> (i32, i32, i32) {
    %c0_i32 = arith.constant 0 : i32
    return %arg0, %arg1, %arg2 : i32, i32, i32
  }
  func.func @transform_3(%arg0: i32, %arg1: i32, %arg2: i32, %arg3: i32) -> (i32, i32, i32) {
    %c0_i32 = arith.constant 0 : i32
    return %arg0, %arg1, %arg2 : i32, i32, i32
  }
  func.func @transform_4(%arg0: i32, %arg1: i32, %arg2: i32, %arg3: i32) -> (i32, i32, i32) {
    %c0_i32 = arith.constant 0 : i32
    return %arg0, %arg1, %arg2 : i32, i32, i32
  }
}

module attributes {stable_mosaic.version = 11 : i64} {
  func.func @_affine_relu_kernel(%arg0: i32, %arg1: memref<512x128xf32, #tpu.memory_space<vmem>>, %arg2: memref<1x128xf32, #tpu.memory_space<vmem>>, %arg3: memref<1x128xf32, #tpu.memory_space<vmem>>, %arg4: memref<512x128xf32, #tpu.memory_space<vmem>>) attributes {dimension_semantics = [#tpu.dimension_semantics<parallel>], iteration_bounds = array<i64: 2>, scalar_prefetch = 0 : i64, scratch_operands = 0 : i64, tpu.core_type = #tpu.core_type<tc>, window_params = [{transform_indices = @transform_0, window_bounds = array<i64: 512, 128>}, {pipeline_mode = #tpu.pipeline_mode<synchronous>, transform_indices = @transform_1, window_bounds = array<i64: 1, 128>}, {pipeline_mode = #tpu.pipeline_mode<synchronous>, transform_indices = @transform_2, window_bounds = array<i64: 1, 128>}, {transform_indices = @transform_3, window_bounds = array<i64: 512, 128>}]} {
    %c0 = arith.constant 0 : index
    %c0_0 = arith.constant 0 : index
    %0 = vector.load %arg1[%c0, %c0_0] : memref<512x128xf32, #tpu.memory_space<vmem>>, vector<512x128xf32>
    %c0_1 = arith.constant 0 : index
    %c0_2 = arith.constant 0 : index
    %1 = vector.load %arg2[%c0_1, %c0_2] : memref<1x128xf32, #tpu.memory_space<vmem>>, vector<1x128xf32>
    %2 = vector.broadcast %1 : vector<1x128xf32> to vector<512x128xf32>
    %3 = arith.mulf %0, %2 : vector<512x128xf32>
    %c0_3 = arith.constant 0 : index
    %c0_4 = arith.constant 0 : index
    %4 = vector.load %arg3[%c0_3, %c0_4] : memref<1x128xf32, #tpu.memory_space<vmem>>, vector<1x128xf32>
    %5 = vector.broadcast %4 : vector<1x128xf32> to vector<512x128xf32>
    %6 = arith.addf %3, %5 : vector<512x128xf32>
    %cst = arith.constant 0.000000e+00 : f32
    %7 = vector.broadcast %cst : f32 to vector<512x128xf32>
    %8 = arith.maximumf %6, %7 : vector<512x128xf32>
    %c0_5 = arith.constant 0 : index
    %c0_6 = arith.constant 0 : index
    %9 = vector.load %arg4[%c0_5, %c0_6] : memref<512x128xf32, #tpu.memory_space<vmem>>, vector<512x128xf32>
    tpu.vector_store %arg4[%c0_5, %c0_6], %8 {strides = array<i32>} : memref<512x128xf32, #tpu.memory_space<vmem>>, vector<512x128xf32>,
    return
  }
  func.func @transform_0(%arg0: i32) -> (i32, i32) {
    %c0_i32 = arith.constant 0 : i32
    %c0_i32_0 = arith.constant 0 : i32
    return %arg0, %c0_i32 : i32, i32
  }
  func.func @transform_1(%arg0: i32) -> (i32, i32) {
    %c0_i32 = arith.constant 0 : i32
    %c0_i32_0 = arith.constant 0 : i32
    %c0_i32_1 = arith.constant 0 : i32
    return %c0_i32, %c0_i32_0 : i32, i32
  }
  func.func @transform_2(%arg0: i32) -> (i32, i32) {
    %c0_i32 = arith.constant 0 : i32
    %c0_i32_0 = arith.constant 0 : i32
    %c0_i32_1 = arith.constant 0 : i32
    return %c0_i32, %c0_i32_0 : i32, i32
  }
  func.func @transform_3(%arg0: i32) -> (i32, i32) {
    %c0_i32 = arith.constant 0 : i32
    %c0_i32_0 = arith.constant 0 : i32
    return %arg0, %c0_i32 : i32, i32
  }
}

module attributes {stable_mosaic.version = 11 : i64} {
  func.func @_mm_bn_stats_kernel(%arg0: i32, %arg1: i32, %arg2: i32, %arg3: i32, %arg4: memref<1x256x64xbf16, #tpu.memory_space<vmem>>, %arg5: memref<1x64x128xbf16, #tpu.memory_space<vmem>>, %arg6: memref<1x256x128xf32, #tpu.memory_space<vmem>>, %arg7: memref<1x8x128xf32, #tpu.memory_space<vmem>>, %arg8: memref<1x8x128xf32, #tpu.memory_space<vmem>>, %arg9: memref<256x128xf32, #tpu.memory_space<vmem>>) attributes {dimension_semantics = [#tpu.dimension_semantics<parallel>, #tpu.dimension_semantics<parallel>, #tpu.dimension_semantics<parallel>, #tpu.dimension_semantics<arbitrary>], iteration_bounds = array<i64: 4, 1, 1, 1>, scalar_prefetch = 0 : i64, scratch_operands = 1 : i64, tpu.core_type = #tpu.core_type<tc>, window_params = [{transform_indices = @transform_0, window_bounds = array<i64: 1, 256, 64>}, {transform_indices = @transform_1, window_bounds = array<i64: 1, 64, 128>}, {transform_indices = @transform_2, window_bounds = array<i64: 1, 256, 128>}, {transform_indices = @transform_3, window_bounds = array<i64: 1, 8, 128>}, {transform_indices = @transform_4, window_bounds = array<i64: 1, 8, 128>}]} {
    %c0_i32 = arith.constant 0 : i32
    %0 = arith.cmpi eq, %arg3, %c0_i32 : i32
    %1 = arith.extui %0 : i1 to i32
    %c0_i32_0 = arith.constant 0 : i32
    %2 = arith.cmpi ne, %1, %c0_i32_0 : i32
    scf.if %2 {
      %cst_12 = arith.constant 0.000000e+00 : f32
      %14 = vector.broadcast %cst_12 : f32 to vector<256x128xf32>
      %c0_13 = arith.constant 0 : index
      %c0_14 = arith.constant 0 : index
      %15 = vector.load %arg9[%c0_13, %c0_14] : memref<256x128xf32, #tpu.memory_space<vmem>>, vector<256x128xf32>
      tpu.vector_store %arg9[%c0_13, %c0_14], %14 {strides = array<i32>} : memref<256x128xf32, #tpu.memory_space<vmem>>, vector<256x128xf32>,
    } else {
    }
    %c0 = arith.constant 0 : index
    %c0_1 = arith.constant 0 : index
    %3 = vector.load %arg9[%c0, %c0_1] : memref<256x128xf32, #tpu.memory_space<vmem>>, vector<256x128xf32>
    %c0_2 = arith.constant 0 : index
    %c0_3 = arith.constant 0 : index
    %c0_4 = arith.constant 0 : index
    %4 = vector.load %arg4[%c0_2, %c0_3, %c0_4] : memref<1x256x64xbf16, #tpu.memory_space<vmem>>, vector<1x256x64xbf16>
    %5 = vector.shape_cast %4 : vector<1x256x64xbf16> to vector<256x64xbf16>
    %c0_5 = arith.constant 0 : index
    %c0_6 = arith.constant 0 : index
    %c0_7 = arith.constant 0 : index
    %6 = vector.load %arg5[%c0_5, %c0_6, %c0_7] : memref<1x64x128xbf16, #tpu.memory_space<vmem>>, vector<1x64x128xbf16>
    %7 = vector.shape_cast %6 : vector<1x64x128xbf16> to vector<64x128xbf16>
    %cst = arith.constant dense<0.000000e+00> : vector<256x128xf32>
    %8 = tpu.matmul %5, %7, %cst {dimension_numbers = #tpu.dot_dimension_numbers<[1], [0], [0], [1], [0, 0, 1, 1], [], []>} : vector<256x64xbf16>, vector<64x128xbf16>, vector<256x128xf32> -> vector<256x128xf32>
    %9 = arith.addf %3, %8 : vector<256x128xf32>
    %c0_8 = arith.constant 0 : index
    %c0_9 = arith.constant 0 : index
    %10 = vector.load %arg9[%c0_8, %c0_9] : memref<256x128xf32, #tpu.memory_space<vmem>>, vector<256x128xf32>
    tpu.vector_store %arg9[%c0_8, %c0_9], %9 {strides = array<i32>} : memref<256x128xf32, #tpu.memory_space<vmem>>, vector<256x128xf32>,
    %c0_i32_10 = arith.constant 0 : i32
    %11 = arith.cmpi eq, %arg3, %c0_i32_10 : i32
    %12 = arith.extui %11 : i1 to i32
    %c0_i32_11 = arith.constant 0 : i32
    %13 = arith.cmpi ne, %12, %c0_i32_11 : i32
    scf.if %13 {
      %c0_12 = arith.constant 0 : index
      %c0_13 = arith.constant 0 : index
      %14 = vector.load %arg9[%c0_12, %c0_13] : memref<256x128xf32, #tpu.memory_space<vmem>>, vector<256x128xf32>
      %c0_14 = arith.constant 0 : index
      %c0_15 = arith.constant 0 : index
      %c0_16 = arith.constant 0 : index
      %15 = vector.load %arg6[%c0_14, %c0_15, %c0_16] : memref<1x256x128xf32, #tpu.memory_space<vmem>>, vector<1x256x128xf32>
      %16 = vector.shape_cast %15 : vector<1x256x128xf32> to vector<256x128xf32>
      %17 = vector.shape_cast %14 : vector<256x128xf32> to vector<1x256x128xf32>
      tpu.vector_store %arg6[%c0_14, %c0_15, %c0_16], %17 {strides = array<i32>} : memref<1x256x128xf32, #tpu.memory_space<vmem>>, vector<1x256x128xf32>,
      %cst_17 = arith.constant dense<0.000000e+00> : vector<128xf32>
      %18 = vector.multi_reduction <add>, %14, %cst_17 [0] : vector<256x128xf32> to vector<128xf32>
      %19 = vector.shape_cast %18 : vector<128xf32> to vector<1x128xf32>
      %20 = arith.mulf %14, %14 : vector<256x128xf32>
      %cst_18 = arith.constant dense<0.000000e+00> : vector<128xf32>
      %21 = vector.multi_reduction <add>, %20, %cst_18 [0] : vector<256x128xf32> to vector<128xf32>
      %22 = vector.shape_cast %21 : vector<128xf32> to vector<1x128xf32>
      %23 = vector.shape_cast %19 : vector<1x128xf32> to vector<1x128xf32>
      %24 = vector.broadcast %23 : vector<1x128xf32> to vector<8x128xf32>
      %c0_19 = arith.constant 0 : index
      %c0_20 = arith.constant 0 : index
      %c0_21 = arith.constant 0 : index
      %25 = vector.load %arg7[%c0_19, %c0_20, %c0_21] : memref<1x8x128xf32, #tpu.memory_space<vmem>>, vector<1x8x128xf32>
      %26 = vector.shape_cast %25 : vector<1x8x128xf32> to vector<8x128xf32>
      %27 = vector.shape_cast %24 : vector<8x128xf32> to vector<1x8x128xf32>
      tpu.vector_store %arg7[%c0_19, %c0_20, %c0_21], %27 {strides = array<i32>} : memref<1x8x128xf32, #tpu.memory_space<vmem>>, vector<1x8x128xf32>,
      %28 = vector.shape_cast %22 : vector<1x128xf32> to vector<1x128xf32>
      %29 = vector.broadcast %28 : vector<1x128xf32> to vector<8x128xf32>
      %c0_22 = arith.constant 0 : index
      %c0_23 = arith.constant 0 : index
      %c0_24 = arith.constant 0 : index
      %30 = vector.load %arg8[%c0_22, %c0_23, %c0_24] : memref<1x8x128xf32, #tpu.memory_space<vmem>>, vector<1x8x128xf32>
      %31 = vector.shape_cast %30 : vector<1x8x128xf32> to vector<8x128xf32>
      %32 = vector.shape_cast %29 : vector<8x128xf32> to vector<1x8x128xf32>
      tpu.vector_store %arg8[%c0_22, %c0_23, %c0_24], %32 {strides = array<i32>} : memref<1x8x128xf32, #tpu.memory_space<vmem>>, vector<1x8x128xf32>,
    } else {
    }
    return
  }
  func.func @transform_0(%arg0: i32, %arg1: i32, %arg2: i32, %arg3: i32) -> (i32, i32, i32) {
    %c0_i32 = arith.constant 0 : i32
    return %arg0, %arg1, %arg3 : i32, i32, i32
  }
  func.func @transform_1(%arg0: i32, %arg1: i32, %arg2: i32, %arg3: i32) -> (i32, i32, i32) {
    %c0_i32 = arith.constant 0 : i32
    return %arg0, %arg3, %arg2 : i32, i32, i32
  }
  func.func @transform_2(%arg0: i32, %arg1: i32, %arg2: i32, %arg3: i32) -> (i32, i32, i32) {
    %c0_i32 = arith.constant 0 : i32
    return %arg0, %arg1, %arg2 : i32, i32, i32
  }
  func.func @transform_3(%arg0: i32, %arg1: i32, %arg2: i32, %arg3: i32) -> (i32, i32, i32) {
    %c0_i32 = arith.constant 0 : i32
    return %arg0, %arg1, %arg2 : i32, i32, i32
  }
  func.func @transform_4(%arg0: i32, %arg1: i32, %arg2: i32, %arg3: i32) -> (i32, i32, i32) {
    %c0_i32 = arith.constant 0 : i32
    return %arg0, %arg1, %arg2 : i32, i32, i32
  }
}

module attributes {stable_mosaic.version = 11 : i64} {
  func.func @_mm_bn_stats_kernel(%arg0: i32, %arg1: i32, %arg2: i32, %arg3: i32, %arg4: memref<1x256x32xbf16, #tpu.memory_space<vmem>>, %arg5: memref<1x32x128xbf16, #tpu.memory_space<vmem>>, %arg6: memref<1x256x128xf32, #tpu.memory_space<vmem>>, %arg7: memref<1x8x128xf32, #tpu.memory_space<vmem>>, %arg8: memref<1x8x128xf32, #tpu.memory_space<vmem>>, %arg9: memref<256x128xf32, #tpu.memory_space<vmem>>) attributes {dimension_semantics = [#tpu.dimension_semantics<parallel>, #tpu.dimension_semantics<parallel>, #tpu.dimension_semantics<parallel>, #tpu.dimension_semantics<arbitrary>], iteration_bounds = array<i64: 4, 2, 1, 1>, scalar_prefetch = 0 : i64, scratch_operands = 1 : i64, tpu.core_type = #tpu.core_type<tc>, window_params = [{transform_indices = @transform_0, window_bounds = array<i64: 1, 256, 32>}, {transform_indices = @transform_1, window_bounds = array<i64: 1, 32, 128>}, {transform_indices = @transform_2, window_bounds = array<i64: 1, 256, 128>}, {transform_indices = @transform_3, window_bounds = array<i64: 1, 8, 128>}, {transform_indices = @transform_4, window_bounds = array<i64: 1, 8, 128>}]} {
    %c0_i32 = arith.constant 0 : i32
    %0 = arith.cmpi eq, %arg3, %c0_i32 : i32
    %1 = arith.extui %0 : i1 to i32
    %c0_i32_0 = arith.constant 0 : i32
    %2 = arith.cmpi ne, %1, %c0_i32_0 : i32
    scf.if %2 {
      %cst_12 = arith.constant 0.000000e+00 : f32
      %14 = vector.broadcast %cst_12 : f32 to vector<256x128xf32>
      %c0_13 = arith.constant 0 : index
      %c0_14 = arith.constant 0 : index
      %15 = vector.load %arg9[%c0_13, %c0_14] : memref<256x128xf32, #tpu.memory_space<vmem>>, vector<256x128xf32>
      tpu.vector_store %arg9[%c0_13, %c0_14], %14 {strides = array<i32>} : memref<256x128xf32, #tpu.memory_space<vmem>>, vector<256x128xf32>,
    } else {
    }
    %c0 = arith.constant 0 : index
    %c0_1 = arith.constant 0 : index
    %3 = vector.load %arg9[%c0, %c0_1] : memref<256x128xf32, #tpu.memory_space<vmem>>, vector<256x128xf32>
    %c0_2 = arith.constant 0 : index
    %c0_3 = arith.constant 0 : index
    %c0_4 = arith.constant 0 : index
    %4 = vector.load %arg4[%c0_2, %c0_3, %c0_4] : memref<1x256x32xbf16, #tpu.memory_space<vmem>>, vector<1x256x32xbf16>
    %5 = vector.shape_cast %4 : vector<1x256x32xbf16> to vector<256x32xbf16>
    %c0_5 = arith.constant 0 : index
    %c0_6 = arith.constant 0 : index
    %c0_7 = arith.constant 0 : index
    %6 = vector.load %arg5[%c0_5, %c0_6, %c0_7] : memref<1x32x128xbf16, #tpu.memory_space<vmem>>, vector<1x32x128xbf16>
    %7 = vector.shape_cast %6 : vector<1x32x128xbf16> to vector<32x128xbf16>
    %cst = arith.constant dense<0.000000e+00> : vector<256x128xf32>
    %8 = tpu.matmul %5, %7, %cst {dimension_numbers = #tpu.dot_dimension_numbers<[1], [0], [0], [1], [0, 0, 1, 1], [], []>} : vector<256x32xbf16>, vector<32x128xbf16>, vector<256x128xf32> -> vector<256x128xf32>
    %9 = arith.addf %3, %8 : vector<256x128xf32>
    %c0_8 = arith.constant 0 : index
    %c0_9 = arith.constant 0 : index
    %10 = vector.load %arg9[%c0_8, %c0_9] : memref<256x128xf32, #tpu.memory_space<vmem>>, vector<256x128xf32>
    tpu.vector_store %arg9[%c0_8, %c0_9], %9 {strides = array<i32>} : memref<256x128xf32, #tpu.memory_space<vmem>>, vector<256x128xf32>,
    %c0_i32_10 = arith.constant 0 : i32
    %11 = arith.cmpi eq, %arg3, %c0_i32_10 : i32
    %12 = arith.extui %11 : i1 to i32
    %c0_i32_11 = arith.constant 0 : i32
    %13 = arith.cmpi ne, %12, %c0_i32_11 : i32
    scf.if %13 {
      %c0_12 = arith.constant 0 : index
      %c0_13 = arith.constant 0 : index
      %14 = vector.load %arg9[%c0_12, %c0_13] : memref<256x128xf32, #tpu.memory_space<vmem>>, vector<256x128xf32>
      %c0_14 = arith.constant 0 : index
      %c0_15 = arith.constant 0 : index
      %c0_16 = arith.constant 0 : index
      %15 = vector.load %arg6[%c0_14, %c0_15, %c0_16] : memref<1x256x128xf32, #tpu.memory_space<vmem>>, vector<1x256x128xf32>
      %16 = vector.shape_cast %15 : vector<1x256x128xf32> to vector<256x128xf32>
      %17 = vector.shape_cast %14 : vector<256x128xf32> to vector<1x256x128xf32>
      tpu.vector_store %arg6[%c0_14, %c0_15, %c0_16], %17 {strides = array<i32>} : memref<1x256x128xf32, #tpu.memory_space<vmem>>, vector<1x256x128xf32>,
      %cst_17 = arith.constant dense<0.000000e+00> : vector<128xf32>
      %18 = vector.multi_reduction <add>, %14, %cst_17 [0] : vector<256x128xf32> to vector<128xf32>
      %19 = vector.shape_cast %18 : vector<128xf32> to vector<1x128xf32>
      %20 = arith.mulf %14, %14 : vector<256x128xf32>
      %cst_18 = arith.constant dense<0.000000e+00> : vector<128xf32>
      %21 = vector.multi_reduction <add>, %20, %cst_18 [0] : vector<256x128xf32> to vector<128xf32>
      %22 = vector.shape_cast %21 : vector<128xf32> to vector<1x128xf32>
      %23 = vector.shape_cast %19 : vector<1x128xf32> to vector<1x128xf32>
      %24 = vector.broadcast %23 : vector<1x128xf32> to vector<8x128xf32>
      %c0_19 = arith.constant 0 : index
      %c0_20 = arith.constant 0 : index
      %c0_21 = arith.constant 0 : index
      %25 = vector.load %arg7[%c0_19, %c0_20, %c0_21] : memref<1x8x128xf32, #tpu.memory_space<vmem>>, vector<1x8x128xf32>
      %26 = vector.shape_cast %25 : vector<1x8x128xf32> to vector<8x128xf32>
      %27 = vector.shape_cast %24 : vector<8x128xf32> to vector<1x8x128xf32>
      tpu.vector_store %arg7[%c0_19, %c0_20, %c0_21], %27 {strides = array<i32>} : memref<1x8x128xf32, #tpu.memory_space<vmem>>, vector<1x8x128xf32>,
      %28 = vector.shape_cast %22 : vector<1x128xf32> to vector<1x128xf32>
      %29 = vector.broadcast %28 : vector<1x128xf32> to vector<8x128xf32>
      %c0_22 = arith.constant 0 : index
      %c0_23 = arith.constant 0 : index
      %c0_24 = arith.constant 0 : index
      %30 = vector.load %arg8[%c0_22, %c0_23, %c0_24] : memref<1x8x128xf32, #tpu.memory_space<vmem>>, vector<1x8x128xf32>
      %31 = vector.shape_cast %30 : vector<1x8x128xf32> to vector<8x128xf32>
      %32 = vector.shape_cast %29 : vector<8x128xf32> to vector<1x8x128xf32>
      tpu.vector_store %arg8[%c0_22, %c0_23, %c0_24], %32 {strides = array<i32>} : memref<1x8x128xf32, #tpu.memory_space<vmem>>, vector<1x8x128xf32>,
    } else {
    }
    return
  }
  func.func @transform_0(%arg0: i32, %arg1: i32, %arg2: i32, %arg3: i32) -> (i32, i32, i32) {
    %c0_i32 = arith.constant 0 : i32
    return %arg0, %arg1, %arg3 : i32, i32, i32
  }
  func.func @transform_1(%arg0: i32, %arg1: i32, %arg2: i32, %arg3: i32) -> (i32, i32, i32) {
    %c0_i32 = arith.constant 0 : i32
    return %arg0, %arg3, %arg2 : i32, i32, i32
  }
  func.func @transform_2(%arg0: i32, %arg1: i32, %arg2: i32, %arg3: i32) -> (i32, i32, i32) {
    %c0_i32 = arith.constant 0 : i32
    return %arg0, %arg1, %arg2 : i32, i32, i32
  }
  func.func @transform_3(%arg0: i32, %arg1: i32, %arg2: i32, %arg3: i32) -> (i32, i32, i32) {
    %c0_i32 = arith.constant 0 : i32
    return %arg0, %arg1, %arg2 : i32, i32, i32
  }
  func.func @transform_4(%arg0: i32, %arg1: i32, %arg2: i32, %arg3: i32) -> (i32, i32, i32) {
    %c0_i32 = arith.constant 0 : i32
    return %arg0, %arg1, %arg2 : i32, i32, i32
  }
}

module attributes {stable_mosaic.version = 11 : i64} {
  func.func @_affine_relu_kernel(%arg0: i32, %arg1: memref<512x128xf32, #tpu.memory_space<vmem>>, %arg2: memref<1x128xf32, #tpu.memory_space<vmem>>, %arg3: memref<1x128xf32, #tpu.memory_space<vmem>>, %arg4: memref<512x128xf32, #tpu.memory_space<vmem>>) attributes {dimension_semantics = [#tpu.dimension_semantics<parallel>], iteration_bounds = array<i64: 4>, scalar_prefetch = 0 : i64, scratch_operands = 0 : i64, tpu.core_type = #tpu.core_type<tc>, window_params = [{transform_indices = @transform_0, window_bounds = array<i64: 512, 128>}, {pipeline_mode = #tpu.pipeline_mode<synchronous>, transform_indices = @transform_1, window_bounds = array<i64: 1, 128>}, {pipeline_mode = #tpu.pipeline_mode<synchronous>, transform_indices = @transform_2, window_bounds = array<i64: 1, 128>}, {transform_indices = @transform_3, window_bounds = array<i64: 512, 128>}]} {
    %c0 = arith.constant 0 : index
    %c0_0 = arith.constant 0 : index
    %0 = vector.load %arg1[%c0, %c0_0] : memref<512x128xf32, #tpu.memory_space<vmem>>, vector<512x128xf32>
    %c0_1 = arith.constant 0 : index
    %c0_2 = arith.constant 0 : index
    %1 = vector.load %arg2[%c0_1, %c0_2] : memref<1x128xf32, #tpu.memory_space<vmem>>, vector<1x128xf32>
    %2 = vector.broadcast %1 : vector<1x128xf32> to vector<512x128xf32>
    %3 = arith.mulf %0, %2 : vector<512x128xf32>
    %c0_3 = arith.constant 0 : index
    %c0_4 = arith.constant 0 : index
    %4 = vector.load %arg3[%c0_3, %c0_4] : memref<1x128xf32, #tpu.memory_space<vmem>>, vector<1x128xf32>
    %5 = vector.broadcast %4 : vector<1x128xf32> to vector<512x128xf32>
    %6 = arith.addf %3, %5 : vector<512x128xf32>
    %cst = arith.constant 0.000000e+00 : f32
    %7 = vector.broadcast %cst : f32 to vector<512x128xf32>
    %8 = arith.maximumf %6, %7 : vector<512x128xf32>
    %c0_5 = arith.constant 0 : index
    %c0_6 = arith.constant 0 : index
    %9 = vector.load %arg4[%c0_5, %c0_6] : memref<512x128xf32, #tpu.memory_space<vmem>>, vector<512x128xf32>
    tpu.vector_store %arg4[%c0_5, %c0_6], %8 {strides = array<i32>} : memref<512x128xf32, #tpu.memory_space<vmem>>, vector<512x128xf32>,
    return
  }
  func.func @transform_0(%arg0: i32) -> (i32, i32) {
    %c0_i32 = arith.constant 0 : i32
    %c0_i32_0 = arith.constant 0 : i32
    return %arg0, %c0_i32 : i32, i32
  }
  func.func @transform_1(%arg0: i32) -> (i32, i32) {
    %c0_i32 = arith.constant 0 : i32
    %c0_i32_0 = arith.constant 0 : i32
    %c0_i32_1 = arith.constant 0 : i32
    return %c0_i32, %c0_i32_0 : i32, i32
  }
  func.func @transform_2(%arg0: i32) -> (i32, i32) {
    %c0_i32 = arith.constant 0 : i32
    %c0_i32_0 = arith.constant 0 : i32
    %c0_i32_1 = arith.constant 0 : i32
    return %c0_i32, %c0_i32_0 : i32, i32
  }
  func.func @transform_3(%arg0: i32) -> (i32, i32) {
    %c0_i32 = arith.constant 0 : i32
    %c0_i32_0 = arith.constant 0 : i32
    return %arg0, %c0_i32 : i32, i32
  }
}

module attributes {stable_mosaic.version = 11 : i64} {
  func.func @_mm_bn_stats_kernel(%arg0: i32, %arg1: i32, %arg2: i32, %arg3: i32, %arg4: memref<1x256x16xbf16, #tpu.memory_space<vmem>>, %arg5: memref<1x16x128xbf16, #tpu.memory_space<vmem>>, %arg6: memref<1x256x128xf32, #tpu.memory_space<vmem>>, %arg7: memref<1x8x128xf32, #tpu.memory_space<vmem>>, %arg8: memref<1x8x128xf32, #tpu.memory_space<vmem>>, %arg9: memref<256x128xf32, #tpu.memory_space<vmem>>) attributes {dimension_semantics = [#tpu.dimension_semantics<parallel>, #tpu.dimension_semantics<parallel>, #tpu.dimension_semantics<parallel>, #tpu.dimension_semantics<arbitrary>], iteration_bounds = array<i64: 4, 8, 1, 1>, scalar_prefetch = 0 : i64, scratch_operands = 1 : i64, tpu.core_type = #tpu.core_type<tc>, window_params = [{transform_indices = @transform_0, window_bounds = array<i64: 1, 256, 16>}, {transform_indices = @transform_1, window_bounds = array<i64: 1, 16, 128>}, {transform_indices = @transform_2, window_bounds = array<i64: 1, 256, 128>}, {transform_indices = @transform_3, window_bounds = array<i64: 1, 8, 128>}, {transform_indices = @transform_4, window_bounds = array<i64: 1, 8, 128>}]} {
    %c0_i32 = arith.constant 0 : i32
    %0 = arith.cmpi eq, %arg3, %c0_i32 : i32
    %1 = arith.extui %0 : i1 to i32
    %c0_i32_0 = arith.constant 0 : i32
    %2 = arith.cmpi ne, %1, %c0_i32_0 : i32
    scf.if %2 {
      %cst_12 = arith.constant 0.000000e+00 : f32
      %14 = vector.broadcast %cst_12 : f32 to vector<256x128xf32>
      %c0_13 = arith.constant 0 : index
      %c0_14 = arith.constant 0 : index
      %15 = vector.load %arg9[%c0_13, %c0_14] : memref<256x128xf32, #tpu.memory_space<vmem>>, vector<256x128xf32>
      tpu.vector_store %arg9[%c0_13, %c0_14], %14 {strides = array<i32>} : memref<256x128xf32, #tpu.memory_space<vmem>>, vector<256x128xf32>,
    } else {
    }
    %c0 = arith.constant 0 : index
    %c0_1 = arith.constant 0 : index
    %3 = vector.load %arg9[%c0, %c0_1] : memref<256x128xf32, #tpu.memory_space<vmem>>, vector<256x128xf32>
    %c0_2 = arith.constant 0 : index
    %c0_3 = arith.constant 0 : index
    %c0_4 = arith.constant 0 : index
    %4 = vector.load %arg4[%c0_2, %c0_3, %c0_4] : memref<1x256x16xbf16, #tpu.memory_space<vmem>>, vector<1x256x16xbf16>
    %5 = vector.shape_cast %4 : vector<1x256x16xbf16> to vector<256x16xbf16>
    %c0_5 = arith.constant 0 : index
    %c0_6 = arith.constant 0 : index
    %c0_7 = arith.constant 0 : index
    %6 = vector.load %arg5[%c0_5, %c0_6, %c0_7] : memref<1x16x128xbf16, #tpu.memory_space<vmem>>, vector<1x16x128xbf16>
    %7 = vector.shape_cast %6 : vector<1x16x128xbf16> to vector<16x128xbf16>
    %cst = arith.constant dense<0.000000e+00> : vector<256x128xf32>
    %8 = tpu.matmul %5, %7, %cst {dimension_numbers = #tpu.dot_dimension_numbers<[1], [0], [0], [1], [0, 0, 1, 1], [], []>} : vector<256x16xbf16>, vector<16x128xbf16>, vector<256x128xf32> -> vector<256x128xf32>
    %9 = arith.addf %3, %8 : vector<256x128xf32>
    %c0_8 = arith.constant 0 : index
    %c0_9 = arith.constant 0 : index
    %10 = vector.load %arg9[%c0_8, %c0_9] : memref<256x128xf32, #tpu.memory_space<vmem>>, vector<256x128xf32>
    tpu.vector_store %arg9[%c0_8, %c0_9], %9 {strides = array<i32>} : memref<256x128xf32, #tpu.memory_space<vmem>>, vector<256x128xf32>,
    %c0_i32_10 = arith.constant 0 : i32
    %11 = arith.cmpi eq, %arg3, %c0_i32_10 : i32
    %12 = arith.extui %11 : i1 to i32
    %c0_i32_11 = arith.constant 0 : i32
    %13 = arith.cmpi ne, %12, %c0_i32_11 : i32
    scf.if %13 {
      %c0_12 = arith.constant 0 : index
      %c0_13 = arith.constant 0 : index
      %14 = vector.load %arg9[%c0_12, %c0_13] : memref<256x128xf32, #tpu.memory_space<vmem>>, vector<256x128xf32>
      %c0_14 = arith.constant 0 : index
      %c0_15 = arith.constant 0 : index
      %c0_16 = arith.constant 0 : index
      %15 = vector.load %arg6[%c0_14, %c0_15, %c0_16] : memref<1x256x128xf32, #tpu.memory_space<vmem>>, vector<1x256x128xf32>
      %16 = vector.shape_cast %15 : vector<1x256x128xf32> to vector<256x128xf32>
      %17 = vector.shape_cast %14 : vector<256x128xf32> to vector<1x256x128xf32>
      tpu.vector_store %arg6[%c0_14, %c0_15, %c0_16], %17 {strides = array<i32>} : memref<1x256x128xf32, #tpu.memory_space<vmem>>, vector<1x256x128xf32>,
      %cst_17 = arith.constant dense<0.000000e+00> : vector<128xf32>
      %18 = vector.multi_reduction <add>, %14, %cst_17 [0] : vector<256x128xf32> to vector<128xf32>
      %19 = vector.shape_cast %18 : vector<128xf32> to vector<1x128xf32>
      %20 = arith.mulf %14, %14 : vector<256x128xf32>
      %cst_18 = arith.constant dense<0.000000e+00> : vector<128xf32>
      %21 = vector.multi_reduction <add>, %20, %cst_18 [0] : vector<256x128xf32> to vector<128xf32>
      %22 = vector.shape_cast %21 : vector<128xf32> to vector<1x128xf32>
      %23 = vector.shape_cast %19 : vector<1x128xf32> to vector<1x128xf32>
      %24 = vector.broadcast %23 : vector<1x128xf32> to vector<8x128xf32>
      %c0_19 = arith.constant 0 : index
      %c0_20 = arith.constant 0 : index
      %c0_21 = arith.constant 0 : index
      %25 = vector.load %arg7[%c0_19, %c0_20, %c0_21] : memref<1x8x128xf32, #tpu.memory_space<vmem>>, vector<1x8x128xf32>
      %26 = vector.shape_cast %25 : vector<1x8x128xf32> to vector<8x128xf32>
      %27 = vector.shape_cast %24 : vector<8x128xf32> to vector<1x8x128xf32>
      tpu.vector_store %arg7[%c0_19, %c0_20, %c0_21], %27 {strides = array<i32>} : memref<1x8x128xf32, #tpu.memory_space<vmem>>, vector<1x8x128xf32>,
      %28 = vector.shape_cast %22 : vector<1x128xf32> to vector<1x128xf32>
      %29 = vector.broadcast %28 : vector<1x128xf32> to vector<8x128xf32>
      %c0_22 = arith.constant 0 : index
      %c0_23 = arith.constant 0 : index
      %c0_24 = arith.constant 0 : index
      %30 = vector.load %arg8[%c0_22, %c0_23, %c0_24] : memref<1x8x128xf32, #tpu.memory_space<vmem>>, vector<1x8x128xf32>
      %31 = vector.shape_cast %30 : vector<1x8x128xf32> to vector<8x128xf32>
      %32 = vector.shape_cast %29 : vector<8x128xf32> to vector<1x8x128xf32>
      tpu.vector_store %arg8[%c0_22, %c0_23, %c0_24], %32 {strides = array<i32>} : memref<1x8x128xf32, #tpu.memory_space<vmem>>, vector<1x8x128xf32>,
    } else {
    }
    return
  }
  func.func @transform_0(%arg0: i32, %arg1: i32, %arg2: i32, %arg3: i32) -> (i32, i32, i32) {
    %c0_i32 = arith.constant 0 : i32
    return %arg0, %arg1, %arg3 : i32, i32, i32
  }
  func.func @transform_1(%arg0: i32, %arg1: i32, %arg2: i32, %arg3: i32) -> (i32, i32, i32) {
    %c0_i32 = arith.constant 0 : i32
    return %arg0, %arg3, %arg2 : i32, i32, i32
  }
  func.func @transform_2(%arg0: i32, %arg1: i32, %arg2: i32, %arg3: i32) -> (i32, i32, i32) {
    %c0_i32 = arith.constant 0 : i32
    return %arg0, %arg1, %arg2 : i32, i32, i32
  }
  func.func @transform_3(%arg0: i32, %arg1: i32, %arg2: i32, %arg3: i32) -> (i32, i32, i32) {
    %c0_i32 = arith.constant 0 : i32
    return %arg0, %arg1, %arg2 : i32, i32, i32
  }
  func.func @transform_4(%arg0: i32, %arg1: i32, %arg2: i32, %arg3: i32) -> (i32, i32, i32) {
    %c0_i32 = arith.constant 0 : i32
    return %arg0, %arg1, %arg2 : i32, i32, i32
  }
}

module attributes {stable_mosaic.version = 11 : i64} {
  func.func @_affine_relu_kernel(%arg0: i32, %arg1: memref<512x128xf32, #tpu.memory_space<vmem>>, %arg2: memref<1x128xf32, #tpu.memory_space<vmem>>, %arg3: memref<1x128xf32, #tpu.memory_space<vmem>>, %arg4: memref<512x128xf32, #tpu.memory_space<vmem>>) attributes {dimension_semantics = [#tpu.dimension_semantics<parallel>], iteration_bounds = array<i64: 16>, scalar_prefetch = 0 : i64, scratch_operands = 0 : i64, tpu.core_type = #tpu.core_type<tc>, window_params = [{transform_indices = @transform_0, window_bounds = array<i64: 512, 128>}, {pipeline_mode = #tpu.pipeline_mode<synchronous>, transform_indices = @transform_1, window_bounds = array<i64: 1, 128>}, {pipeline_mode = #tpu.pipeline_mode<synchronous>, transform_indices = @transform_2, window_bounds = array<i64: 1, 128>}, {transform_indices = @transform_3, window_bounds = array<i64: 512, 128>}]} {
    %c0 = arith.constant 0 : index
    %c0_0 = arith.constant 0 : index
    %0 = vector.load %arg1[%c0, %c0_0] : memref<512x128xf32, #tpu.memory_space<vmem>>, vector<512x128xf32>
    %c0_1 = arith.constant 0 : index
    %c0_2 = arith.constant 0 : index
    %1 = vector.load %arg2[%c0_1, %c0_2] : memref<1x128xf32, #tpu.memory_space<vmem>>, vector<1x128xf32>
    %2 = vector.broadcast %1 : vector<1x128xf32> to vector<512x128xf32>
    %3 = arith.mulf %0, %2 : vector<512x128xf32>
    %c0_3 = arith.constant 0 : index
    %c0_4 = arith.constant 0 : index
    %4 = vector.load %arg3[%c0_3, %c0_4] : memref<1x128xf32, #tpu.memory_space<vmem>>, vector<1x128xf32>
    %5 = vector.broadcast %4 : vector<1x128xf32> to vector<512x128xf32>
    %6 = arith.addf %3, %5 : vector<512x128xf32>
    %cst = arith.constant 0.000000e+00 : f32
    %7 = vector.broadcast %cst : f32 to vector<512x128xf32>
    %8 = arith.maximumf %6, %7 : vector<512x128xf32>
    %c0_5 = arith.constant 0 : index
    %c0_6 = arith.constant 0 : index
    %9 = vector.load %arg4[%c0_5, %c0_6] : memref<512x128xf32, #tpu.memory_space<vmem>>, vector<512x128xf32>
    tpu.vector_store %arg4[%c0_5, %c0_6], %8 {strides = array<i32>} : memref<512x128xf32, #tpu.memory_space<vmem>>, vector<512x128xf32>,
    return
  }
  func.func @transform_0(%arg0: i32) -> (i32, i32) {
    %c0_i32 = arith.constant 0 : i32
    %c0_i32_0 = arith.constant 0 : i32
    return %arg0, %c0_i32 : i32, i32
  }
  func.func @transform_1(%arg0: i32) -> (i32, i32) {
    %c0_i32 = arith.constant 0 : i32
    %c0_i32_0 = arith.constant 0 : i32
    %c0_i32_1 = arith.constant 0 : i32
    return %c0_i32, %c0_i32_0 : i32, i32
  }
  func.func @transform_2(%arg0: i32) -> (i32, i32) {
    %c0_i32 = arith.constant 0 : i32
    %c0_i32_0 = arith.constant 0 : i32
    %c0_i32_1 = arith.constant 0 : i32
    return %c0_i32, %c0_i32_0 : i32, i32
  }
  func.func @transform_3(%arg0: i32) -> (i32, i32) {
    %c0_i32 = arith.constant 0 : i32
    %c0_i32_0 = arith.constant 0 : i32
    return %arg0, %c0_i32 : i32, i32
  }
}

module attributes {stable_mosaic.version = 11 : i64} {
  func.func @_mm_bn_stats_kernel(%arg0: i32, %arg1: i32, %arg2: i32, %arg3: i32, %arg4: memref<1x256x8xbf16, #tpu.memory_space<vmem>>, %arg5: memref<1x8x128xbf16, #tpu.memory_space<vmem>>, %arg6: memref<1x256x128xf32, #tpu.memory_space<vmem>>, %arg7: memref<1x8x128xf32, #tpu.memory_space<vmem>>, %arg8: memref<1x8x128xf32, #tpu.memory_space<vmem>>, %arg9: memref<256x128xf32, #tpu.memory_space<vmem>>) attributes {dimension_semantics = [#tpu.dimension_semantics<parallel>, #tpu.dimension_semantics<parallel>, #tpu.dimension_semantics<parallel>, #tpu.dimension_semantics<arbitrary>], iteration_bounds = array<i64: 4, 32, 1, 1>, scalar_prefetch = 0 : i64, scratch_operands = 1 : i64, tpu.core_type = #tpu.core_type<tc>, window_params = [{transform_indices = @transform_0, window_bounds = array<i64: 1, 256, 8>}, {transform_indices = @transform_1, window_bounds = array<i64: 1, 8, 128>}, {transform_indices = @transform_2, window_bounds = array<i64: 1, 256, 128>}, {transform_indices = @transform_3, window_bounds = array<i64: 1, 8, 128>}, {transform_indices = @transform_4, window_bounds = array<i64: 1, 8, 128>}]} {
    %c0_i32 = arith.constant 0 : i32
    %0 = arith.cmpi eq, %arg3, %c0_i32 : i32
    %1 = arith.extui %0 : i1 to i32
    %c0_i32_0 = arith.constant 0 : i32
    %2 = arith.cmpi ne, %1, %c0_i32_0 : i32
    scf.if %2 {
      %cst_12 = arith.constant 0.000000e+00 : f32
      %14 = vector.broadcast %cst_12 : f32 to vector<256x128xf32>
      %c0_13 = arith.constant 0 : index
      %c0_14 = arith.constant 0 : index
      %15 = vector.load %arg9[%c0_13, %c0_14] : memref<256x128xf32, #tpu.memory_space<vmem>>, vector<256x128xf32>
      tpu.vector_store %arg9[%c0_13, %c0_14], %14 {strides = array<i32>} : memref<256x128xf32, #tpu.memory_space<vmem>>, vector<256x128xf32>,
    } else {
    }
    %c0 = arith.constant 0 : index
    %c0_1 = arith.constant 0 : index
    %3 = vector.load %arg9[%c0, %c0_1] : memref<256x128xf32, #tpu.memory_space<vmem>>, vector<256x128xf32>
    %c0_2 = arith.constant 0 : index
    %c0_3 = arith.constant 0 : index
    %c0_4 = arith.constant 0 : index
    %4 = vector.load %arg4[%c0_2, %c0_3, %c0_4] : memref<1x256x8xbf16, #tpu.memory_space<vmem>>, vector<1x256x8xbf16>
    %5 = vector.shape_cast %4 : vector<1x256x8xbf16> to vector<256x8xbf16>
    %c0_5 = arith.constant 0 : index
    %c0_6 = arith.constant 0 : index
    %c0_7 = arith.constant 0 : index
    %6 = vector.load %arg5[%c0_5, %c0_6, %c0_7] : memref<1x8x128xbf16, #tpu.memory_space<vmem>>, vector<1x8x128xbf16>
    %7 = vector.shape_cast %6 : vector<1x8x128xbf16> to vector<8x128xbf16>
    %cst = arith.constant dense<0.000000e+00> : vector<256x128xf32>
    %8 = tpu.matmul %5, %7, %cst {dimension_numbers = #tpu.dot_dimension_numbers<[1], [0], [0], [1], [0, 0, 1, 1], [], []>} : vector<256x8xbf16>, vector<8x128xbf16>, vector<256x128xf32> -> vector<256x128xf32>
    %9 = arith.addf %3, %8 : vector<256x128xf32>
    %c0_8 = arith.constant 0 : index
    %c0_9 = arith.constant 0 : index
    %10 = vector.load %arg9[%c0_8, %c0_9] : memref<256x128xf32, #tpu.memory_space<vmem>>, vector<256x128xf32>
    tpu.vector_store %arg9[%c0_8, %c0_9], %9 {strides = array<i32>} : memref<256x128xf32, #tpu.memory_space<vmem>>, vector<256x128xf32>,
    %c0_i32_10 = arith.constant 0 : i32
    %11 = arith.cmpi eq, %arg3, %c0_i32_10 : i32
    %12 = arith.extui %11 : i1 to i32
    %c0_i32_11 = arith.constant 0 : i32
    %13 = arith.cmpi ne, %12, %c0_i32_11 : i32
    scf.if %13 {
      %c0_12 = arith.constant 0 : index
      %c0_13 = arith.constant 0 : index
      %14 = vector.load %arg9[%c0_12, %c0_13] : memref<256x128xf32, #tpu.memory_space<vmem>>, vector<256x128xf32>
      %c0_14 = arith.constant 0 : index
      %c0_15 = arith.constant 0 : index
      %c0_16 = arith.constant 0 : index
      %15 = vector.load %arg6[%c0_14, %c0_15, %c0_16] : memref<1x256x128xf32, #tpu.memory_space<vmem>>, vector<1x256x128xf32>
      %16 = vector.shape_cast %15 : vector<1x256x128xf32> to vector<256x128xf32>
      %17 = vector.shape_cast %14 : vector<256x128xf32> to vector<1x256x128xf32>
      tpu.vector_store %arg6[%c0_14, %c0_15, %c0_16], %17 {strides = array<i32>} : memref<1x256x128xf32, #tpu.memory_space<vmem>>, vector<1x256x128xf32>,
      %cst_17 = arith.constant dense<0.000000e+00> : vector<128xf32>
      %18 = vector.multi_reduction <add>, %14, %cst_17 [0] : vector<256x128xf32> to vector<128xf32>
      %19 = vector.shape_cast %18 : vector<128xf32> to vector<1x128xf32>
      %20 = arith.mulf %14, %14 : vector<256x128xf32>
      %cst_18 = arith.constant dense<0.000000e+00> : vector<128xf32>
      %21 = vector.multi_reduction <add>, %20, %cst_18 [0] : vector<256x128xf32> to vector<128xf32>
      %22 = vector.shape_cast %21 : vector<128xf32> to vector<1x128xf32>
      %23 = vector.shape_cast %19 : vector<1x128xf32> to vector<1x128xf32>
      %24 = vector.broadcast %23 : vector<1x128xf32> to vector<8x128xf32>
      %c0_19 = arith.constant 0 : index
      %c0_20 = arith.constant 0 : index
      %c0_21 = arith.constant 0 : index
      %25 = vector.load %arg7[%c0_19, %c0_20, %c0_21] : memref<1x8x128xf32, #tpu.memory_space<vmem>>, vector<1x8x128xf32>
      %26 = vector.shape_cast %25 : vector<1x8x128xf32> to vector<8x128xf32>
      %27 = vector.shape_cast %24 : vector<8x128xf32> to vector<1x8x128xf32>
      tpu.vector_store %arg7[%c0_19, %c0_20, %c0_21], %27 {strides = array<i32>} : memref<1x8x128xf32, #tpu.memory_space<vmem>>, vector<1x8x128xf32>,
      %28 = vector.shape_cast %22 : vector<1x128xf32> to vector<1x128xf32>
      %29 = vector.broadcast %28 : vector<1x128xf32> to vector<8x128xf32>
      %c0_22 = arith.constant 0 : index
      %c0_23 = arith.constant 0 : index
      %c0_24 = arith.constant 0 : index
      %30 = vector.load %arg8[%c0_22, %c0_23, %c0_24] : memref<1x8x128xf32, #tpu.memory_space<vmem>>, vector<1x8x128xf32>
      %31 = vector.shape_cast %30 : vector<1x8x128xf32> to vector<8x128xf32>
      %32 = vector.shape_cast %29 : vector<8x128xf32> to vector<1x8x128xf32>
      tpu.vector_store %arg8[%c0_22, %c0_23, %c0_24], %32 {strides = array<i32>} : memref<1x8x128xf32, #tpu.memory_space<vmem>>, vector<1x8x128xf32>,
    } else {
    }
    return
  }
  func.func @transform_0(%arg0: i32, %arg1: i32, %arg2: i32, %arg3: i32) -> (i32, i32, i32) {
    %c0_i32 = arith.constant 0 : i32
    return %arg0, %arg1, %arg3 : i32, i32, i32
  }
  func.func @transform_1(%arg0: i32, %arg1: i32, %arg2: i32, %arg3: i32) -> (i32, i32, i32) {
    %c0_i32 = arith.constant 0 : i32
    return %arg0, %arg3, %arg2 : i32, i32, i32
  }
  func.func @transform_2(%arg0: i32, %arg1: i32, %arg2: i32, %arg3: i32) -> (i32, i32, i32) {
    %c0_i32 = arith.constant 0 : i32
    return %arg0, %arg1, %arg2 : i32, i32, i32
  }
  func.func @transform_3(%arg0: i32, %arg1: i32, %arg2: i32, %arg3: i32) -> (i32, i32, i32) {
    %c0_i32 = arith.constant 0 : i32
    return %arg0, %arg1, %arg2 : i32, i32, i32
  }
  func.func @transform_4(%arg0: i32, %arg1: i32, %arg2: i32, %arg3: i32) -> (i32, i32, i32) {
    %c0_i32 = arith.constant 0 : i32
    return %arg0, %arg1, %arg2 : i32, i32, i32
  }
}

module attributes {stable_mosaic.version = 11 : i64} {
  func.func @_affine_relu_kernel(%arg0: i32, %arg1: memref<512x128xf32, #tpu.memory_space<vmem>>, %arg2: memref<1x128xf32, #tpu.memory_space<vmem>>, %arg3: memref<1x128xf32, #tpu.memory_space<vmem>>, %arg4: memref<512x128xf32, #tpu.memory_space<vmem>>) attributes {dimension_semantics = [#tpu.dimension_semantics<parallel>], iteration_bounds = array<i64: 64>, scalar_prefetch = 0 : i64, scratch_operands = 0 : i64, tpu.core_type = #tpu.core_type<tc>, window_params = [{transform_indices = @transform_0, window_bounds = array<i64: 512, 128>}, {pipeline_mode = #tpu.pipeline_mode<synchronous>, transform_indices = @transform_1, window_bounds = array<i64: 1, 128>}, {pipeline_mode = #tpu.pipeline_mode<synchronous>, transform_indices = @transform_2, window_bounds = array<i64: 1, 128>}, {transform_indices = @transform_3, window_bounds = array<i64: 512, 128>}]} {
    %c0 = arith.constant 0 : index
    %c0_0 = arith.constant 0 : index
    %0 = vector.load %arg1[%c0, %c0_0] : memref<512x128xf32, #tpu.memory_space<vmem>>, vector<512x128xf32>
    %c0_1 = arith.constant 0 : index
    %c0_2 = arith.constant 0 : index
    %1 = vector.load %arg2[%c0_1, %c0_2] : memref<1x128xf32, #tpu.memory_space<vmem>>, vector<1x128xf32>
    %2 = vector.broadcast %1 : vector<1x128xf32> to vector<512x128xf32>
    %3 = arith.mulf %0, %2 : vector<512x128xf32>
    %c0_3 = arith.constant 0 : index
    %c0_4 = arith.constant 0 : index
    %4 = vector.load %arg3[%c0_3, %c0_4] : memref<1x128xf32, #tpu.memory_space<vmem>>, vector<1x128xf32>
    %5 = vector.broadcast %4 : vector<1x128xf32> to vector<512x128xf32>
    %6 = arith.addf %3, %5 : vector<512x128xf32>
    %cst = arith.constant 0.000000e+00 : f32
    %7 = vector.broadcast %cst : f32 to vector<512x128xf32>
    %8 = arith.maximumf %6, %7 : vector<512x128xf32>
    %c0_5 = arith.constant 0 : index
    %c0_6 = arith.constant 0 : index
    %9 = vector.load %arg4[%c0_5, %c0_6] : memref<512x128xf32, #tpu.memory_space<vmem>>, vector<512x128xf32>
    tpu.vector_store %arg4[%c0_5, %c0_6], %8 {strides = array<i32>} : memref<512x128xf32, #tpu.memory_space<vmem>>, vector<512x128xf32>,
    return
  }
  func.func @transform_0(%arg0: i32) -> (i32, i32) {
    %c0_i32 = arith.constant 0 : i32
    %c0_i32_0 = arith.constant 0 : i32
    return %arg0, %c0_i32 : i32, i32
  }
  func.func @transform_1(%arg0: i32) -> (i32, i32) {
    %c0_i32 = arith.constant 0 : i32
    %c0_i32_0 = arith.constant 0 : i32
    %c0_i32_1 = arith.constant 0 : i32
    return %c0_i32, %c0_i32_0 : i32, i32
  }
  func.func @transform_2(%arg0: i32) -> (i32, i32) {
    %c0_i32 = arith.constant 0 : i32
    %c0_i32_0 = arith.constant 0 : i32
    %c0_i32_1 = arith.constant 0 : i32
    return %c0_i32, %c0_i32_0 : i32, i32
  }
  func.func @transform_3(%arg0: i32) -> (i32, i32) {
    %c0_i32 = arith.constant 0 : i32
    %c0_i32_0 = arith.constant 0 : i32
    return %arg0, %c0_i32 : i32, i32
  }
}

module attributes {stable_mosaic.version = 11 : i64} {
  func.func @_mm_tanh_kernel(%arg0: i32, %arg1: i32, %arg2: i32, %arg3: i32, %arg4: memref<1x256x49xbf16, #tpu.memory_space<vmem>>, %arg5: memref<1x49x128xbf16, #tpu.memory_space<vmem>>, %arg6: memref<1x256x128xf32, #tpu.memory_space<vmem>>, %arg7: memref<256x128xf32, #tpu.memory_space<vmem>>) attributes {dimension_semantics = [#tpu.dimension_semantics<parallel>, #tpu.dimension_semantics<parallel>, #tpu.dimension_semantics<parallel>, #tpu.dimension_semantics<arbitrary>], iteration_bounds = array<i64: 1, 128, 1, 1>, scalar_prefetch = 0 : i64, scratch_operands = 1 : i64, tpu.core_type = #tpu.core_type<tc>, window_params = [{transform_indices = @transform_0, window_bounds = array<i64: 1, 256, 49>}, {transform_indices = @transform_1, window_bounds = array<i64: 1, 49, 128>}, {transform_indices = @transform_2, window_bounds = array<i64: 1, 256, 128>}]} {
    %c0_i32 = arith.constant 0 : i32
    %0 = arith.cmpi eq, %arg3, %c0_i32 : i32
    %1 = arith.extui %0 : i1 to i32
    %c0_i32_0 = arith.constant 0 : i32
    %2 = arith.cmpi ne, %1, %c0_i32_0 : i32
    scf.if %2 {
      %cst_12 = arith.constant 0.000000e+00 : f32
      %14 = vector.broadcast %cst_12 : f32 to vector<256x128xf32>
      %c0_13 = arith.constant 0 : index
      %c0_14 = arith.constant 0 : index
      %15 = vector.load %arg7[%c0_13, %c0_14] : memref<256x128xf32, #tpu.memory_space<vmem>>, vector<256x128xf32>
      tpu.vector_store %arg7[%c0_13, %c0_14], %14 {strides = array<i32>} : memref<256x128xf32, #tpu.memory_space<vmem>>, vector<256x128xf32>,
    } else {
    }
    %c0 = arith.constant 0 : index
    %c0_1 = arith.constant 0 : index
    %3 = vector.load %arg7[%c0, %c0_1] : memref<256x128xf32, #tpu.memory_space<vmem>>, vector<256x128xf32>
    %c0_2 = arith.constant 0 : index
    %c0_3 = arith.constant 0 : index
    %c0_4 = arith.constant 0 : index
    %4 = vector.load %arg4[%c0_2, %c0_3, %c0_4] : memref<1x256x49xbf16, #tpu.memory_space<vmem>>, vector<1x256x49xbf16>
    %5 = vector.shape_cast %4 : vector<1x256x49xbf16> to vector<256x49xbf16>
    %c0_5 = arith.constant 0 : index
    %c0_6 = arith.constant 0 : index
    %c0_7 = arith.constant 0 : index
    %6 = vector.load %arg5[%c0_5, %c0_6, %c0_7] : memref<1x49x128xbf16, #tpu.memory_space<vmem>>, vector<1x49x128xbf16>
    %7 = vector.shape_cast %6 : vector<1x49x128xbf16> to vector<49x128xbf16>
    %cst = arith.constant dense<0.000000e+00> : vector<256x128xf32>
    %8 = tpu.matmul %5, %7, %cst {dimension_numbers = #tpu.dot_dimension_numbers<[1], [0], [0], [1], [0, 0, 1, 1], [], []>} : vector<256x49xbf16>, vector<49x128xbf16>, vector<256x128xf32> -> vector<256x128xf32>
    %9 = arith.addf %3, %8 : vector<256x128xf32>
    %c0_8 = arith.constant 0 : index
    %c0_9 = arith.constant 0 : index
    %10 = vector.load %arg7[%c0_8, %c0_9] : memref<256x128xf32, #tpu.memory_space<vmem>>, vector<256x128xf32>
    tpu.vector_store %arg7[%c0_8, %c0_9], %9 {strides = array<i32>} : memref<256x128xf32, #tpu.memory_space<vmem>>, vector<256x128xf32>,
    %c0_i32_10 = arith.constant 0 : i32
    %11 = arith.cmpi eq, %arg3, %c0_i32_10 : i32
    %12 = arith.extui %11 : i1 to i32
    %c0_i32_11 = arith.constant 0 : i32
    %13 = arith.cmpi ne, %12, %c0_i32_11 : i32
    scf.if %13 {
      %c0_12 = arith.constant 0 : index
      %c0_13 = arith.constant 0 : index
      %14 = vector.load %arg7[%c0_12, %c0_13] : memref<256x128xf32, #tpu.memory_space<vmem>>, vector<256x128xf32>
      %15 = math.tanh %14 : vector<256x128xf32>
      %c0_14 = arith.constant 0 : index
      %c0_15 = arith.constant 0 : index
      %c0_16 = arith.constant 0 : index
      %16 = vector.load %arg6[%c0_14, %c0_15, %c0_16] : memref<1x256x128xf32, #tpu.memory_space<vmem>>, vector<1x256x128xf32>
      %17 = vector.shape_cast %16 : vector<1x256x128xf32> to vector<256x128xf32>
      %18 = vector.shape_cast %15 : vector<256x128xf32> to vector<1x256x128xf32>
      tpu.vector_store %arg6[%c0_14, %c0_15, %c0_16], %18 {strides = array<i32>} : memref<1x256x128xf32, #tpu.memory_space<vmem>>, vector<1x256x128xf32>,
    } else {
    }
    return
  }
  func.func @transform_0(%arg0: i32, %arg1: i32, %arg2: i32, %arg3: i32) -> (i32, i32, i32) {
    %c0_i32 = arith.constant 0 : i32
    return %arg0, %arg1, %arg3 : i32, i32, i32
  }
  func.func @transform_1(%arg0: i32, %arg1: i32, %arg2: i32, %arg3: i32) -> (i32, i32, i32) {
    %c0_i32 = arith.constant 0 : i32
    return %arg0, %arg3, %arg2 : i32, i32, i32
  }
  func.func @transform_2(%arg0: i32, %arg1: i32, %arg2: i32, %arg3: i32) -> (i32, i32, i32) {
    %c0_i32 = arith.constant 0 : i32
    return %arg0, %arg1, %arg2 : i32, i32, i32
  }
}

</mosaic_0001>

<bundles_post_ra>
// kernel: decoder_ir_forward.12
= control target key start
LH: loop header
LB: loop body
LE: loop exit
PB: predicated region body
PF: predicated region fallthrough
CT: control target
= control target key end

     0   :  { %s613_s12 = smov 0   ;;  %s900_s0 = inlined_call_operand.vmem [shape: f32[1024,128], index: 0, kind: input, shape index: {}]   ;;  %s901_s1 = inlined_call_operand.vmem [shape: f32[1,128], index: 1, kind: input, shape index: {}]   ;;  %s902_s2 = inlined_call_operand.vmem [shape: f32[1,128], index: 2, kind: input, shape index: {}]   ;;  %s903_s3 = inlined_call_operand.vmem [shape: f32[1024,128], index: 3, kind: output, shape index: {}]  }
   0x1 LB: > { %s564_s13 = sadd.s32 4294967295, %s591_s12   ;;  %p568_p0 = scmp.ge.s32.totalorder %s591_s12, 1  ;;  %s591_s12 = sphi %s613_s12, %s13_s12  }
   0x2   : > { %p138_p1 = scmp.lt.s32.totalorder %s591_s12, 3 }
   0x4   : > { %p139_p2 = pnand %p568_p0, %p138_p1 }
   0x5   : > { %s569_s14 = sshll.u32 (!%p139_p2), %s564_s13, 6 }
   0x6   : > { %142 = sbr.rel (%p139_p2) target bundleno = 68 (0x44), region = 32  ;;  %p163_p3 = scmp.lt.s32.totalorder (!%p139_p2), %s569_s14, 127 }
   0xb   : > { %s905_s14 = smov (!%p163_p3, %s569_s14), 127  ;;  %v624_v0 = vld [vmem:[%s901_s1] ss:$0 sm:$0xff] }
   0xc   : > { %s570_s15 = sshll.u32 %s905_s14, 3  ;;  %v634_v1 = vld [vmem:[%s902_s2] ss:$0 sm:$0xff] }
   0xd   : > { %s629_s20 = scalar_lea.vmem %s900_s0, %s570_s15  ;;  %s657_s25 = scalar_lea.vmem %s903_s3, %s570_s15 }
   0xe   : > { %v174_v2 = vld [vmem:[%s629_s20] sm:$0xff]  ;;  %v175_v3 = vld [vmem:[%s629_s20 + $0x8] sm:$0xff]  ;;  %v176_v4 = vld [vmem:[%s629_s20 + $0x10] sm:$0xff] }
   0xf   : > { %v245_v5 = vmul.f32 %v624_v0, %v174_v2  ;;  %v246_v6 = vmul.f32 %v624_v0, %v175_v3  ;;  %v247_v7 = vmul.f32 %v624_v0, %v176_v4  ;;  %v177_v8 = vld [vmem:[%s629_s20 + $0x18] sm:$0xff]  ;;  %v178_v9 = vld [vmem:[%s629_s20 + $0x20] sm:$0xff]  ;;  %v179_v10 = vld [vmem:[%s629_s20 + $0x28] sm:$0xff] }
  0x10   : > { %v248_v11 = vmul.f32 %v624_v0, %v177_v8  ;;  %v249_v12 = vmul.f32 %v624_v0, %v178_v9  ;;  %v250_v13 = vmul.f32 %v624_v0, %v179_v10  ;;  %v180_v14 = vld [vmem:[%s629_s20 + $0x30] sm:$0xff]  ;;  %v181_v15 = vld [vmem:[%s629_s20 + $0x38] sm:$0xff]  ;;  %v182_v24 = vld [vmem:[%s629_s20 + $0x40] sm:$0xff] }
  0x11   : > { %v316_v16 = vadd.f32 %v634_v1, %v245_v5  ;;  %v317_v17 = vadd.f32 %v634_v1, %v246_v6  ;;  %v318_v18 = vadd.f32 %v634_v1, %v247_v7  ;;  %v251_v19 = vmul.f32 %v624_v0, %v180_v14  ;;  %v183_v25 = vld [vmem:[%s629_s20 + $0x48] sm:$0xff]  ;;  %v184_v26 = vld [vmem:[%s629_s20 + $0x50] sm:$0xff]  ;;  %v185_v31 = vld [vmem:[%s629_s20 + $0x58] sm:$0xff] }
  0x12   : > { %v319_v20 = vadd.f32 %v634_v1, %v248_v11  ;;  %v320_v21 = vadd.f32 %v634_v1, %v249_v12  ;;  %v321_v22 = vadd.f32 %v634_v1, %v250_v13  ;;  %v252_v23 = vmul.f32 %v624_v0, %v181_v15  ;;  %v186_v32 = vld [vmem:[%s629_s20 + $0x60] sm:$0xff]  ;;  %v187_v33 = vld [vmem:[%s629_s20 + $0x68] sm:$0xff]  ;;  %v188_v38 = vld [vmem:[%s629_s20 + $0x70] sm:$0xff] }
  0x13   : > { %v380_v27 = vmax.f32 %v316_v16, 0.0  ;;  %v381_v28 = vmax.f32 %v317_v17, 0.0  ;;  %v382_v29 = vmax.f32 %v318_v18, 0.0  ;;  %v322_v30 = vadd.f32 %v634_v1, %v251_v19  ;;  %v189_v43 = vld [vmem:[%s629_s20 + $0x78] sm:$0xff]  ;;  %v190_v56 = vld [vmem:[%s629_s20 + $0x80] sm:$0xff]  ;;  %v191_v57 = vld [vmem:[%s629_s20 + $0x88] sm:$0xff] }
  0x14   : > { %v383_v34 = vmax.f32 %v319_v20, 0.0  ;;  %v384_v35 = vmax.f32 %v320_v21, 0.0  ;;  %v385_v36 = vmax.f32 %v321_v22, 0.0  ;;  %v323_v37 = vadd.f32 %v634_v1, %v252_v23  ;;  %v192_v58 = vld [vmem:[%s629_s20 + $0x90] sm:$0xff]  ;;  %v193_v63 = vld [vmem:[%s629_s20 + $0x98] sm:$0xff]  ;;  %v194_v2 = vld [vmem:[%s629_s20 + $0xa0] sm:$0xff] }
  0x15   : > { %444 = vst [vmem:[%s657_s25] sm:$0xff] %v380_v27  ;;  %445 = vst [vmem:[%s657_s25 + $0x8] sm:$0xff] %v381_v28  ;;  %v386_v39 = vmax.f32 %v322_v30, 0.0  ;;  %v253_v40 = vmul.f32 %v624_v0, %v182_v24  ;;  %v254_v41 = vmul.f32 %v624_v0, %v183_v25  ;;  %v255_v42 = vmul.f32 %v624_v0, %v184_v26  ;;  %v195_v3 = vld [vmem:[%s629_s20 + $0xa8] sm:$0xff]  ;;  %v196_v8 = vld [vmem:[%s629_s20 + $0xb0] sm:$0xff] }
  0x16   : > { %446 = vst [vmem:[%s657_s25 + $0x10] sm:$0xff] %v382_v29  ;;  %447 = vst [vmem:[%s657_s25 + $0x18] sm:$0xff] %v383_v34  ;;  %v387_v44 = vmax.f32 %v323_v37, 0.0  ;;  %v256_v45 = vmul.f32 %v624_v0, %v185_v31  ;;  %v257_v46 = vmul.f32 %v624_v0, %v186_v32  ;;  %v258_v47 = vmul.f32 %v624_v0, %v187_v33  ;;  %v197_v13 = vld [vmem:[%s629_s20 + $0xb8] sm:$0xff]  ;;  %v198_v26 = vld [vmem:[%s629_s20 + $0xc0] sm:$0xff] }
  0x17   : > { %448 = vst [vmem:[%s657_s25 + $0x20] sm:$0xff] %v384_v35  ;;  %449 = vst [vmem:[%s657_s25 + $0x28] sm:$0xff] %v385_v36  ;;  %v324_v48 = vadd.f32 %v634_v1, %v253_v40  ;;  %v325_v49 = vadd.f32 %v634_v1, %v254_v41  ;;  %v326_v50 = vadd.f32 %v634_v1, %v255_v42  ;;  %v199_v27 = vld [vmem:[%s629_s20 + $0xc8] sm:$0xff]  ;;  %v200_v28 = vld [vmem:[%s629_s20 + $0xd0] sm:$0xff] }
  0x18   : > { %450 = vst [vmem:[%s657_s25 + $0x30] sm:$0xff] %v386_v39  ;;  %v259_v51 = vmul.f32 %v624_v0, %v188_v38  ;;  %451 = vst [vmem:[%s657_s25 + $0x38] sm:$0xff] %v387_v44  ;;  %v327_v52 = vadd.f32 %v634_v1, %v256_v45  ;;  %v328_v53 = vadd.f32 %v634_v1, %v257_v46  ;;  %v201_v33 = vld [vmem:[%s629_s20 + $0xd8] sm:$0xff]  ;;  %v202_v34 = vld [vmem:[%s629_s20 + $0xe0] sm:$0xff] }
  0x19   : > { %v329_v54 = vadd.f32 %v634_v1, %v258_v47  ;;  %v260_v55 = vmul.f32 %v624_v0, %v189_v43  ;;  %v388_v59 = vmax.f32 %v324_v48, 0.0  ;;  %v389_v60 = vmax.f32 %v325_v49, 0.0  ;;  %v203_v35 = vld [vmem:[%s629_s20 + $0xe8] sm:$0xff]  ;;  %v204_v40 = vld [vmem:[%s629_s20 + $0xf0] sm:$0xff]  ;;  %v205_v45 = vld [vmem:[%s629_s20 + $0xf8] sm:$0xff] }
  0x1a   : > { %v390_v61 = vmax.f32 %v326_v50, 0.0  ;;  %v330_v62 = vadd.f32 %v634_v1, %v259_v51  ;;  %v391_v4 = vmax.f32 %v327_v52, 0.0  ;;  %v392_v5 = vmax.f32 %v328_v53, 0.0 }
  0x1b   : > { %v393_v6 = vmax.f32 %v329_v54, 0.0  ;;  %v331_v7 = vadd.f32 %v634_v1, %v260_v55  ;;  %452 = vst [vmem:[%s657_s25 + $0x40] sm:$0xff] %v388_v59  ;;  %453 = vst [vmem:[%s657_s25 + $0x48] sm:$0xff] %v389_v60  ;;  %v261_v10 = vmul.f32 %v624_v0, %v190_v56  ;;  %v262_v11 = vmul.f32 %v624_v0, %v191_v57  ;;  %v207_v59 = vld [vmem:[%s629_s20 + $0x108] sm:$0xff]  ;;  %v208_v60 = vld [vmem:[%s629_s20 + $0x110] sm:$0xff] }
  0x1c   : > { %454 = vst [vmem:[%s657_s25 + $0x50] sm:$0xff] %v390_v61  ;;  %v394_v9 = vmax.f32 %v330_v62, 0.0  ;;  %v263_v12 = vmul.f32 %v624_v0, %v192_v58  ;;  %455 = vst [vmem:[%s657_s25 + $0x58] sm:$0xff] %v391_v4  ;;  %v264_v15 = vmul.f32 %v624_v0, %v193_v63  ;;  %v265_v16 = vmul.f32 %v624_v0, %v194_v2  ;;  %v206_v58 = vld [vmem:[%s629_s20 + $0x100] sm:$0xff] }
  0x1d   : > { %456 = vst [vmem:[%s657_s25 + $0x60] sm:$0xff] %v392_v5  ;;  %457 = vst [vmem:[%s657_s25 + $0x68] sm:$0xff] %v393_v6  ;;  %v395_v14 = vmax.f32 %v331_v7, 0.0  ;;  %v266_v17 = vmul.f32 %v624_v0, %v195_v3  ;;  %v332_v18 = vadd.f32 %v634_v1, %v261_v10  ;;  %v333_v19 = vadd.f32 %v634_v1, %v262_v11  ;;  %v209_v3 = vld [vmem:[%s629_s20 + $0x118] sm:$0xff]  ;;  %v210_v4 = vld [vmem:[%s629_s20 + $0x120] sm:$0xff] }
  0x1e   : > { %458 = vst [vmem:[%s657_s25 + $0x70] sm:$0xff] %v394_v9  ;;  %v334_v20 = vadd.f32 %v634_v1, %v263_v12  ;;  %v267_v21 = vmul.f32 %v624_v0, %v196_v8  ;;  %v335_v22 = vadd.f32 %v634_v1, %v264_v15  ;;  %v336_v23 = vadd.f32 %v634_v1, %v265_v16  ;;  %v211_v5 = vld [vmem:[%s629_s20 + $0x128] sm:$0xff]  ;;  %v212_v10 = vld [vmem:[%s629_s20 + $0x130] sm:$0xff]  ;;  %v213_v15 = vld [vmem:[%s629_s20 + $0x138] sm:$0xff] }
  0x1f   : > { %459 = vst [vmem:[%s657_s25 + $0x78] sm:$0xff] %v395_v14  ;;  %v337_v24 = vadd.f32 %v634_v1, %v266_v17  ;;  %v268_v25 = vmul.f32 %v624_v0, %v197_v13  ;;  %v396_v29 = vmax.f32 %v332_v18, 0.0  ;;  %v397_v30 = vmax.f32 %v333_v19, 0.0 }
  0x20   : > { %v398_v31 = vmax.f32 %v334_v20, 0.0  ;;  %v338_v32 = vadd.f32 %v634_v1, %v267_v21  ;;  %v399_v36 = vmax.f32 %v335_v22, 0.0  ;;  %v400_v37 = vmax.f32 %v336_v23, 0.0 }
  0x21   : > { %v401_v38 = vmax.f32 %v337_v24, 0.0  ;;  %v339_v39 = vadd.f32 %v634_v1, %v268_v25  ;;  %460 = vst [vmem:[%s657_s25 + $0x80] sm:$0xff] %v396_v29  ;;  %461 = vst [vmem:[%s657_s25 + $0x88] sm:$0xff] %v397_v30  ;;  %v269_v42 = vmul.f32 %v624_v0, %v198_v26  ;;  %v270_v43 = vmul.f32 %v624_v0, %v199_v27  ;;  %v215_v29 = vld [vmem:[%s629_s20 + $0x148] sm:$0xff]  ;;  %v216_v30 = vld [vmem:[%s629_s20 + $0x150] sm:$0xff] }
  0x22   : > { %462 = vst [vmem:[%s657_s25 + $0x90] sm:$0xff] %v398_v31  ;;  %v402_v41 = vmax.f32 %v338_v32, 0.0  ;;  %v271_v44 = vmul.f32 %v624_v0, %v200_v28  ;;  %463 = vst [vmem:[%s657_s25 + $0x98] sm:$0xff] %v399_v36  ;;  %v272_v47 = vmul.f32 %v624_v0, %v201_v33  ;;  %v273_v48 = vmul.f32 %v624_v0, %v202_v34  ;;  %v214_v28 = vld [vmem:[%s629_s20 + $0x140] sm:$0xff] }
  0x23   : > { %464 = vst [vmem:[%s657_s25 + $0xa0] sm:$0xff] %v400_v37  ;;  %465 = vst [vmem:[%s657_s25 + $0xa8] sm:$0xff] %v401_v38  ;;  %v403_v46 = vmax.f32 %v339_v39, 0.0  ;;  %v274_v49 = vmul.f32 %v624_v0, %v203_v35  ;;  %v340_v50 = vadd.f32 %v634_v1, %v269_v42  ;;  %v341_v51 = vadd.f32 %v634_v1, %v270_v43  ;;  %v217_v35 = vld [vmem:[%s629_s20 + $0x158] sm:$0xff]  ;;  %v218_v36 = vld [vmem:[%s629_s20 + $0x160] sm:$0xff] }
  0x24   : > { %466 = vst [vmem:[%s657_s25 + $0xb0] sm:$0xff] %v402_v41  ;;  %v342_v52 = vadd.f32 %v634_v1, %v271_v44  ;;  %v275_v53 = vmul.f32 %v624_v0, %v204_v40  ;;  %v343_v54 = vadd.f32 %v634_v1, %v272_v47  ;;  %v344_v55 = vadd.f32 %v634_v1, %v273_v48  ;;  %v219_v37 = vld [vmem:[%s629_s20 + $0x168] sm:$0xff]  ;;  %v220_v42 = vld [vmem:[%s629_s20 + $0x170] sm:$0xff]  ;;  %v221_v47 = vld [vmem:[%s629_s20 + $0x178] sm:$0xff] }
  0x25   : > { %467 = vst [vmem:[%s657_s25 + $0xb8] sm:$0xff] %v403_v46  ;;  %v345_v56 = vadd.f32 %v634_v1, %v274_v49  ;;  %v276_v57 = vmul.f32 %v624_v0, %v205_v45  ;;  %v404_v61 = vmax.f32 %v340_v50, 0.0  ;;  %v405_v62 = vmax.f32 %v341_v51, 0.0 }
  0x26   : > { %v406_v63 = vmax.f32 %v342_v52, 0.0  ;;  %v346_v2 = vadd.f32 %v634_v1, %v275_v53  ;;  %v407_v6 = vmax.f32 %v343_v54, 0.0  ;;  %v408_v7 = vmax.f32 %v344_v55, 0.0 }
  0x27   : > { %v409_v8 = vmax.f32 %v345_v56, 0.0  ;;  %v347_v9 = vadd.f32 %v634_v1, %v276_v57  ;;  %468 = vst [vmem:[%s657_s25 + $0xc0] sm:$0xff] %v404_v61  ;;  %469 = vst [vmem:[%s657_s25 + $0xc8] sm:$0xff] %v405_v62  ;;  %v277_v12 = vmul.f32 %v624_v0, %v206_v58  ;;  %v278_v13 = vmul.f32 %v624_v0, %v207_v59  ;;  %v223_v61 = vld [vmem:[%s629_s20 + $0x188] sm:$0xff]  ;;  %v224_v62 = vld [vmem:[%s629_s20 + $0x190] sm:$0xff] }
  0x28   : > { %470 = vst [vmem:[%s657_s25 + $0xd0] sm:$0xff] %v406_v63  ;;  %v410_v11 = vmax.f32 %v346_v2, 0.0  ;;  %v279_v14 = vmul.f32 %v624_v0, %v208_v60  ;;  %471 = vst [vmem:[%s657_s25 + $0xd8] sm:$0xff] %v407_v6  ;;  %v280_v17 = vmul.f32 %v624_v0, %v209_v3  ;;  %v281_v18 = vmul.f32 %v624_v0, %v210_v4  ;;  %v222_v60 = vld [vmem:[%s629_s20 + $0x180] sm:$0xff] }
  0x29   : > { %472 = vst [vmem:[%s657_s25 + $0xe0] sm:$0xff] %v408_v7  ;;  %473 = vst [vmem:[%s657_s25 + $0xe8] sm:$0xff] %v409_v8  ;;  %v411_v16 = vmax.f32 %v347_v9, 0.0  ;;  %v282_v19 = vmul.f32 %v624_v0, %v211_v5  ;;  %v348_v20 = vadd.f32 %v634_v1, %v277_v12  ;;  %v349_v21 = vadd.f32 %v634_v1, %v278_v13  ;;  %v225_v5 = vld [vmem:[%s629_s20 + $0x198] sm:$0xff]  ;;  %v226_v6 = vld [vmem:[%s629_s20 + $0x1a0] sm:$0xff] }
  0x2a   : > { %474 = vst [vmem:[%s657_s25 + $0xf0] sm:$0xff] %v410_v11  ;;  %v350_v22 = vadd.f32 %v634_v1, %v279_v14  ;;  %v283_v23 = vmul.f32 %v624_v0, %v212_v10  ;;  %v351_v24 = vadd.f32 %v634_v1, %v280_v17  ;;  %v352_v25 = vadd.f32 %v634_v1, %v281_v18  ;;  %v227_v7 = vld [vmem:[%s629_s20 + $0x1a8] sm:$0xff]  ;;  %v228_v12 = vld [vmem:[%s629_s20 + $0x1b0] sm:$0xff]  ;;  %v229_v17 = vld [vmem:[%s629_s20 + $0x1b8] sm:$0xff] }
  0x2b   : > { %475 = vst [vmem:[%s657_s25 + $0xf8] sm:$0xff] %v411_v16  ;;  %v353_v26 = vadd.f32 %v634_v1, %v282_v19  ;;  %v284_v27 = vmul.f32 %v624_v0, %v213_v15  ;;  %v412_v31 = vmax.f32 %v348_v20, 0.0  ;;  %v413_v32 = vmax.f32 %v349_v21, 0.0 }
  0x2c   : > { %v414_v33 = vmax.f32 %v350_v22, 0.0  ;;  %v354_v34 = vadd.f32 %v634_v1, %v283_v23  ;;  %v415_v38 = vmax.f32 %v351_v24, 0.0  ;;  %v416_v39 = vmax.f32 %v352_v25, 0.0 }
  0x2d   : > { %v417_v40 = vmax.f32 %v353_v26, 0.0  ;;  %v355_v41 = vadd.f32 %v634_v1, %v284_v27  ;;  %476 = vst [vmem:[%s657_s25 + $0x100] sm:$0xff] %v412_v31  ;;  %477 = vst [vmem:[%s657_s25 + $0x108] sm:$0xff] %v413_v32  ;;  %v285_v44 = vmul.f32 %v624_v0, %v214_v28  ;;  %v286_v45 = vmul.f32 %v624_v0, %v215_v29  ;;  %v231_v31 = vld [vmem:[%s629_s20 + $0x1c8] sm:$0xff]  ;;  %v232_v32 = vld [vmem:[%s629_s20 + $0x1d0] sm:$0xff] }
  0x2e   : > { %478 = vst [vmem:[%s657_s25 + $0x110] sm:$0xff] %v414_v33  ;;  %v418_v43 = vmax.f32 %v354_v34, 0.0  ;;  %v287_v46 = vmul.f32 %v624_v0, %v216_v30  ;;  %479 = vst [vmem:[%s657_s25 + $0x118] sm:$0xff] %v415_v38  ;;  %v288_v49 = vmul.f32 %v624_v0, %v217_v35  ;;  %v289_v50 = vmul.f32 %v624_v0, %v218_v36  ;;  %v230_v30 = vld [vmem:[%s629_s20 + $0x1c0] sm:$0xff] }
  0x2f   : > { %480 = vst [vmem:[%s657_s25 + $0x120] sm:$0xff] %v416_v39  ;;  %481 = vst [vmem:[%s657_s25 + $0x128] sm:$0xff] %v417_v40  ;;  %v419_v48 = vmax.f32 %v355_v41, 0.0  ;;  %v290_v51 = vmul.f32 %v624_v0, %v219_v37  ;;  %v356_v52 = vadd.f32 %v634_v1, %v285_v44  ;;  %v357_v53 = vadd.f32 %v634_v1, %v286_v45  ;;  %v233_v37 = vld [vmem:[%s629_s20 + $0x1d8] sm:$0xff]  ;;  %v234_v38 = vld [vmem:[%s629_s20 + $0x1e0] sm:$0xff] }
  0x30   : > { %482 = vst [vmem:[%s657_s25 + $0x130] sm:$0xff] %v418_v43  ;;  %v358_v54 = vadd.f32 %v634_v1, %v287_v46  ;;  %v291_v55 = vmul.f32 %v624_v0, %v220_v42  ;;  %v359_v56 = vadd.f32 %v634_v1, %v288_v49  ;;  %v360_v57 = vadd.f32 %v634_v1, %v289_v50  ;;  %v235_v39 = vld [vmem:[%s629_s20 + $0x1e8] sm:$0xff]  ;;  %v236_v44 = vld [vmem:[%s629_s20 + $0x1f0] sm:$0xff]  ;;  %v237_v49 = vld [vmem:[%s629_s20 + $0x1f8] sm:$0xff] }
  0x31   : > { %483 = vst [vmem:[%s657_s25 + $0x138] sm:$0xff] %v419_v48  ;;  %v361_v58 = vadd.f32 %v634_v1, %v290_v51  ;;  %v292_v59 = vmul.f32 %v624_v0, %v221_v47  ;;  %v420_v63 = vmax.f32 %v356_v52, 0.0  ;;  %v421_v2 = vmax.f32 %v357_v53, 0.0 }
  0x32   : > { %v422_v3 = vmax.f32 %v358_v54, 0.0  ;;  %v362_v4 = vadd.f32 %v634_v1, %v291_v55  ;;  %v423_v8 = vmax.f32 %v359_v56, 0.0  ;;  %v424_v9 = vmax.f32 %v360_v57, 0.0 }
  0x33   : > { %v425_v10 = vmax.f32 %v361_v58, 0.0  ;;  %v363_v11 = vadd.f32 %v634_v1, %v292_v59  ;;  %484 = vst [vmem:[%s657_s25 + $0x140] sm:$0xff] %v420_v63  ;;  %485 = vst [vmem:[%s657_s25 + $0x148] sm:$0xff] %v421_v2  ;;  %v293_v14 = vmul.f32 %v624_v0, %v222_v60  ;;  %v294_v15 = vmul.f32 %v624_v0, %v223_v61 }
  0x34   : > { %486 = vst [vmem:[%s657_s25 + $0x150] sm:$0xff] %v422_v3  ;;  %v426_v13 = vmax.f32 %v362_v4, 0.0  ;;  %v295_v16 = vmul.f32 %v624_v0, %v224_v62  ;;  %487 = vst [vmem:[%s657_s25 + $0x158] sm:$0xff] %v423_v8  ;;  %v296_v19 = vmul.f32 %v624_v0, %v225_v5  ;;  %v297_v20 = vmul.f32 %v624_v0, %v226_v6 }
  0x35   : > { %488 = vst [vmem:[%s657_s25 + $0x160] sm:$0xff] %v424_v9  ;;  %489 = vst [vmem:[%s657_s25 + $0x168] sm:$0xff] %v425_v10  ;;  %v427_v18 = vmax.f32 %v363_v11, 0.0  ;;  %v298_v21 = vmul.f32 %v624_v0, %v227_v7  ;;  %v364_v22 = vadd.f32 %v634_v1, %v293_v14  ;;  %v365_v23 = vadd.f32 %v634_v1, %v294_v15 }
  0x36   : > { %490 = vst [vmem:[%s657_s25 + $0x170] sm:$0xff] %v426_v13  ;;  %v366_v24 = vadd.f32 %v634_v1, %v295_v16  ;;  %v299_v25 = vmul.f32 %v624_v0, %v228_v12  ;;  %v367_v26 = vadd.f32 %v634_v1, %v296_v19  ;;  %v368_v27 = vadd.f32 %v634_v1, %v297_v20 }
  0x37   : > { %491 = vst [vmem:[%s657_s25 + $0x178] sm:$0xff] %v427_v18  ;;  %v369_v28 = vadd.f32 %v634_v1, %v298_v21  ;;  %v300_v29 = vmul.f32 %v624_v0, %v229_v17  ;;  %v428_v33 = vmax.f32 %v364_v22, 0.0  ;;  %v429_v34 = vmax.f32 %v365_v23, 0.0 }
  0x38   : > { %v430_v35 = vmax.f32 %v366_v24, 0.0  ;;  %v370_v36 = vadd.f32 %v634_v1, %v299_v25  ;;  %v431_v40 = vmax.f32 %v367_v26, 0.0  ;;  %v432_v41 = vmax.f32 %v368_v27, 0.0 }
  0x39   : > { %v433_v42 = vmax.f32 %v369_v28, 0.0  ;;  %v371_v43 = vadd.f32 %v634_v1, %v300_v29  ;;  %492 = vst [vmem:[%s657_s25 + $0x180] sm:$0xff] %v428_v33  ;;  %493 = vst [vmem:[%s657_s25 + $0x188] sm:$0xff] %v429_v34  ;;  %v301_v46 = vmul.f32 %v624_v0, %v230_v30  ;;  %v302_v47 = vmul.f32 %v624_v0, %v231_v31 }
  0x3a   : > { %494 = vst [vmem:[%s657_s25 + $0x190] sm:$0xff] %v430_v35  ;;  %v434_v45 = vmax.f32 %v370_v36, 0.0  ;;  %v303_v48 = vmul.f32 %v624_v0, %v232_v32  ;;  %495 = vst [vmem:[%s657_s25 + $0x198] sm:$0xff] %v431_v40  ;;  %v304_v51 = vmul.f32 %v624_v0, %v233_v37  ;;  %v305_v52 = vmul.f32 %v624_v0, %v234_v38 }
  0x3b   : > { %496 = vst [vmem:[%s657_s25 + $0x1a0] sm:$0xff] %v432_v41  ;;  %497 = vst [vmem:[%s657_s25 + $0x1a8] sm:$0xff] %v433_v42  ;;  %v435_v50 = vmax.f32 %v371_v43, 0.0  ;;  %v306_v53 = vmul.f32 %v624_v0, %v235_v39  ;;  %v372_v54 = vadd.f32 %v634_v1, %v301_v46  ;;  %v373_v55 = vadd.f32 %v634_v1, %v302_v47 }
  0x3c   : > { %498 = vst [vmem:[%s657_s25 + $0x1b0] sm:$0xff] %v434_v45  ;;  %v374_v56 = vadd.f32 %v634_v1, %v303_v48  ;;  %v307_v57 = vmul.f32 %v624_v0, %v236_v44  ;;  %v375_v58 = vadd.f32 %v634_v1, %v304_v51  ;;  %v376_v59 = vadd.f32 %v634_v1, %v305_v52 }
  0x3d   : > { %499 = vst [vmem:[%s657_s25 + $0x1b8] sm:$0xff] %v435_v50  ;;  %v377_v60 = vadd.f32 %v634_v1, %v306_v53  ;;  %v308_v61 = vmul.f32 %v624_v0, %v237_v49  ;;  %v436_v62 = vmax.f32 %v372_v54, 0.0  ;;  %v437_v63 = vmax.f32 %v373_v55, 0.0 }
  0x3e   : > { %v438_v2 = vmax.f32 %v374_v56, 0.0  ;;  %v378_v3 = vadd.f32 %v634_v1, %v307_v57  ;;  %v439_v4 = vmax.f32 %v375_v58, 0.0  ;;  %v440_v5 = vmax.f32 %v376_v59, 0.0 }
  0x3f   : > { %v441_v6 = vmax.f32 %v377_v60, 0.0  ;;  %v379_v7 = vadd.f32 %v634_v1, %v308_v61  ;;  %500 = vst [vmem:[%s657_s25 + $0x1c0] sm:$0xff] %v436_v62  ;;  %501 = vst [vmem:[%s657_s25 + $0x1c8] sm:$0xff] %v437_v63 }
  0x40   : > { %502 = vst [vmem:[%s657_s25 + $0x1d0] sm:$0xff] %v438_v2  ;;  %v442_v8 = vmax.f32 %v378_v3, 0.0  ;;  %503 = vst [vmem:[%s657_s25 + $0x1d8] sm:$0xff] %v439_v4 }
  0x41   : > { %504 = vst [vmem:[%s657_s25 + $0x1e0] sm:$0xff] %v440_v5  ;;  %505 = vst [vmem:[%s657_s25 + $0x1e8] sm:$0xff] %v441_v6  ;;  %v443_v0 = vmax.f32 %v379_v7, 0.0 }
  0x42   : > { %506 = vst [vmem:[%s657_s25 + $0x1f0] sm:$0xff] %v442_v8 }
  0x43   : > { %507 = vst [vmem:[%s657_s25 + $0x1f8] sm:$0xff] %v443_v0 }
  0x44 PF: > { %s13_s12 = sadd.s32 1, %s591_s12  }
  0x45   : > { %p10_p4 = scmp.ge.s32.totalorder %s13_s12, 4  }
  0x47   :  { %12 = sbr.rel (!%p10_p4) target bundleno = 1 (0x1), region = 62 }

// kernel: decoder_ir_forward.11
= control target key start
LH: loop header
LB: loop body
LE: loop exit
PB: predicated region body
PF: predicated region fallthrough
CT: control target
= control target key end

     0   :  { %s1487_s15 = smov 0   ;;  %s1489_s16 = smov 0   ;;  %s1681_s0 = inlined_call_operand.vmem [shape: bf16[4,256,128], index: 0, kind: input, shape index: {}]   ;;  %s1682_s1 = inlined_call_operand.vmem [shape: bf16[4,128,128], index: 1, kind: input, shape index: {}]   ;;  %s1683_s2 = inlined_call_operand.vmem [shape: f32[4,256,128], index: 2, kind: output, shape index: {0}]   ;;  %s1684_s3 = inlined_call_operand.vmem [shape: f32[4,8,128], index: 3, kind: output, shape index: {1}]   ;;  %s1685_s4 = inlined_call_operand.vmem [shape: f32[4,8,128], index: 4, kind: output, shape index: {2}]  }
   0x1   :  { %s1491_s17 = smov 0  }
   0x2 LB: > { %s41_s18 = sadd.s32 1, %s1456_s16  ;;  %p1264_p0 = scmp.ge.s32.totalorder %s1460_s17, 1  ;;  %s1460_s17 = sphi %s1491_s17, %s15_s17   ;;  %s1456_s16 = sphi %s1489_s16, %s1687_s16   ;;  %s1452_s15 = sphi %s1487_s15, %s1686_s15  }
   0x3   : > { %p43_p1 = scmp.ge.s32.totalorder %s41_s18, 4  ;;  %p239_p2 = scmp.lt.s32.totalorder %s1460_s17, 5 }
   0x5   : > { %s1689_s18 = smov (%p43_p1, %s41_s18), 0  ;;  %p240_p3 = pnand %p1264_p0, %p239_p2 }
   0x6   : > { %p312_p4 = scmp.lt.s32.totalorder (!%p240_p3), %s1452_s15, 3 }
   0x7   : > { %243 = sbr.rel (%p240_p3) target bundleno = 324 (0x144), region = 28 }
   0xc   : > { %s1691_s15 = smov (!%p312_p4, %s1452_s15), 3 }
   0xd   : > { %s1300_s19 = sshll.u32 %s1691_s15, 6  ;;  %s1299_s23 = sshll.u32 %s1691_s15, 7 }
   0xe   : > { %s1511_s22 = scalar_lea.vmem %s1682_s1, %s1300_s19  ;;  %s1520_s26 = scalar_lea.vmem %s1681_s0, %s1299_s23 }
   0xf   : > { %v1414_v0 = vld [vmem:[%s1511_s22 + $0x38] sm:$0xff]   ;;  %v1415_v1 = vld [vmem:[%s1511_s22 + $0x30] sm:$0xff]   ;;  %v1416_v2 = vld [vmem:[%s1511_s22 + $0x28] sm:$0xff]   ;;  %s1301_s27 = sshll.u32 %s1691_s15, 8  ;;  %s1271_s5 = sshll.u32 %s1691_s15, 3 }
  0x10   : > { %1326 = vmatprep.subr.bf16.mxu0 %v1414_v0  ;;  %1374 = vmatprep.subr.bf16.mxu1 %v1414_v0  ;;  %v1417_v3 = vld [vmem:[%s1511_s22 + $0x20] sm:$0xff]   ;;  %v1418_v5 = vld [vmem:[%s1511_s22 + $0x18] sm:$0xff]   ;;  %v1419_v6 = vld [vmem:[%s1511_s22 + $0x10] sm:$0xff]   ;;  %s1547_s30 = scalar_lea.vmem %s1683_s2, %s1301_s27  ;;  %s359_s8 = scalar_lea.vmem %s1684_s3, %s1271_s5 }
  0x11   : > { %1327 = vmatpush3.bf16.msra.mxu0 %v1414_v0  ;;  %1382 = vmatpush3.bf16.msra.mxu1 %v1414_v0  ;;  %v1422_v4 = vld [vmem:[%s1520_s26] sm:$0xff]   ;;  %v1420_v8 = vld [vmem:[%s1511_s22 + $0x8] sm:$0xff]   ;;  %v1424_v12 = vld [vmem:[%s1520_s26 + $0x10] sm:$0xff]   ;;  %s369_s11 = scalar_lea.vmem %s1685_s4, %s1271_s5 }
  0x12   : > { %1328 = vmatprep.subr.bf16.mxu0 %v1415_v1  ;;  %1375 = vmatprep.subr.bf16.mxu1 %v1415_v1  ;;  %v1430_v7 = vld [vmem:[%s1520_s26 + $0x40] sm:$0xff]   ;;  %v1423_v10 = vld [vmem:[%s1520_s26 + $0x8] sm:$0xff]   ;;  %v1432_v13 = vld [vmem:[%s1520_s26 + $0x50] sm:$0xff]  }
  0x13   : > { %1342 = vmatprep.mubr.bf16.mxu0 %v1422_v4  ;;  %1358 = vmatprep.mubr.bf16.mxu1 %v1430_v7  ;;  %v1421_v9 = vld [vmem:[%s1511_s22] sm:$0xff]   ;;  %v1431_v11 = vld [vmem:[%s1520_s26 + $0x48] sm:$0xff]   ;;  %v1425_v14 = vld [vmem:[%s1520_s26 + $0x18] sm:$0xff]  }
  0x14   : > { %v1433_v15 = vld [vmem:[%s1520_s26 + $0x58] sm:$0xff]   ;;  %v1426_v16 = vld [vmem:[%s1520_s26 + $0x20] sm:$0xff]   ;;  %v1427_v18 = vld [vmem:[%s1520_s26 + $0x28] sm:$0xff]  }
  0x15   : > { %1329 = vmatpush3.bf16.msra.mxu0 %v1415_v1  ;;  %1383 = vmatpush3.bf16.msra.mxu1 %v1415_v1  ;;  %v1434_v17 = vld [vmem:[%s1520_s26 + $0x60] sm:$0xff]   ;;  %v1435_v19 = vld [vmem:[%s1520_s26 + $0x68] sm:$0xff]   ;;  %v1428_v20 = vld [vmem:[%s1520_s26 + $0x30] sm:$0xff]  }
  0x16   : > { %1330 = vmatprep.subr.bf16.mxu0 %v1416_v2  ;;  %1376 = vmatprep.subr.bf16.mxu1 %v1416_v2  ;;  %v1436_v21 = vld [vmem:[%s1520_s26 + $0x70] sm:$0xff]   ;;  %v1429_v22 = vld [vmem:[%s1520_s26 + $0x38] sm:$0xff]  }
  0x17   : > { %v1437_v23 = vld [vmem:[%s1520_s26 + $0x78] sm:$0xff]  }
  0x19   : > { %1331 = vmatpush3.bf16.msra.mxu0 %v1416_v2  ;;  %1384 = vmatpush3.bf16.msra.mxu1 %v1416_v2 }
  0x1a   : > { %1332 = vmatprep.subr.bf16.mxu0 %v1417_v3  ;;  %1377 = vmatprep.subr.bf16.mxu1 %v1417_v3 }
  0x1d   : > { %1333 = vmatpush3.bf16.msra.mxu0 %v1417_v3  ;;  %1385 = vmatpush3.bf16.msra.mxu1 %v1417_v3 }
  0x1e   : > { %1334 = vmatprep.subr.bf16.mxu0 %v1418_v5  ;;  %1378 = vmatprep.subr.bf16.mxu1 %v1418_v5 }
  0x21   : > { %1335 = vmatpush3.bf16.msra.mxu0 %v1418_v5  ;;  %1386 = vmatpush3.bf16.msra.mxu1 %v1418_v5 }
  0x22   : > { %1336 = vmatprep.subr.bf16.mxu0 %v1419_v6  ;;  %1379 = vmatprep.subr.bf16.mxu1 %v1419_v6 }
  0x25   : > { %1337 = vmatpush3.bf16.msra.mxu0 %v1419_v6  ;;  %1387 = vmatpush3.bf16.msra.mxu1 %v1419_v6 }
  0x26   : > { %1338 = vmatprep.subr.bf16.mxu0 %v1420_v8  ;;  %1380 = vmatprep.subr.bf16.mxu1 %v1420_v8 }
  0x29   : > { %1339 = vmatpush3.bf16.msra.mxu0 %v1420_v8  ;;  %1388 = vmatpush3.bf16.msra.mxu1 %v1420_v8 }
  0x2a   : > { %1340 = vmatprep.subr.bf16.mxu0 %v1421_v9  ;;  %1381 = vmatprep.subr.bf16.mxu1 %v1421_v9 }
  0x2d   : > { %1341 = vmatpush3.bf16.msra.mxu0 %v1421_v9  ;;  %1389 = vmatpush3.bf16.msra.mxu1 %v1421_v9 }
  0x30   : > { %1343 = vmatmul.mubr.bf16.vlgmr.msra.gmra.mxu0 %v1423_v10  ;;  %1359 = vmatmul.mubr.bf16.vlgmr.msra.gmra.mxu1 %v1431_v11 }
  0x31   : > { %1346 = vmatprep.mubr.bf16.mxu0 %v1424_v12  ;;  %1362 = vmatprep.mubr.bf16.mxu1 %v1432_v13 }
  0x38   : > { %1347 = vmatmul.mubr.bf16.gmra.mxu0 %v1425_v14  ;;  %1363 = vmatmul.mubr.bf16.gmra.mxu1 %v1433_v15 }
  0x39   : > { %1350 = vmatprep.mubr.bf16.mxu0 %v1426_v16  ;;  %1366 = vmatprep.mubr.bf16.mxu1 %v1434_v17 }
  0x40   : > { %1351 = vmatmul.mubr.bf16.gmra.mxu0 %v1427_v18  ;;  %1367 = vmatmul.mubr.bf16.gmra.mxu1 %v1435_v19 }
  0x41   : > { %1354 = vmatprep.mubr.bf16.mxu0 %v1428_v20  ;;  %1370 = vmatprep.mubr.bf16.mxu1 %v1436_v21 }
  0x48   : > { %1355 = vmatmul.mubr.bf16.gmra.mxu0 %v1429_v22  ;;  %1371 = vmatmul.mubr.bf16.gmra.mxu1 %v1437_v23 }
  0xf0   : > { %v1344_v24 = vpop.f32.mrf.mxu0  ;;  %v1549_v25 = vpop.f32.mrf.mxu1 }
  0xf1   : > { %893 = vst [vmem:[%s1547_s30 + $0x10] sm:$0xff] %v1344_v24  ;;  %909 = vst [vmem:[%s1547_s30 + $0x90] sm:$0xff] %v1549_v25  ;;  %v962_v37 = vmul.f32 %v1344_v24, %v1344_v24 }
  0xf2   : > { %v665_v26 = vpop.f32.mrf.mxu0  ;;  %v1554_v27 = vpop.f32.mrf.mxu1 }
  0xf3   : > { %891 = vst [vmem:[%s1547_s30] sm:$0xff] %v665_v26  ;;  %907 = vst [vmem:[%s1547_s30 + $0x80] sm:$0xff] %v1554_v27  ;;  %v960_v32 = vmul.f32 %v665_v26, %v665_v26 }
  0xf4   : > { %v1345_v28 = vpop.f32.mrf.mxu0  ;;  %v1559_v29 = vpop.f32.mrf.mxu1 }
  0xf5   : > { %894 = vst [vmem:[%s1547_s30 + $0x18] sm:$0xff] %v1345_v28  ;;  %910 = vst [vmem:[%s1547_s30 + $0x98] sm:$0xff] %v1559_v29  ;;  %v963_v42 = vmul.f32 %v1345_v28, %v1345_v28 }
  0xf6   : > { %v668_v30 = vpop.f32.mrf.mxu0  ;;  %v1564_v31 = vpop.f32.mrf.mxu1 }
  0xf7   : > { %892 = vst [vmem:[%s1547_s30 + $0x8] sm:$0xff] %v668_v30  ;;  %v923_v33 = vadd.f32 %v668_v30, %v665_v26  ;;  %v961_v34 = vmul.f32 %v668_v30, %v668_v30  ;;  %908 = vst [vmem:[%s1547_s30 + $0x88] sm:$0xff] %v1564_v31 }
  0xf8   : > { %v1348_v35 = vpop.f32.mrf.mxu0  ;;  %v1569_v36 = vpop.f32.mrf.mxu1 }
  0xf9   : > { %v924_v38 = vadd.f32 %v1344_v24, %v923_v33  ;;  %v992_v39 = vadd.f32 %v961_v34, %v960_v32  ;;  %897 = vst [vmem:[%s1547_s30 + $0x30] sm:$0xff] %v1348_v35  ;;  %913 = vst [vmem:[%s1547_s30 + $0xb0] sm:$0xff] %v1569_v36  ;;  %v966_v57 = vmul.f32 %v1348_v35, %v1348_v35 }
  0xfa   : > { %v681_v40 = vpop.f32.mrf.mxu0  ;;  %v1574_v41 = vpop.f32.mrf.mxu1 }
  0xfb   : > { %v993_v43 = vadd.f32 %v992_v39, %v962_v37  ;;  %895 = vst [vmem:[%s1547_s30 + $0x20] sm:$0xff] %v681_v40  ;;  %v925_v44 = vadd.f32 %v1345_v28, %v924_v38  ;;  %911 = vst [vmem:[%s1547_s30 + $0xa0] sm:$0xff] %v1574_v41  ;;  %v964_v48 = vmul.f32 %v681_v40, %v681_v40 }
  0xfc   : > { %v1349_v45 = vpop.f32.mrf.mxu0  ;;  %v1579_v46 = vpop.f32.mrf.mxu1 }
  0xfd   : > { %v926_v47 = vadd.f32 %v925_v44, %v681_v40  ;;  %v994_v49 = vadd.f32 %v993_v43, %v963_v42  ;;  %898 = vst [vmem:[%s1547_s30 + $0x38] sm:$0xff] %v1349_v45  ;;  %914 = vst [vmem:[%s1547_s30 + $0xb8] sm:$0xff] %v1579_v46  ;;  %v967_v62 = vmul.f32 %v1349_v45, %v1349_v45 }
  0xfe   : > { %v684_v50 = vpop.f32.mrf.mxu0  ;;  %v1584_v51 = vpop.f32.mrf.mxu1  ;;  %v976_v43 = vmul.f32 %v1554_v27, %v1554_v27 }
  0xff   : > { %v995_v52 = vadd.f32 %v994_v49, %v964_v48  ;;  %896 = vst [vmem:[%s1547_s30 + $0x28] sm:$0xff] %v684_v50  ;;  %v927_v53 = vadd.f32 %v926_v47, %v684_v50  ;;  %v965_v54 = vmul.f32 %v684_v50, %v684_v50  ;;  %912 = vst [vmem:[%s1547_s30 + $0xa8] sm:$0xff] %v1584_v51 }
 0x100   : > { %v1352_v55 = vpop.f32.mrf.mxu0  ;;  %v1589_v56 = vpop.f32.mrf.mxu1  ;;  %v977_v48 = vmul.f32 %v1564_v31, %v1564_v31  ;;  %v978_v50 = vmul.f32 %v1549_v25, %v1549_v25 }
 0x101   : > { %v928_v58 = vadd.f32 %v1348_v35, %v927_v53  ;;  %v996_v59 = vadd.f32 %v995_v52, %v965_v54  ;;  %901 = vst [vmem:[%s1547_s30 + $0x50] sm:$0xff] %v1352_v55  ;;  %917 = vst [vmem:[%s1547_s30 + $0xd0] sm:$0xff] %v1589_v56  ;;  %v970_v13 = vmul.f32 %v1352_v55, %v1352_v55 }
 0x102   : > { %v697_v60 = vpop.f32.mrf.mxu0  ;;  %v1594_v61 = vpop.f32.mrf.mxu1  ;;  %v979_v54 = vmul.f32 %v1559_v29, %v1559_v29 }
 0x103   : > { %v997_v63 = vadd.f32 %v996_v59, %v966_v57  ;;  %899 = vst [vmem:[%s1547_s30 + $0x40] sm:$0xff] %v697_v60  ;;  %v929_v0 = vadd.f32 %v1349_v45, %v928_v58  ;;  %915 = vst [vmem:[%s1547_s30 + $0xc0] sm:$0xff] %v1594_v61  ;;  %v968_v4 = vmul.f32 %v697_v60, %v697_v60 }
 0x104   : > { %v1353_v1 = vpop.f32.mrf.mxu0  ;;  %v1599_v2 = vpop.f32.mrf.mxu1  ;;  %v980_v58 = vmul.f32 %v1574_v41, %v1574_v41 }
 0x105   : > { %v930_v3 = vadd.f32 %v929_v0, %v697_v60  ;;  %v998_v5 = vadd.f32 %v997_v63, %v967_v62  ;;  %902 = vst [vmem:[%s1547_s30 + $0x58] sm:$0xff] %v1353_v1  ;;  %918 = vst [vmem:[%s1547_s30 + $0xd8] sm:$0xff] %v1599_v2  ;;  %v971_v18 = vmul.f32 %v1353_v1, %v1353_v1 }
 0x106   : > { %v700_v6 = vpop.f32.mrf.mxu0  ;;  %v1604_v7 = vpop.f32.mrf.mxu1  ;;  %v981_v62 = vmul.f32 %v1584_v51, %v1584_v51 }
 0x107   : > { %v999_v8 = vadd.f32 %v998_v5, %v968_v4  ;;  %900 = vst [vmem:[%s1547_s30 + $0x48] sm:$0xff] %v700_v6  ;;  %v931_v9 = vadd.f32 %v930_v3, %v700_v6  ;;  %v969_v10 = vmul.f32 %v700_v6, %v700_v6  ;;  %916 = vst [vmem:[%s1547_s30 + $0xc8] sm:$0xff] %v1604_v7 }
 0x108   : > { %v1356_v11 = vpop.f32.mrf.mxu0  ;;  %v1609_v12 = vpop.f32.mrf.mxu1  ;;  %v984_v4 = vmul.f32 %v1594_v61, %v1594_v61 }
 0x109   : > { %v932_v14 = vadd.f32 %v1352_v55, %v931_v9  ;;  %v1000_v15 = vadd.f32 %v999_v8, %v969_v10  ;;  %905 = vst [vmem:[%s1547_s30 + $0x70] sm:$0xff] %v1356_v11  ;;  %921 = vst [vmem:[%s1547_s30 + $0xf0] sm:$0xff] %v1609_v12  ;;  %v974_v35 = vmul.f32 %v1356_v11, %v1356_v11 }
 0x10a   : > { %v713_v16 = vpop.f32.mrf.mxu0  ;;  %v777_v17 = vpop.f32.mrf.mxu1  ;;  %v985_v8 = vmul.f32 %v1604_v7, %v1604_v7 }
 0x10b   : > { %v1001_v19 = vadd.f32 %v1000_v15, %v970_v13  ;;  %903 = vst [vmem:[%s1547_s30 + $0x60] sm:$0xff] %v713_v16  ;;  %v933_v20 = vadd.f32 %v1353_v1, %v932_v14  ;;  %919 = vst [vmem:[%s1547_s30 + $0xe0] sm:$0xff] %v777_v17  ;;  %v972_v24 = vmul.f32 %v713_v16, %v713_v16 }
 0x10c   : > { %v1357_v21 = vpop.f32.mrf.mxu0  ;;  %v1616_v22 = vpop.f32.mrf.mxu1  ;;  %v988_v14 = vmul.f32 %v777_v17, %v777_v17 }
 0x10d   : > { %v934_v23 = vadd.f32 %v933_v20, %v713_v16  ;;  %v1002_v26 = vadd.f32 %v1001_v19, %v971_v18  ;;  %906 = vst [vmem:[%s1547_s30 + $0x78] sm:$0xff] %v1357_v21  ;;  %922 = vst [vmem:[%s1547_s30 + $0xf8] sm:$0xff] %v1616_v22  ;;  %v975_v39 = vmul.f32 %v1357_v21, %v1357_v21 }
 0x10e   : > { %v716_v28 = vpop.f32.mrf.mxu0  ;;  %v780_v30 = vpop.f32.mrf.mxu1 }
 0x10f   : > { %v1003_v32 = vadd.f32 %v1002_v26, %v972_v24  ;;  %904 = vst [vmem:[%s1547_s30 + $0x68] sm:$0xff] %v716_v28  ;;  %v935_v33 = vadd.f32 %v934_v23, %v716_v28  ;;  %v973_v34 = vmul.f32 %v716_v28, %v716_v28  ;;  %920 = vst [vmem:[%s1547_s30 + $0xe8] sm:$0xff] %v780_v30 }
 0x110   : > { %v989_v19 = vmul.f32 %v780_v30, %v780_v30 }
 0x111   : > { %v936_v37 = vadd.f32 %v1356_v11, %v935_v33  ;;  %v1004_v38 = vadd.f32 %v1003_v32, %v973_v34 }
 0x113   : > { %v937_v40 = vadd.f32 %v1357_v21, %v936_v37  ;;  %v1005_v42 = vadd.f32 %v1004_v38, %v974_v35  ;;  %v991_v21 = vmul.f32 %v1616_v22, %v1616_v22 }
 0x115   : > { %v1006_v44 = vadd.f32 %v1005_v42, %v975_v39  ;;  %v938_v45 = vadd.f32 %v937_v40, %v1554_v27 }
 0x117   : > { %v939_v47 = vadd.f32 %v938_v45, %v1564_v31  ;;  %v1007_v49 = vadd.f32 %v1006_v44, %v976_v43 }
 0x119   : > { %v940_v52 = vadd.f32 %v1549_v25, %v939_v47  ;;  %v1008_v53 = vadd.f32 %v1007_v49, %v977_v48  ;;  %v982_v25 = vmul.f32 %v1569_v36, %v1569_v36 }
 0x11b   : > { %v1009_v55 = vadd.f32 %v1008_v53, %v978_v50  ;;  %v941_v57 = vadd.f32 %v1559_v29, %v940_v52  ;;  %v983_v29 = vmul.f32 %v1579_v46, %v1579_v46 }
 0x11d   : > { %v942_v27 = vadd.f32 %v941_v57, %v1574_v41  ;;  %v1010_v59 = vadd.f32 %v1009_v55, %v979_v54 }
 0x11f   : > { %v1011_v31 = vadd.f32 %v1010_v59, %v980_v58  ;;  %v943_v60 = vadd.f32 %v942_v27, %v1584_v51 }
 0x121   : > { %v944_v63 = vadd.f32 %v1569_v36, %v943_v60  ;;  %v1012_v0 = vadd.f32 %v1011_v31, %v981_v62  ;;  %v986_v36 = vmul.f32 %v1589_v56, %v1589_v56 }
 0x123   : > { %v1013_v1 = vadd.f32 %v1012_v0, %v982_v25  ;;  %v945_v3 = vadd.f32 %v1579_v46, %v944_v63  ;;  %v987_v46 = vmul.f32 %v1599_v2, %v1599_v2 }
 0x125   : > { %v946_v41 = vadd.f32 %v945_v3, %v1594_v61  ;;  %v1014_v5 = vadd.f32 %v1013_v1, %v983_v29 }
 0x127   : > { %v1015_v6 = vadd.f32 %v1014_v5, %v984_v4  ;;  %v947_v51 = vadd.f32 %v946_v41, %v1604_v7  ;;  %v990_v7 = vmul.f32 %v1609_v12, %v1609_v12 }
 0x129   : > { %v948_v9 = vadd.f32 %v1589_v56, %v947_v51  ;;  %v1016_v10 = vadd.f32 %v1015_v6, %v985_v8 }
 0x12b   : > { %v1017_v11 = vadd.f32 %v1016_v10, %v986_v36  ;;  %v949_v13 = vadd.f32 %v1599_v2, %v948_v9 }
 0x12d   : > { %v950_v61 = vadd.f32 %v949_v13, %v777_v17  ;;  %v1018_v15 = vadd.f32 %v1017_v11, %v987_v46 }
 0x12f   : > { %v1019_v16 = vadd.f32 %v1018_v15, %v988_v14  ;;  %v951_v18 = vadd.f32 %v950_v61, %v780_v30 }
 0x131   : > { %v952_v20 = vadd.f32 %v1609_v12, %v951_v18  ;;  %v1020_v56 = vadd.f32 %v1019_v16, %v989_v19 }
 0x133   : > { %v953_v23 = vadd.f32 %v1616_v22, %v952_v20  ;;  %v1021_v24 = vadd.f32 %v1020_v56, %v990_v7 }
 0x135   : > { %v954_v2 = vrot.slane %v953_v23, 4  ;;  %v1022_v26 = vadd.f32 %v1021_v24, %v991_v21 }
 0x137   : > { %v955_v17 = vadd.f32 %v954_v2, %v953_v23  ;;  %v1023_v28 = vrot.slane %v1022_v26, 4 }
 0x139   : > { %v956_v32 = vrot.slane %v955_v17, 2  ;;  %v1024_v33 = vadd.f32 %v1023_v28, %v1022_v26 }
 0x13b   : > { %v957_v30 = vadd.f32 %v956_v32, %v955_v17  ;;  %v1025_v34 = vrot.slane %v1024_v33, 2 }
 0x13d   : > { %v958_v35 = vrot.slane %v957_v30, 1  ;;  %v1026_v37 = vadd.f32 %v1025_v34, %v1024_v33 }
 0x13f   : > { %v959_v12 = vadd.f32 %v958_v35, %v957_v30  ;;  %v1027_v38 = vrot.slane %v1026_v37, 1 }
 0x141   : > { %v1028_v22 = vadd.f32 %v1027_v38, %v1026_v37  ;;  %1029 = vst [vmem:[%s359_s8] sm:$0xff] %v959_v12 }
 0x143   : > { %1030 = vst [vmem:[%s369_s11] sm:$0xff] %v1028_v22 }
 0x144 PF: > { %s15_s17 = sadd.s32 1, %s1460_s17   ;;  %s1686_s15 = smov %s1456_s16 }
 0x145   : > { %p12_p5 = scmp.ge.s32.totalorder %s15_s17, 6   ;;  %s1687_s16 = smov %s1689_s18 }
 0x147   :  { %14 = sbr.rel (!%p12_p5) target bundleno = 2 (0x2), region = 93 }

// kernel: decoder_ir_forward.13
= control target key start
LH: loop header
LB: loop body
LE: loop exit
PB: predicated region body
PF: predicated region fallthrough
CT: control target
= control target key end

     0   :  { %s1476_s15 = smov 0   ;;  %s1478_s16 = smov 0   ;;  %s1676_s0 = inlined_call_operand.vmem [shape: bf16[4,256,64], index: 0, kind: input, shape index: {}]   ;;  %s1677_s1 = inlined_call_operand.vmem [shape: bf16[4,64,128], index: 1, kind: input, shape index: {}]   ;;  %s1678_s2 = inlined_call_operand.vmem [shape: f32[4,256,128], index: 2, kind: output, shape index: {0}]   ;;  %s1679_s3 = inlined_call_operand.vmem [shape: f32[4,8,128], index: 3, kind: output, shape index: {1}]   ;;  %s1680_s4 = inlined_call_operand.vmem [shape: f32[4,8,128], index: 4, kind: output, shape index: {2}]  }
   0x1   :  { %s1480_s17 = smov 0  }
   0x2 LB: > { %s41_s18 = sadd.s32 1, %s1445_s16  ;;  %p1265_p0 = scmp.ge.s32.totalorder %s1449_s17, 1  ;;  %s1449_s17 = sphi %s1480_s17, %s15_s17   ;;  %s1445_s16 = sphi %s1478_s16, %s1682_s16   ;;  %s1441_s15 = sphi %s1476_s15, %s1681_s15  }
   0x3   : > { %p43_p1 = scmp.ge.s32.totalorder %s41_s18, 4  ;;  %p239_p2 = scmp.lt.s32.totalorder %s1449_s17, 5 }
   0x5   : > { %s1684_s18 = smov (%p43_p1, %s41_s18), 0  ;;  %p240_p3 = pnand %p1265_p0, %p239_p2 }
   0x6   : > { %p312_p4 = scmp.lt.s32.totalorder (!%p240_p3), %s1441_s15, 3 }
   0x7   : > { %243 = sbr.rel (%p240_p3) target bundleno = 308 (0x134), region = 28 }
   0xc   : > { %s1686_s15 = smov (!%p312_p4, %s1441_s15), 3  ;;  %vm583_vm0 = vcmask 523264  }
   0xd   : > { %s1312_s19 = sshll.u32 %s1686_s15, 7  ;;  %s1313_s20 = sshll.u32 %s1686_s15, 5 }
   0xe   : > { %s335_s23 = scalar_lea.vmem %s1677_s1, %s1313_s20  ;;  %s1504_s26 = scalar_lea.vmem %s1676_s0, %s1312_s19 }
   0xf   : > { %v1407_v0 = vld [vmem:[%s335_s23 + $0x18] sm:$0xff]   ;;  %v1408_v1 = vld [vmem:[%s335_s23 + $0x10] sm:$0xff]   ;;  %v1409_v2 = vld [vmem:[%s335_s23 + $0x8] sm:$0xff]   ;;  %s1314_s27 = sshll.u32 %s1686_s15, 8  ;;  %s1272_s5 = sshll.u32 %s1686_s15, 3 }
  0x10   : > { %1335 = vmatprep.subr.bf16.mxu0 %v1407_v0  ;;  %1375 = vmatprep.subr.bf16.mxu1 %v1407_v0  ;;  %v1411_v3 = vld [vmem:[%s1504_s26] sm:$0xff]   ;;  %v1412_v5 = vld [vmem:[%s1504_s26 + $0x8] sm:$0xff]   ;;  %v1413_v7 = vld [vmem:[%s1504_s26 + $0x10] sm:$0xff]   ;;  %s1542_s30 = scalar_lea.vmem %s1678_s2, %s1314_s27  ;;  %s359_s8 = scalar_lea.vmem %s1679_s3, %s1272_s5 }
  0x11   : > { %1336 = vmatpush3.bf16.msra.mxu0 %v1407_v0  ;;  %1379 = vmatpush3.bf16.msra.mxu1 %v1407_v0  ;;  %v1410_v4 = vld [vmem:[%s335_s23] sm:$0xff]   ;;  %v1420_v8 = vld [vmem:[%s1504_s26 + $0x48] sm:$0xff]   ;;  %v1421_v9 = vld [vmem:[%s1504_s26 + $0x50] sm:$0xff]   ;;  %s369_s11 = scalar_lea.vmem %s1680_s4, %s1272_s5 }
  0x12   : > { %1337 = vmatprep.subr.bf16.mxu0 %v1408_v1  ;;  %1376 = vmatprep.subr.bf16.mxu1 %v1408_v1  ;;  %v1419_v6 = vld [vmem:[%s1504_s26 + $0x40] sm:$0xff]   ;;  %v1414_v10 = vld [vmem:[%s1504_s26 + $0x18] sm:$0xff]   ;;  %v1416_v14 = vld [vmem:[%s1504_s26 + $0x28] sm:$0xff]  }
  0x13   : > { %1343 = vmatprep.mubr.msk.bf16.mxu0 %vm583_vm0, %v1411_v3  ;;  %1359 = vmatprep.mubr.msk.bf16.mxu1 %vm583_vm0, %v1419_v6  ;;  %v1422_v11 = vld [vmem:[%s1504_s26 + $0x58] sm:$0xff]   ;;  %v1415_v12 = vld [vmem:[%s1504_s26 + $0x20] sm:$0xff]   ;;  %v1424_v15 = vld [vmem:[%s1504_s26 + $0x68] sm:$0xff]  }
  0x14   : > { %v1423_v13 = vld [vmem:[%s1504_s26 + $0x60] sm:$0xff]   ;;  %v1417_v16 = vld [vmem:[%s1504_s26 + $0x30] sm:$0xff]   ;;  %v1418_v18 = vld [vmem:[%s1504_s26 + $0x38] sm:$0xff]  }
  0x15   : > { %1338 = vmatpush3.bf16.msra.mxu0 %v1408_v1  ;;  %1380 = vmatpush3.bf16.msra.mxu1 %v1408_v1  ;;  %v1425_v17 = vld [vmem:[%s1504_s26 + $0x70] sm:$0xff]   ;;  %v1426_v19 = vld [vmem:[%s1504_s26 + $0x78] sm:$0xff]  }
  0x16   : > { %1339 = vmatprep.subr.bf16.mxu0 %v1409_v2  ;;  %1377 = vmatprep.subr.bf16.mxu1 %v1409_v2 }
  0x19   : > { %1340 = vmatpush3.bf16.msra.mxu0 %v1409_v2  ;;  %1381 = vmatpush3.bf16.msra.mxu1 %v1409_v2 }
  0x1a   : > { %1341 = vmatprep.subr.bf16.mxu0 %v1410_v4  ;;  %1378 = vmatprep.subr.bf16.mxu1 %v1410_v4 }
  0x1d   : > { %1342 = vmatpush3.bf16.msra.mxu0 %v1410_v4  ;;  %1382 = vmatpush3.bf16.msra.mxu1 %v1410_v4 }
  0x20   : > { %1344 = vmatmul.mubr.msk.bf16.vlgmr.msra.gmra.mxu0 %vm583_vm0, %v1412_v5  ;;  %1360 = vmatmul.mubr.msk.bf16.vlgmr.msra.gmra.mxu1 %vm583_vm0, %v1420_v8 }
  0x21   : > { %1347 = vmatprep.mubr.msk.bf16.mxu0 %vm583_vm0, %v1413_v7  ;;  %1363 = vmatprep.mubr.msk.bf16.mxu1 %vm583_vm0, %v1421_v9 }
  0x28   : > { %1348 = vmatmul.mubr.msk.bf16.gmra.mxu0 %vm583_vm0, %v1414_v10  ;;  %1364 = vmatmul.mubr.msk.bf16.gmra.mxu1 %vm583_vm0, %v1422_v11 }
  0x29   : > { %1351 = vmatprep.mubr.msk.bf16.mxu0 %vm583_vm0, %v1415_v12  ;;  %1367 = vmatprep.mubr.msk.bf16.mxu1 %vm583_vm0, %v1423_v13 }
  0x30   : > { %1352 = vmatmul.mubr.msk.bf16.gmra.mxu0 %vm583_vm0, %v1416_v14  ;;  %1368 = vmatmul.mubr.msk.bf16.gmra.mxu1 %vm583_vm0, %v1424_v15 }
  0x31   : > { %1355 = vmatprep.mubr.msk.bf16.mxu0 %vm583_vm0, %v1417_v16  ;;  %1371 = vmatprep.mubr.msk.bf16.mxu1 %vm583_vm0, %v1425_v17 }
  0x38   : > { %1356 = vmatmul.mubr.msk.bf16.gmra.mxu0 %vm583_vm0, %v1418_v18  ;;  %1372 = vmatmul.mubr.msk.bf16.gmra.mxu1 %vm583_vm0, %v1426_v19 }
  0xe0   : > { %v1345_v20 = vpop.f32.mrf.mxu0  ;;  %v1544_v21 = vpop.f32.mrf.mxu1 }
  0xe1   : > { %894 = vst [vmem:[%s1542_s30 + $0x10] sm:$0xff] %v1345_v20  ;;  %910 = vst [vmem:[%s1542_s30 + $0x90] sm:$0xff] %v1544_v21  ;;  %v963_v33 = vmul.f32 %v1345_v20, %v1345_v20 }
  0xe2   : > { %v666_v22 = vpop.f32.mrf.mxu0  ;;  %v1549_v23 = vpop.f32.mrf.mxu1 }
  0xe3   : > { %892 = vst [vmem:[%s1542_s30] sm:$0xff] %v666_v22  ;;  %908 = vst [vmem:[%s1542_s30 + $0x80] sm:$0xff] %v1549_v23  ;;  %v961_v28 = vmul.f32 %v666_v22, %v666_v22 }
  0xe4   : > { %v1346_v24 = vpop.f32.mrf.mxu0  ;;  %v1554_v25 = vpop.f32.mrf.mxu1 }
  0xe5   : > { %895 = vst [vmem:[%s1542_s30 + $0x18] sm:$0xff] %v1346_v24  ;;  %911 = vst [vmem:[%s1542_s30 + $0x98] sm:$0xff] %v1554_v25  ;;  %v964_v38 = vmul.f32 %v1346_v24, %v1346_v24 }
  0xe6   : > { %v669_v26 = vpop.f32.mrf.mxu0  ;;  %v1559_v27 = vpop.f32.mrf.mxu1 }
  0xe7   : > { %893 = vst [vmem:[%s1542_s30 + $0x8] sm:$0xff] %v669_v26  ;;  %v924_v29 = vadd.f32 %v669_v26, %v666_v22  ;;  %v962_v30 = vmul.f32 %v669_v26, %v669_v26  ;;  %909 = vst [vmem:[%s1542_s30 + $0x88] sm:$0xff] %v1559_v27 }
  0xe8   : > { %v1349_v31 = vpop.f32.mrf.mxu0  ;;  %v1564_v32 = vpop.f32.mrf.mxu1 }
  0xe9   : > { %v925_v34 = vadd.f32 %v1345_v20, %v924_v29  ;;  %v993_v35 = vadd.f32 %v962_v30, %v961_v28  ;;  %898 = vst [vmem:[%s1542_s30 + $0x30] sm:$0xff] %v1349_v31  ;;  %914 = vst [vmem:[%s1542_s30 + $0xb0] sm:$0xff] %v1564_v32  ;;  %v967_v53 = vmul.f32 %v1349_v31, %v1349_v31 }
  0xea   : > { %v682_v36 = vpop.f32.mrf.mxu0  ;;  %v1569_v37 = vpop.f32.mrf.mxu1 }
  0xeb   : > { %v994_v39 = vadd.f32 %v993_v35, %v963_v33  ;;  %896 = vst [vmem:[%s1542_s30 + $0x20] sm:$0xff] %v682_v36  ;;  %v926_v40 = vadd.f32 %v1346_v24, %v925_v34  ;;  %912 = vst [vmem:[%s1542_s30 + $0xa0] sm:$0xff] %v1569_v37  ;;  %v965_v44 = vmul.f32 %v682_v36, %v682_v36 }
  0xec   : > { %v1350_v41 = vpop.f32.mrf.mxu0  ;;  %v1574_v42 = vpop.f32.mrf.mxu1 }
  0xed   : > { %v927_v43 = vadd.f32 %v926_v40, %v682_v36  ;;  %v995_v45 = vadd.f32 %v994_v39, %v964_v38  ;;  %899 = vst [vmem:[%s1542_s30 + $0x38] sm:$0xff] %v1350_v41  ;;  %915 = vst [vmem:[%s1542_s30 + $0xb8] sm:$0xff] %v1574_v42  ;;  %v968_v58 = vmul.f32 %v1350_v41, %v1350_v41 }
  0xee   : > { %v685_v46 = vpop.f32.mrf.mxu0  ;;  %v1579_v47 = vpop.f32.mrf.mxu1  ;;  %v977_v39 = vmul.f32 %v1549_v23, %v1549_v23 }
  0xef   : > { %v996_v48 = vadd.f32 %v995_v45, %v965_v44  ;;  %897 = vst [vmem:[%s1542_s30 + $0x28] sm:$0xff] %v685_v46  ;;  %v928_v49 = vadd.f32 %v927_v43, %v685_v46  ;;  %v966_v50 = vmul.f32 %v685_v46, %v685_v46  ;;  %913 = vst [vmem:[%s1542_s30 + $0xa8] sm:$0xff] %v1579_v47 }
  0xf0   : > { %v1353_v51 = vpop.f32.mrf.mxu0  ;;  %v1584_v52 = vpop.f32.mrf.mxu1  ;;  %v978_v44 = vmul.f32 %v1559_v27, %v1559_v27  ;;  %v979_v46 = vmul.f32 %v1544_v21, %v1544_v21 }
  0xf1   : > { %v929_v54 = vadd.f32 %v1349_v31, %v928_v49  ;;  %v997_v55 = vadd.f32 %v996_v48, %v966_v50  ;;  %902 = vst [vmem:[%s1542_s30 + $0x50] sm:$0xff] %v1353_v51  ;;  %918 = vst [vmem:[%s1542_s30 + $0xd0] sm:$0xff] %v1584_v52  ;;  %v971_v9 = vmul.f32 %v1353_v51, %v1353_v51 }
  0xf2   : > { %v698_v56 = vpop.f32.mrf.mxu0  ;;  %v1589_v57 = vpop.f32.mrf.mxu1  ;;  %v980_v50 = vmul.f32 %v1554_v25, %v1554_v25 }
  0xf3   : > { %v998_v59 = vadd.f32 %v997_v55, %v967_v53  ;;  %900 = vst [vmem:[%s1542_s30 + $0x40] sm:$0xff] %v698_v56  ;;  %v930_v60 = vadd.f32 %v1350_v41, %v929_v54  ;;  %916 = vst [vmem:[%s1542_s30 + $0xc0] sm:$0xff] %v1589_v57  ;;  %v969_v0 = vmul.f32 %v698_v56, %v698_v56 }
  0xf4   : > { %v1354_v61 = vpop.f32.mrf.mxu0  ;;  %v1594_v62 = vpop.f32.mrf.mxu1  ;;  %v981_v54 = vmul.f32 %v1569_v37, %v1569_v37 }
  0xf5   : > { %v931_v63 = vadd.f32 %v930_v60, %v698_v56  ;;  %v999_v1 = vadd.f32 %v998_v59, %v968_v58  ;;  %903 = vst [vmem:[%s1542_s30 + $0x58] sm:$0xff] %v1354_v61  ;;  %919 = vst [vmem:[%s1542_s30 + $0xd8] sm:$0xff] %v1594_v62  ;;  %v972_v14 = vmul.f32 %v1354_v61, %v1354_v61 }
  0xf6   : > { %v701_v2 = vpop.f32.mrf.mxu0  ;;  %v1599_v3 = vpop.f32.mrf.mxu1  ;;  %v982_v58 = vmul.f32 %v1579_v47, %v1579_v47 }
  0xf7   : > { %v1000_v4 = vadd.f32 %v999_v1, %v969_v0  ;;  %901 = vst [vmem:[%s1542_s30 + $0x48] sm:$0xff] %v701_v2  ;;  %v932_v5 = vadd.f32 %v931_v63, %v701_v2  ;;  %v970_v6 = vmul.f32 %v701_v2, %v701_v2  ;;  %917 = vst [vmem:[%s1542_s30 + $0xc8] sm:$0xff] %v1599_v3 }
  0xf8   : > { %v1357_v7 = vpop.f32.mrf.mxu0  ;;  %v1604_v8 = vpop.f32.mrf.mxu1  ;;  %v985_v0 = vmul.f32 %v1589_v57, %v1589_v57 }
  0xf9   : > { %v933_v10 = vadd.f32 %v1353_v51, %v932_v5  ;;  %v1001_v11 = vadd.f32 %v1000_v4, %v970_v6  ;;  %906 = vst [vmem:[%s1542_s30 + $0x70] sm:$0xff] %v1357_v7  ;;  %922 = vst [vmem:[%s1542_s30 + $0xf0] sm:$0xff] %v1604_v8  ;;  %v975_v31 = vmul.f32 %v1357_v7, %v1357_v7 }
  0xfa   : > { %v714_v12 = vpop.f32.mrf.mxu0  ;;  %v778_v13 = vpop.f32.mrf.mxu1  ;;  %v986_v4 = vmul.f32 %v1599_v3, %v1599_v3 }
  0xfb   : > { %v1002_v15 = vadd.f32 %v1001_v11, %v971_v9  ;;  %904 = vst [vmem:[%s1542_s30 + $0x60] sm:$0xff] %v714_v12  ;;  %v934_v16 = vadd.f32 %v1354_v61, %v933_v10  ;;  %920 = vst [vmem:[%s1542_s30 + $0xe0] sm:$0xff] %v778_v13  ;;  %v973_v20 = vmul.f32 %v714_v12, %v714_v12 }
  0xfc   : > { %v1358_v17 = vpop.f32.mrf.mxu0  ;;  %v1611_v18 = vpop.f32.mrf.mxu1  ;;  %v989_v10 = vmul.f32 %v778_v13, %v778_v13 }
  0xfd   : > { %v935_v19 = vadd.f32 %v934_v16, %v714_v12  ;;  %v1003_v22 = vadd.f32 %v1002_v15, %v972_v14  ;;  %907 = vst [vmem:[%s1542_s30 + $0x78] sm:$0xff] %v1358_v17  ;;  %923 = vst [vmem:[%s1542_s30 + $0xf8] sm:$0xff] %v1611_v18  ;;  %v976_v35 = vmul.f32 %v1358_v17, %v1358_v17 }
  0xfe   : > { %v717_v24 = vpop.f32.mrf.mxu0  ;;  %v781_v26 = vpop.f32.mrf.mxu1 }
  0xff   : > { %v1004_v28 = vadd.f32 %v1003_v22, %v973_v20  ;;  %905 = vst [vmem:[%s1542_s30 + $0x68] sm:$0xff] %v717_v24  ;;  %v936_v29 = vadd.f32 %v935_v19, %v717_v24  ;;  %v974_v30 = vmul.f32 %v717_v24, %v717_v24  ;;  %921 = vst [vmem:[%s1542_s30 + $0xe8] sm:$0xff] %v781_v26 }
 0x100   : > { %v990_v15 = vmul.f32 %v781_v26, %v781_v26 }
 0x101   : > { %v937_v33 = vadd.f32 %v1357_v7, %v936_v29  ;;  %v1005_v34 = vadd.f32 %v1004_v28, %v974_v30 }
 0x103   : > { %v938_v36 = vadd.f32 %v1358_v17, %v937_v33  ;;  %v1006_v38 = vadd.f32 %v1005_v34, %v975_v31  ;;  %v992_v17 = vmul.f32 %v1611_v18, %v1611_v18 }
 0x105   : > { %v1007_v40 = vadd.f32 %v1006_v38, %v976_v35  ;;  %v939_v41 = vadd.f32 %v938_v36, %v1549_v23 }
 0x107   : > { %v940_v43 = vadd.f32 %v939_v41, %v1559_v27  ;;  %v1008_v45 = vadd.f32 %v1007_v40, %v977_v39 }
 0x109   : > { %v941_v48 = vadd.f32 %v1544_v21, %v940_v43  ;;  %v1009_v49 = vadd.f32 %v1008_v45, %v978_v44  ;;  %v983_v21 = vmul.f32 %v1564_v32, %v1564_v32 }
 0x10b   : > { %v1010_v51 = vadd.f32 %v1009_v49, %v979_v46  ;;  %v942_v53 = vadd.f32 %v1554_v25, %v941_v48  ;;  %v984_v25 = vmul.f32 %v1574_v42, %v1574_v42 }
 0x10d   : > { %v943_v23 = vadd.f32 %v942_v53, %v1569_v37  ;;  %v1011_v55 = vadd.f32 %v1010_v51, %v980_v50 }
 0x10f   : > { %v1012_v27 = vadd.f32 %v1011_v55, %v981_v54  ;;  %v944_v56 = vadd.f32 %v943_v23, %v1579_v47 }
 0x111   : > { %v945_v59 = vadd.f32 %v1564_v32, %v944_v56  ;;  %v1013_v60 = vadd.f32 %v1012_v27, %v982_v58  ;;  %v987_v32 = vmul.f32 %v1584_v52, %v1584_v52 }
 0x113   : > { %v1014_v61 = vadd.f32 %v1013_v60, %v983_v21  ;;  %v946_v63 = vadd.f32 %v1574_v42, %v945_v59  ;;  %v988_v42 = vmul.f32 %v1594_v62, %v1594_v62 }
 0x115   : > { %v947_v37 = vadd.f32 %v946_v63, %v1589_v57  ;;  %v1015_v1 = vadd.f32 %v1014_v61, %v984_v25 }
 0x117   : > { %v1016_v2 = vadd.f32 %v1015_v1, %v985_v0  ;;  %v948_v47 = vadd.f32 %v947_v37, %v1599_v3  ;;  %v991_v3 = vmul.f32 %v1604_v8, %v1604_v8 }
 0x119   : > { %v949_v5 = vadd.f32 %v1584_v52, %v948_v47  ;;  %v1017_v6 = vadd.f32 %v1016_v2, %v986_v4 }
 0x11b   : > { %v1018_v7 = vadd.f32 %v1017_v6, %v987_v32  ;;  %v950_v9 = vadd.f32 %v1594_v62, %v949_v5 }
 0x11d   : > { %v951_v57 = vadd.f32 %v950_v9, %v778_v13  ;;  %v1019_v11 = vadd.f32 %v1018_v7, %v988_v42 }
 0x11f   : > { %v1020_v12 = vadd.f32 %v1019_v11, %v989_v10  ;;  %v952_v14 = vadd.f32 %v951_v57, %v781_v26 }
 0x121   : > { %v953_v16 = vadd.f32 %v1604_v8, %v952_v14  ;;  %v1021_v52 = vadd.f32 %v1020_v12, %v990_v15 }
 0x123   : > { %v954_v19 = vadd.f32 %v1611_v18, %v953_v16  ;;  %v1022_v20 = vadd.f32 %v1021_v52, %v991_v3 }
 0x125   : > { %v955_v62 = vrot.slane %v954_v19, 4  ;;  %v1023_v22 = vadd.f32 %v1022_v20, %v992_v17 }
 0x127   : > { %v956_v13 = vadd.f32 %v955_v62, %v954_v19  ;;  %v1024_v24 = vrot.slane %v1023_v22, 4 }
 0x129   : > { %v957_v28 = vrot.slane %v956_v13, 2  ;;  %v1025_v29 = vadd.f32 %v1024_v24, %v1023_v22 }
 0x12b   : > { %v958_v26 = vadd.f32 %v957_v28, %v956_v13  ;;  %v1026_v30 = vrot.slane %v1025_v29, 2 }
 0x12d   : > { %v959_v31 = vrot.slane %v958_v26, 1  ;;  %v1027_v33 = vadd.f32 %v1026_v30, %v1025_v29 }
 0x12f   : > { %v960_v8 = vadd.f32 %v959_v31, %v958_v26  ;;  %v1028_v34 = vrot.slane %v1027_v33, 1 }
 0x131   : > { %v1029_v18 = vadd.f32 %v1028_v34, %v1027_v33  ;;  %1030 = vst [vmem:[%s359_s8] sm:$0xff] %v960_v8 }
 0x133   : > { %1031 = vst [vmem:[%s369_s11] sm:$0xff] %v1029_v18 }
 0x134 PF: > { %s15_s17 = sadd.s32 1, %s1449_s17   ;;  %s1681_s15 = smov %s1445_s16 }
 0x135   : > { %p12_p5 = scmp.ge.s32.totalorder %s15_s17, 6   ;;  %s1682_s16 = smov %s1684_s18 }
 0x137   :  { %14 = sbr.rel (!%p12_p5) target bundleno = 2 (0x2), region = 93 }

// kernel: decoder_ir_forward.15
= control target key start
LH: loop header
LB: loop body
LE: loop exit
PB: predicated region body
PF: predicated region fallthrough
CT: control target
= control target key end

     0   :  { %s1499_s15 = smov 0   ;;  %s1501_s16 = smov 0   ;;  %s1713_s0 = inlined_call_operand.vmem [shape: bf16[4,512,32], index: 0, kind: input, shape index: {}]   ;;  %s1714_s1 = inlined_call_operand.vmem [shape: bf16[4,32,128], index: 1, kind: input, shape index: {}]   ;;  %s1715_s2 = inlined_call_operand.vmem [shape: f32[4,512,128], index: 2, kind: output, shape index: {0}]   ;;  %s1716_s3 = inlined_call_operand.vmem [shape: f32[4,16,128], index: 3, kind: output, shape index: {1}]   ;;  %s1717_s4 = inlined_call_operand.vmem [shape: f32[4,16,128], index: 4, kind: output, shape index: {2}]  }
   0x1   :  { %s1503_s17 = smov 0   ;;  %s1505_s18 = smov 0  }
   0x2   :  { %s1507_s19 = smov 0  }
   0x3 LB: > { %s37_s20 = sadd.s32 1, %s1464_s17  ;;  %s41_s21 = sadd.s32 1, %s1468_s18  ;;  %s1472_s19 = sphi %s1507_s19, %s15_s19   ;;  %s1468_s18 = sphi %s1505_s18, %s1721_s18   ;;  %s1464_s17 = sphi %s1503_s17, %s1720_s17   ;;  %s1460_s16 = sphi %s1501_s16, %s1719_s16   ;;  %s1456_s15 = sphi %s1499_s15, %s1718_s15  }
   0x4   : > { %p39_p0 = scmp.ge.s32.totalorder %s37_s20, 2  ;;  %p1268_p1 = scmp.ge.s32.totalorder %s1472_s19, 1 }
   0x5   : > { %p239_p2 = scmp.lt.s32.totalorder %s1472_s19, 9 }
   0x6   : > { %s1723_s20 = smov (%p39_p0, %s37_s20), 0  ;;  %s1725_s21 = smov (!%p39_p0, %s41_s21), %s1468_s18 }
   0x7   : > { %p240_p3 = pnand %p1268_p1, %p239_p2  ;;  %p43_p4 = scmp.ge.s32.totalorder %s1725_s21, 4 }
   0x8   : > { %s1269_s22 = sshll.u32 (!%p240_p3), %s1456_s15, 5  ;;  %p314_p5 = scmp.lt.s32.totalorder (!%p240_p3), %s1460_s16, 3 }
   0x9   : > { %s1727_s21 = smov (%p43_p4, %s1725_s21), 0  ;;  %243 = sbr.rel (%p240_p3) target bundleno = 302 (0x12e), region = 28 }
   0xa   : > { %p316_p6 = scmp.lt.s32.totalorder (!%p240_p3), %s1269_s22, 63  ;;  %p354_p7 = scmp.lt.s32.totalorder (!%p240_p3), %s1456_s15, 1 }
   0xe   : > { %s1729_s16 = smov (!%p314_p5, %s1460_s16), 3  ;;  %s1731_s22 = smov (!%p316_p6, %s1269_s22), 63  ;;  %vm571_vm0 = vcmask 261120  }
   0xf   : > { %s1270_s23 = sshll.u32 %s1729_s16, 6  ;;  %s1317_s24 = sshll.u32 %s1729_s16, 4 }
  0x10   : > { %s1536_s25 = sadd.s32 %s1270_s23, %s1731_s22  ;;  %s337_s28 = scalar_lea.vmem %s1714_s1, %s1317_s24 }
  0x11   : > { %s1271_s29 = sshll.u32 %s1536_s25, 2  ;;  %v1416_v0 = vld [vmem:[%s337_s28 + $0x8] sm:$0xff]   ;;  %v1417_v1 = vld [vmem:[%s337_s28] sm:$0xff]   ;;  %s1276_s7 = sshll.u32 %s1536_s25, 3 }
  0x12   : > { %s1545_s6 = scalar_lea.vmem %s1713_s0, %s1271_s29  ;;  %1336 = vmatprep.subr.bf16.mxu0 %v1416_v0  ;;  %1372 = vmatprep.subr.bf16.mxu1 %v1416_v0  ;;  %s1583_s10 = scalar_lea.vmem %s1715_s2, %s1276_s7 }
  0x13   : > { %v1418_v2 = vld [vmem:[%s1545_s6] sm:$0xff]   ;;  %1337 = vmatpush3.bf16.msra.mxu0 %v1416_v0  ;;  %1374 = vmatpush3.bf16.msra.mxu1 %v1416_v0  ;;  %v1419_v3 = vld [vmem:[%s1545_s6 + $0x8] sm:$0xff]   ;;  %v1420_v4 = vld [vmem:[%s1545_s6 + $0x10] sm:$0xff]   ;;  %s1733_s15 = smov (!%p354_p7, %s1456_s15), 1  ;;  %s1277_s11 = sshll.u32 %s1729_s16, 1 }
  0x14   : > { %1338 = vmatprep.subr.bf16.mxu0 %v1417_v1  ;;  %1340 = vmatprep.mubr.msk.bf16.mxu0 %vm571_vm0, %v1418_v2  ;;  %v1426_v5 = vld [vmem:[%s1545_s6 + $0x40] sm:$0xff]   ;;  %v1427_v6 = vld [vmem:[%s1545_s6 + $0x48] sm:$0xff]   ;;  %v1428_v7 = vld [vmem:[%s1545_s6 + $0x50] sm:$0xff]   ;;  %s360_s12 = sadd.s32 %s1277_s11, %s1733_s15 }
  0x15   : > { %1373 = vmatprep.subr.bf16.mxu1 %v1417_v1  ;;  %1356 = vmatprep.mubr.msk.bf16.mxu1 %vm571_vm0, %v1426_v5  ;;  %v1421_v8 = vld [vmem:[%s1545_s6 + $0x18] sm:$0xff]   ;;  %v1422_v9 = vld [vmem:[%s1545_s6 + $0x20] sm:$0xff]   ;;  %v1423_v12 = vld [vmem:[%s1545_s6 + $0x28] sm:$0xff]   ;;  %s1278_s13 = sshll.u32 %s360_s12, 3 }
  0x16   : > { %v1429_v10 = vld [vmem:[%s1545_s6 + $0x58] sm:$0xff]   ;;  %v1430_v11 = vld [vmem:[%s1545_s6 + $0x60] sm:$0xff]   ;;  %v1424_v13 = vld [vmem:[%s1545_s6 + $0x30] sm:$0xff]   ;;  %s362_s23 = scalar_lea.vmem %s1716_s3, %s1278_s13  ;;  %s373_s25 = scalar_lea.vmem %s1717_s4, %s1278_s13 }
  0x17   : > { %1339 = vmatpush3.bf16.msra.mxu0 %v1417_v1  ;;  %1375 = vmatpush3.bf16.msra.mxu1 %v1417_v1  ;;  %v1431_v14 = vld [vmem:[%s1545_s6 + $0x68] sm:$0xff]   ;;  %v1432_v15 = vld [vmem:[%s1545_s6 + $0x70] sm:$0xff]   ;;  %v1425_v16 = vld [vmem:[%s1545_s6 + $0x38] sm:$0xff]  }
  0x18   : > { %v1433_v17 = vld [vmem:[%s1545_s6 + $0x78] sm:$0xff]  }
  0x1a   : > { %1341 = vmatmul.mubr.msk.bf16.vlgmr.msra.gmra.mxu0 %vm571_vm0, %v1419_v3  ;;  %1357 = vmatmul.mubr.msk.bf16.vlgmr.msra.gmra.mxu1 %vm571_vm0, %v1427_v6 }
  0x1b   : > { %1344 = vmatprep.mubr.msk.bf16.mxu0 %vm571_vm0, %v1420_v4  ;;  %1360 = vmatprep.mubr.msk.bf16.mxu1 %vm571_vm0, %v1428_v7 }
  0x22   : > { %1345 = vmatmul.mubr.msk.bf16.gmra.mxu0 %vm571_vm0, %v1421_v8  ;;  %1361 = vmatmul.mubr.msk.bf16.gmra.mxu1 %vm571_vm0, %v1429_v10 }
  0x23   : > { %1348 = vmatprep.mubr.msk.bf16.mxu0 %vm571_vm0, %v1422_v9  ;;  %1364 = vmatprep.mubr.msk.bf16.mxu1 %vm571_vm0, %v1430_v11 }
  0x2a   : > { %1349 = vmatmul.mubr.msk.bf16.gmra.mxu0 %vm571_vm0, %v1423_v12  ;;  %1365 = vmatmul.mubr.msk.bf16.gmra.mxu1 %vm571_vm0, %v1431_v14 }
  0x2b   : > { %1352 = vmatprep.mubr.msk.bf16.mxu0 %vm571_vm0, %v1424_v13  ;;  %1368 = vmatprep.mubr.msk.bf16.mxu1 %vm571_vm0, %v1432_v15 }
  0x32   : > { %1353 = vmatmul.mubr.msk.bf16.gmra.mxu0 %vm571_vm0, %v1425_v16  ;;  %1369 = vmatmul.mubr.msk.bf16.gmra.mxu1 %vm571_vm0, %v1433_v17 }
  0xda   : > { %v1342_v18 = vpop.f32.mrf.mxu0  ;;  %v1587_v20 = vpop.f32.mrf.mxu1 }
  0xdb   : > { %882 = vst [vmem:[%s1583_s10 + $0x10] sm:$0xff] %v1342_v18  ;;  %898 = vst [vmem:[%s1583_s10 + $0x90] sm:$0xff] %v1587_v20  ;;  %v951_v29 = vmul.f32 %v1342_v18, %v1342_v18 }
  0xdc   : > { %v654_v19 = vpop.f32.mrf.mxu0  ;;  %v1592_v22 = vpop.f32.mrf.mxu1 }
  0xdd   : > { %880 = vst [vmem:[%s1583_s10] sm:$0xff] %v654_v19  ;;  %896 = vst [vmem:[%s1583_s10 + $0x80] sm:$0xff] %v1592_v22  ;;  %v949_v24 = vmul.f32 %v654_v19, %v654_v19 }
  0xde   : > { %v1343_v21 = vpop.f32.mrf.mxu0  ;;  %v1597_v27 = vpop.f32.mrf.mxu1 }
  0xdf   : > { %883 = vst [vmem:[%s1583_s10 + $0x18] sm:$0xff] %v1343_v21  ;;  %899 = vst [vmem:[%s1583_s10 + $0x98] sm:$0xff] %v1597_v27  ;;  %v952_v34 = vmul.f32 %v1343_v21, %v1343_v21 }
  0xe0   : > { %v657_v23 = vpop.f32.mrf.mxu0  ;;  %v1602_v32 = vpop.f32.mrf.mxu1 }
  0xe1   : > { %881 = vst [vmem:[%s1583_s10 + $0x8] sm:$0xff] %v657_v23  ;;  %v912_v25 = vadd.f32 %v657_v23, %v654_v19  ;;  %v950_v26 = vmul.f32 %v657_v23, %v657_v23  ;;  %897 = vst [vmem:[%s1583_s10 + $0x88] sm:$0xff] %v1602_v32 }
  0xe2   : > { %v1346_v28 = vpop.f32.mrf.mxu0  ;;  %v1607_v37 = vpop.f32.mrf.mxu1 }
  0xe3   : > { %v913_v30 = vadd.f32 %v1342_v18, %v912_v25  ;;  %v981_v31 = vadd.f32 %v950_v26, %v949_v24  ;;  %886 = vst [vmem:[%s1583_s10 + $0x30] sm:$0xff] %v1346_v28  ;;  %902 = vst [vmem:[%s1583_s10 + $0xb0] sm:$0xff] %v1607_v37  ;;  %v955_v49 = vmul.f32 %v1346_v28, %v1346_v28 }
  0xe4   : > { %v670_v33 = vpop.f32.mrf.mxu0  ;;  %v1612_v42 = vpop.f32.mrf.mxu1 }
  0xe5   : > { %v982_v35 = vadd.f32 %v981_v31, %v951_v29  ;;  %884 = vst [vmem:[%s1583_s10 + $0x20] sm:$0xff] %v670_v33  ;;  %v914_v36 = vadd.f32 %v1343_v21, %v913_v30  ;;  %v953_v40 = vmul.f32 %v670_v33, %v670_v33  ;;  %900 = vst [vmem:[%s1583_s10 + $0xa0] sm:$0xff] %v1612_v42 }
  0xe6   : > { %v1347_v38 = vpop.f32.mrf.mxu0  ;;  %v1617_v47 = vpop.f32.mrf.mxu1 }
  0xe7   : > { %v915_v39 = vadd.f32 %v914_v36, %v670_v33  ;;  %v983_v41 = vadd.f32 %v982_v35, %v952_v34  ;;  %887 = vst [vmem:[%s1583_s10 + $0x38] sm:$0xff] %v1347_v38  ;;  %903 = vst [vmem:[%s1583_s10 + $0xb8] sm:$0xff] %v1617_v47  ;;  %v956_v54 = vmul.f32 %v1347_v38, %v1347_v38 }
  0xe8   : > { %v673_v43 = vpop.f32.mrf.mxu0  ;;  %v1622_v52 = vpop.f32.mrf.mxu1  ;;  %v965_v35 = vmul.f32 %v1592_v22, %v1592_v22 }
  0xe9   : > { %v984_v44 = vadd.f32 %v983_v41, %v953_v40  ;;  %885 = vst [vmem:[%s1583_s10 + $0x28] sm:$0xff] %v673_v43  ;;  %v916_v45 = vadd.f32 %v915_v39, %v673_v43  ;;  %v954_v46 = vmul.f32 %v673_v43, %v673_v43  ;;  %901 = vst [vmem:[%s1583_s10 + $0xa8] sm:$0xff] %v1622_v52 }
  0xea   : > { %v1350_v48 = vpop.f32.mrf.mxu0  ;;  %v1627_v57 = vpop.f32.mrf.mxu1  ;;  %v966_v40 = vmul.f32 %v1602_v32, %v1602_v32  ;;  %v967_v43 = vmul.f32 %v1587_v20, %v1587_v20 }
  0xeb   : > { %v917_v50 = vadd.f32 %v1346_v28, %v916_v45  ;;  %v985_v51 = vadd.f32 %v984_v44, %v954_v46  ;;  %890 = vst [vmem:[%s1583_s10 + $0x50] sm:$0xff] %v1350_v48  ;;  %906 = vst [vmem:[%s1583_s10 + $0xd0] sm:$0xff] %v1627_v57  ;;  %v959_v5 = vmul.f32 %v1350_v48, %v1350_v48 }
  0xec   : > { %v686_v53 = vpop.f32.mrf.mxu0  ;;  %v1632_v62 = vpop.f32.mrf.mxu1  ;;  %v968_v46 = vmul.f32 %v1597_v27, %v1597_v27 }
  0xed   : > { %v986_v55 = vadd.f32 %v985_v51, %v955_v49  ;;  %888 = vst [vmem:[%s1583_s10 + $0x40] sm:$0xff] %v686_v53  ;;  %v918_v56 = vadd.f32 %v1347_v38, %v917_v50  ;;  %v957_v60 = vmul.f32 %v686_v53, %v686_v53  ;;  %904 = vst [vmem:[%s1583_s10 + $0xc0] sm:$0xff] %v1632_v62 }
  0xee   : > { %v1351_v58 = vpop.f32.mrf.mxu0  ;;  %v1637_v3 = vpop.f32.mrf.mxu1  ;;  %v969_v50 = vmul.f32 %v1612_v42, %v1612_v42 }
  0xef   : > { %v919_v59 = vadd.f32 %v918_v56, %v686_v53  ;;  %v987_v61 = vadd.f32 %v986_v55, %v956_v54  ;;  %891 = vst [vmem:[%s1583_s10 + $0x58] sm:$0xff] %v1351_v58  ;;  %907 = vst [vmem:[%s1583_s10 + $0xd8] sm:$0xff] %v1637_v3  ;;  %v960_v10 = vmul.f32 %v1351_v58, %v1351_v58 }
  0xf0   : > { %v689_v63 = vpop.f32.mrf.mxu0  ;;  %v753_v8 = vpop.f32.mrf.mxu1  ;;  %v970_v54 = vmul.f32 %v1622_v52, %v1622_v52 }
  0xf1   : > { %v988_v0 = vadd.f32 %v987_v61, %v957_v60  ;;  %889 = vst [vmem:[%s1583_s10 + $0x48] sm:$0xff] %v689_v63  ;;  %v920_v1 = vadd.f32 %v919_v59, %v689_v63  ;;  %v958_v2 = vmul.f32 %v689_v63, %v689_v63  ;;  %905 = vst [vmem:[%s1583_s10 + $0xc8] sm:$0xff] %v753_v8 }
  0xf2   : > { %v1354_v4 = vpop.f32.mrf.mxu0  ;;  %v1644_v13 = vpop.f32.mrf.mxu1  ;;  %v973_v60 = vmul.f32 %v1632_v62, %v1632_v62 }
  0xf3   : > { %v921_v6 = vadd.f32 %v1350_v48, %v920_v1  ;;  %v989_v7 = vadd.f32 %v988_v0, %v958_v2  ;;  %894 = vst [vmem:[%s1583_s10 + $0x70] sm:$0xff] %v1354_v4  ;;  %910 = vst [vmem:[%s1583_s10 + $0xf0] sm:$0xff] %v1644_v13  ;;  %v963_v26 = vmul.f32 %v1354_v4, %v1354_v4 }
  0xf4   : > { %v702_v9 = vpop.f32.mrf.mxu0  ;;  %v766_v18 = vpop.f32.mrf.mxu1  ;;  %v974_v0 = vmul.f32 %v753_v8, %v753_v8 }
  0xf5   : > { %v990_v11 = vadd.f32 %v989_v7, %v959_v5  ;;  %892 = vst [vmem:[%s1583_s10 + $0x60] sm:$0xff] %v702_v9  ;;  %v922_v12 = vadd.f32 %v1351_v58, %v921_v6  ;;  %v961_v16 = vmul.f32 %v702_v9, %v702_v9  ;;  %908 = vst [vmem:[%s1583_s10 + $0xe0] sm:$0xff] %v766_v18 }
  0xf6   : > { %v1355_v14 = vpop.f32.mrf.mxu0  ;;  %v1371_v25 = vpop.f32.mrf.mxu1  ;;  %v977_v6 = vmul.f32 %v766_v18, %v766_v18 }
  0xf7   : > { %v923_v15 = vadd.f32 %v922_v12, %v702_v9  ;;  %v991_v17 = vadd.f32 %v990_v11, %v960_v10  ;;  %895 = vst [vmem:[%s1583_s10 + $0x78] sm:$0xff] %v1355_v14  ;;  %911 = vst [vmem:[%s1583_s10 + $0xf8] sm:$0xff] %v1371_v25  ;;  %v964_v31 = vmul.f32 %v1355_v14, %v1355_v14 }
  0xf8   : > { %v705_v19 = vpop.f32.mrf.mxu0  ;;  %v769_v30 = vpop.f32.mrf.mxu1  ;;  %v979_v11 = vmul.f32 %v1644_v13, %v1644_v13 }
  0xf9   : > { %v992_v21 = vadd.f32 %v991_v17, %v961_v16  ;;  %893 = vst [vmem:[%s1583_s10 + $0x68] sm:$0xff] %v705_v19  ;;  %v924_v23 = vadd.f32 %v923_v15, %v705_v19  ;;  %v962_v24 = vmul.f32 %v705_v19, %v705_v19  ;;  %909 = vst [vmem:[%s1583_s10 + $0xe8] sm:$0xff] %v769_v30 }
  0xfb   : > { %v925_v28 = vadd.f32 %v1354_v4, %v924_v23  ;;  %v993_v29 = vadd.f32 %v992_v21, %v962_v24  ;;  %v976_v4 = vmul.f32 %v1637_v3, %v1637_v3 }
  0xfd   : > { %v926_v33 = vadd.f32 %v1355_v14, %v925_v28  ;;  %v994_v34 = vadd.f32 %v993_v29, %v963_v26  ;;  %v980_v14 = vmul.f32 %v1371_v25, %v1371_v25 }
  0xff   : > { %v995_v36 = vadd.f32 %v994_v34, %v964_v31  ;;  %v927_v38 = vadd.f32 %v926_v33, %v1592_v22 }
 0x101   : > { %v928_v39 = vadd.f32 %v927_v38, %v1602_v32  ;;  %v996_v41 = vadd.f32 %v995_v36, %v965_v35 }
 0x103   : > { %v929_v44 = vadd.f32 %v1587_v20, %v928_v39  ;;  %v997_v45 = vadd.f32 %v996_v41, %v966_v40  ;;  %v971_v20 = vmul.f32 %v1607_v37, %v1607_v37 }
 0x105   : > { %v998_v48 = vadd.f32 %v997_v45, %v967_v43  ;;  %v930_v49 = vadd.f32 %v1597_v27, %v929_v44  ;;  %v972_v27 = vmul.f32 %v1617_v47, %v1617_v47 }
 0x107   : > { %v931_v22 = vadd.f32 %v930_v49, %v1612_v42  ;;  %v999_v51 = vadd.f32 %v998_v48, %v968_v46 }
 0x109   : > { %v1000_v32 = vadd.f32 %v999_v51, %v969_v50  ;;  %v932_v53 = vadd.f32 %v931_v22, %v1622_v52 }
 0x10b   : > { %v933_v55 = vadd.f32 %v1607_v37, %v932_v53  ;;  %v1001_v56 = vadd.f32 %v1000_v32, %v970_v54  ;;  %v975_v37 = vmul.f32 %v1627_v57, %v1627_v57 }
 0x10d   : > { %v1002_v58 = vadd.f32 %v1001_v56, %v971_v20  ;;  %v934_v59 = vadd.f32 %v1617_v47, %v933_v55 }
 0x10f   : > { %v935_v42 = vadd.f32 %v934_v59, %v1632_v62  ;;  %v1003_v61 = vadd.f32 %v1002_v58, %v972_v27 }
 0x111   : > { %v1004_v52 = vadd.f32 %v1003_v61, %v973_v60  ;;  %v936_v63 = vadd.f32 %v935_v42, %v753_v8  ;;  %v978_v8 = vmul.f32 %v769_v30, %v769_v30 }
 0x113   : > { %v937_v1 = vadd.f32 %v1627_v57, %v936_v63  ;;  %v1005_v2 = vadd.f32 %v1004_v52, %v974_v0 }
 0x115   : > { %v1006_v47 = vadd.f32 %v1005_v2, %v975_v37  ;;  %v938_v5 = vadd.f32 %v1637_v3, %v937_v1 }
 0x117   : > { %v939_v62 = vadd.f32 %v938_v5, %v766_v18  ;;  %v1007_v7 = vadd.f32 %v1006_v47, %v976_v4 }
 0x119   : > { %v1008_v9 = vadd.f32 %v1007_v7, %v977_v6  ;;  %v940_v10 = vadd.f32 %v939_v62, %v769_v30 }
 0x11b   : > { %v941_v57 = vadd.f32 %v1644_v13, %v940_v10  ;;  %v1009_v12 = vadd.f32 %v1008_v9, %v978_v8 }
 0x11d   : > { %v942_v15 = vadd.f32 %v1371_v25, %v941_v57  ;;  %v1010_v16 = vadd.f32 %v1009_v12, %v979_v11 }
 0x11f   : > { %v943_v17 = vrot.slane %v942_v15, 4  ;;  %v1011_v3 = vadd.f32 %v1010_v16, %v980_v14 }
 0x121   : > { %v944_v19 = vadd.f32 %v943_v17, %v942_v15  ;;  %v1012_v18 = vrot.slane %v1011_v3, 4 }
 0x123   : > { %v945_v21 = vrot.slane %v944_v19, 2  ;;  %v1013_v23 = vadd.f32 %v1012_v18, %v1011_v3 }
 0x125   : > { %v946_v24 = vadd.f32 %v945_v21, %v944_v19  ;;  %v1014_v26 = vrot.slane %v1013_v23, 2 }
 0x127   : > { %v947_v28 = vrot.slane %v946_v24, 1  ;;  %v1015_v29 = vadd.f32 %v1014_v26, %v1013_v23 }
 0x129   : > { %v948_v13 = vadd.f32 %v947_v28, %v946_v24  ;;  %v1016_v25 = vrot.slane %v1015_v29, 1 }
 0x12b   : > { %v1017_v30 = vadd.f32 %v1016_v25, %v1015_v29  ;;  %1018 = vst [vmem:[%s362_s23] sm:$0xff] %v948_v13 }
 0x12d   : > { %1019 = vst [vmem:[%s373_s25] sm:$0xff] %v1017_v30 }
 0x12e PF: > { %s15_s19 = sadd.s32 1, %s1472_s19   ;;  %s1718_s15 = smov %s1464_s17 }
 0x12f   : > { %p12_p8 = scmp.ge.s32.totalorder %s15_s19, 10   ;;  %s1719_s16 = smov %s1468_s18 }
 0x130   : > { %s1720_s17 = smov %s1723_s20  ;;  %s1721_s18 = smov %s1727_s21 }
 0x131   :  { %14 = sbr.rel (!%p12_p8) target bundleno = 3 (0x3), region = 93 }

// kernel: decoder_ir_forward.16
= control target key start
LH: loop header
LB: loop body
LE: loop exit
PB: predicated region body
PF: predicated region fallthrough
CT: control target
= control target key end

     0   :  { %s613_s12 = smov 0   ;;  %s900_s0 = inlined_call_operand.vmem [shape: f32[2048,128], index: 0, kind: input, shape index: {}]   ;;  %s901_s1 = inlined_call_operand.vmem [shape: f32[1,128], index: 1, kind: input, shape index: {}]   ;;  %s902_s2 = inlined_call_operand.vmem [shape: f32[1,128], index: 2, kind: input, shape index: {}]   ;;  %s903_s3 = inlined_call_operand.vmem [shape: f32[2048,128], index: 3, kind: output, shape index: {}]  }
   0x1 LB: > { %s564_s13 = sadd.s32 4294967295, %s591_s12   ;;  %p568_p0 = scmp.ge.s32.totalorder %s591_s12, 1  ;;  %s591_s12 = sphi %s613_s12, %s13_s12  }
   0x2   : > { %p138_p1 = scmp.lt.s32.totalorder %s591_s12, 5 }
   0x4   : > { %p139_p2 = pnand %p568_p0, %p138_p1 }
   0x5   : > { %s569_s14 = sshll.u32 (!%p139_p2), %s564_s13, 6 }
   0x6   : > { %142 = sbr.rel (%p139_p2) target bundleno = 68 (0x44), region = 32  ;;  %p163_p3 = scmp.lt.s32.totalorder (!%p139_p2), %s569_s14, 255 }
   0xb   : > { %s905_s14 = smov (!%p163_p3, %s569_s14), 255  ;;  %v624_v0 = vld [vmem:[%s901_s1] ss:$0 sm:$0xff] }
   0xc   : > { %s570_s15 = sshll.u32 %s905_s14, 3  ;;  %v634_v1 = vld [vmem:[%s902_s2] ss:$0 sm:$0xff] }
   0xd   : > { %s629_s20 = scalar_lea.vmem %s900_s0, %s570_s15  ;;  %s657_s25 = scalar_lea.vmem %s903_s3, %s570_s15 }
   0xe   : > { %v174_v2 = vld [vmem:[%s629_s20] sm:$0xff]  ;;  %v175_v3 = vld [vmem:[%s629_s20 + $0x8] sm:$0xff]  ;;  %v176_v4 = vld [vmem:[%s629_s20 + $0x10] sm:$0xff] }
   0xf   : > { %v245_v5 = vmul.f32 %v624_v0, %v174_v2  ;;  %v246_v6 = vmul.f32 %v624_v0, %v175_v3  ;;  %v247_v7 = vmul.f32 %v624_v0, %v176_v4  ;;  %v177_v8 = vld [vmem:[%s629_s20 + $0x18] sm:$0xff]  ;;  %v178_v9 = vld [vmem:[%s629_s20 + $0x20] sm:$0xff]  ;;  %v179_v10 = vld [vmem:[%s629_s20 + $0x28] sm:$0xff] }
  0x10   : > { %v248_v11 = vmul.f32 %v624_v0, %v177_v8  ;;  %v249_v12 = vmul.f32 %v624_v0, %v178_v9  ;;  %v250_v13 = vmul.f32 %v624_v0, %v179_v10  ;;  %v180_v14 = vld [vmem:[%s629_s20 + $0x30] sm:$0xff]  ;;  %v181_v15 = vld [vmem:[%s629_s20 + $0x38] sm:$0xff]  ;;  %v182_v24 = vld [vmem:[%s629_s20 + $0x40] sm:$0xff] }
  0x11   : > { %v316_v16 = vadd.f32 %v634_v1, %v245_v5  ;;  %v317_v17 = vadd.f32 %v634_v1, %v246_v6  ;;  %v318_v18 = vadd.f32 %v634_v1, %v247_v7  ;;  %v251_v19 = vmul.f32 %v624_v0, %v180_v14  ;;  %v183_v25 = vld [vmem:[%s629_s20 + $0x48] sm:$0xff]  ;;  %v184_v26 = vld [vmem:[%s629_s20 + $0x50] sm:$0xff]  ;;  %v185_v31 = vld [vmem:[%s629_s20 + $0x58] sm:$0xff] }
  0x12   : > { %v319_v20 = vadd.f32 %v634_v1, %v248_v11  ;;  %v320_v21 = vadd.f32 %v634_v1, %v249_v12  ;;  %v321_v22 = vadd.f32 %v634_v1, %v250_v13  ;;  %v252_v23 = vmul.f32 %v624_v0, %v181_v15  ;;  %v186_v32 = vld [vmem:[%s629_s20 + $0x60] sm:$0xff]  ;;  %v187_v33 = vld [vmem:[%s629_s20 + $0x68] sm:$0xff]  ;;  %v188_v38 = vld [vmem:[%s629_s20 + $0x70] sm:$0xff] }
  0x13   : > { %v380_v27 = vmax.f32 %v316_v16, 0.0  ;;  %v381_v28 = vmax.f32 %v317_v17, 0.0  ;;  %v382_v29 = vmax.f32 %v318_v18, 0.0  ;;  %v322_v30 = vadd.f32 %v634_v1, %v251_v19  ;;  %v189_v43 = vld [vmem:[%s629_s20 + $0x78] sm:$0xff]  ;;  %v190_v56 = vld [vmem:[%s629_s20 + $0x80] sm:$0xff]  ;;  %v191_v57 = vld [vmem:[%s629_s20 + $0x88] sm:$0xff] }
  0x14   : > { %v383_v34 = vmax.f32 %v319_v20, 0.0  ;;  %v384_v35 = vmax.f32 %v320_v21, 0.0  ;;  %v385_v36 = vmax.f32 %v321_v22, 0.0  ;;  %v323_v37 = vadd.f32 %v634_v1, %v252_v23  ;;  %v192_v58 = vld [vmem:[%s629_s20 + $0x90] sm:$0xff]  ;;  %v193_v63 = vld [vmem:[%s629_s20 + $0x98] sm:$0xff]  ;;  %v194_v2 = vld [vmem:[%s629_s20 + $0xa0] sm:$0xff] }
  0x15   : > { %444 = vst [vmem:[%s657_s25] sm:$0xff] %v380_v27  ;;  %445 = vst [vmem:[%s657_s25 + $0x8] sm:$0xff] %v381_v28  ;;  %v386_v39 = vmax.f32 %v322_v30, 0.0  ;;  %v253_v40 = vmul.f32 %v624_v0, %v182_v24  ;;  %v254_v41 = vmul.f32 %v624_v0, %v183_v25  ;;  %v255_v42 = vmul.f32 %v624_v0, %v184_v26  ;;  %v195_v3 = vld [vmem:[%s629_s20 + $0xa8] sm:$0xff]  ;;  %v196_v8 = vld [vmem:[%s629_s20 + $0xb0] sm:$0xff] }
  0x16   : > { %446 = vst [vmem:[%s657_s25 + $0x10] sm:$0xff] %v382_v29  ;;  %447 = vst [vmem:[%s657_s25 + $0x18] sm:$0xff] %v383_v34  ;;  %v387_v44 = vmax.f32 %v323_v37, 0.0  ;;  %v256_v45 = vmul.f32 %v624_v0, %v185_v31  ;;  %v257_v46 = vmul.f32 %v624_v0, %v186_v32  ;;  %v258_v47 = vmul.f32 %v624_v0, %v187_v33  ;;  %v197_v13 = vld [vmem:[%s629_s20 + $0xb8] sm:$0xff]  ;;  %v198_v26 = vld [vmem:[%s629_s20 + $0xc0] sm:$0xff] }
  0x17   : > { %448 = vst [vmem:[%s657_s25 + $0x20] sm:$0xff] %v384_v35  ;;  %449 = vst [vmem:[%s657_s25 + $0x28] sm:$0xff] %v385_v36  ;;  %v324_v48 = vadd.f32 %v634_v1, %v253_v40  ;;  %v325_v49 = vadd.f32 %v634_v1, %v254_v41  ;;  %v326_v50 = vadd.f32 %v634_v1, %v255_v42  ;;  %v199_v27 = vld [vmem:[%s629_s20 + $0xc8] sm:$0xff]  ;;  %v200_v28 = vld [vmem:[%s629_s20 + $0xd0] sm:$0xff] }
  0x18   : > { %450 = vst [vmem:[%s657_s25 + $0x30] sm:$0xff] %v386_v39  ;;  %v259_v51 = vmul.f32 %v624_v0, %v188_v38  ;;  %451 = vst [vmem:[%s657_s25 + $0x38] sm:$0xff] %v387_v44  ;;  %v327_v52 = vadd.f32 %v634_v1, %v256_v45  ;;  %v328_v53 = vadd.f32 %v634_v1, %v257_v46  ;;  %v201_v33 = vld [vmem:[%s629_s20 + $0xd8] sm:$0xff]  ;;  %v202_v34 = vld [vmem:[%s629_s20 + $0xe0] sm:$0xff] }
  0x19   : > { %v329_v54 = vadd.f32 %v634_v1, %v258_v47  ;;  %v260_v55 = vmul.f32 %v624_v0, %v189_v43  ;;  %v388_v59 = vmax.f32 %v324_v48, 0.0  ;;  %v389_v60 = vmax.f32 %v325_v49, 0.0  ;;  %v203_v35 = vld [vmem:[%s629_s20 + $0xe8] sm:$0xff]  ;;  %v204_v40 = vld [vmem:[%s629_s20 + $0xf0] sm:$0xff]  ;;  %v205_v45 = vld [vmem:[%s629_s20 + $0xf8] sm:$0xff] }
  0x1a   : > { %v390_v61 = vmax.f32 %v326_v50, 0.0  ;;  %v330_v62 = vadd.f32 %v634_v1, %v259_v51  ;;  %v391_v4 = vmax.f32 %v327_v52, 0.0  ;;  %v392_v5 = vmax.f32 %v328_v53, 0.0 }
  0x1b   : > { %v393_v6 = vmax.f32 %v329_v54, 0.0  ;;  %v331_v7 = vadd.f32 %v634_v1, %v260_v55  ;;  %452 = vst [vmem:[%s657_s25 + $0x40] sm:$0xff] %v388_v59  ;;  %453 = vst [vmem:[%s657_s25 + $0x48] sm:$0xff] %v389_v60  ;;  %v261_v10 = vmul.f32 %v624_v0, %v190_v56  ;;  %v262_v11 = vmul.f32 %v624_v0, %v191_v57  ;;  %v207_v59 = vld [vmem:[%s629_s20 + $0x108] sm:$0xff]  ;;  %v208_v60 = vld [vmem:[%s629_s20 + $0x110] sm:$0xff] }
  0x1c   : > { %454 = vst [vmem:[%s657_s25 + $0x50] sm:$0xff] %v390_v61  ;;  %v394_v9 = vmax.f32 %v330_v62, 0.0  ;;  %v263_v12 = vmul.f32 %v624_v0, %v192_v58  ;;  %455 = vst [vmem:[%s657_s25 + $0x58] sm:$0xff] %v391_v4  ;;  %v264_v15 = vmul.f32 %v624_v0, %v193_v63  ;;  %v265_v16 = vmul.f32 %v624_v0, %v194_v2  ;;  %v206_v58 = vld [vmem:[%s629_s20 + $0x100] sm:$0xff] }
  0x1d   : > { %456 = vst [vmem:[%s657_s25 + $0x60] sm:$0xff] %v392_v5  ;;  %457 = vst [vmem:[%s657_s25 + $0x68] sm:$0xff] %v393_v6  ;;  %v395_v14 = vmax.f32 %v331_v7, 0.0  ;;  %v266_v17 = vmul.f32 %v624_v0, %v195_v3  ;;  %v332_v18 = vadd.f32 %v634_v1, %v261_v10  ;;  %v333_v19 = vadd.f32 %v634_v1, %v262_v11  ;;  %v209_v3 = vld [vmem:[%s629_s20 + $0x118] sm:$0xff]  ;;  %v210_v4 = vld [vmem:[%s629_s20 + $0x120] sm:$0xff] }
  0x1e   : > { %458 = vst [vmem:[%s657_s25 + $0x70] sm:$0xff] %v394_v9  ;;  %v334_v20 = vadd.f32 %v634_v1, %v263_v12  ;;  %v267_v21 = vmul.f32 %v624_v0, %v196_v8  ;;  %v335_v22 = vadd.f32 %v634_v1, %v264_v15  ;;  %v336_v23 = vadd.f32 %v634_v1, %v265_v16  ;;  %v211_v5 = vld [vmem:[%s629_s20 + $0x128] sm:$0xff]  ;;  %v212_v10 = vld [vmem:[%s629_s20 + $0x130] sm:$0xff]  ;;  %v213_v15 = vld [vmem:[%s629_s20 + $0x138] sm:$0xff] }
  0x1f   : > { %459 = vst [vmem:[%s657_s25 + $0x78] sm:$0xff] %v395_v14  ;;  %v337_v24 = vadd.f32 %v634_v1, %v266_v17  ;;  %v268_v25 = vmul.f32 %v624_v0, %v197_v13  ;;  %v396_v29 = vmax.f32 %v332_v18, 0.0  ;;  %v397_v30 = vmax.f32 %v333_v19, 0.0 }
  0x20   : > { %v398_v31 = vmax.f32 %v334_v20, 0.0  ;;  %v338_v32 = vadd.f32 %v634_v1, %v267_v21  ;;  %v399_v36 = vmax.f32 %v335_v22, 0.0  ;;  %v400_v37 = vmax.f32 %v336_v23, 0.0 }
  0x21   : > { %v401_v38 = vmax.f32 %v337_v24, 0.0  ;;  %v339_v39 = vadd.f32 %v634_v1, %v268_v25  ;;  %460 = vst [vmem:[%s657_s25 + $0x80] sm:$0xff] %v396_v29  ;;  %461 = vst [vmem:[%s657_s25 + $0x88] sm:$0xff] %v397_v30  ;;  %v269_v42 = vmul.f32 %v624_v0, %v198_v26  ;;  %v270_v43 = vmul.f32 %v624_v0, %v199_v27  ;;  %v215_v29 = vld [vmem:[%s629_s20 + $0x148] sm:$0xff]  ;;  %v216_v30 = vld [vmem:[%s629_s20 + $0x150] sm:$0xff] }
  0x22   : > { %462 = vst [vmem:[%s657_s25 + $0x90] sm:$0xff] %v398_v31  ;;  %v402_v41 = vmax.f32 %v338_v32, 0.0  ;;  %v271_v44 = vmul.f32 %v624_v0, %v200_v28  ;;  %463 = vst [vmem:[%s657_s25 + $0x98] sm:$0xff] %v399_v36  ;;  %v272_v47 = vmul.f32 %v624_v0, %v201_v33  ;;  %v273_v48 = vmul.f32 %v624_v0, %v202_v34  ;;  %v214_v28 = vld [vmem:[%s629_s20 + $0x140] sm:$0xff] }
  0x23   : > { %464 = vst [vmem:[%s657_s25 + $0xa0] sm:$0xff] %v400_v37  ;;  %465 = vst [vmem:[%s657_s25 + $0xa8] sm:$0xff] %v401_v38  ;;  %v403_v46 = vmax.f32 %v339_v39, 0.0  ;;  %v274_v49 = vmul.f32 %v624_v0, %v203_v35  ;;  %v340_v50 = vadd.f32 %v634_v1, %v269_v42  ;;  %v341_v51 = vadd.f32 %v634_v1, %v270_v43  ;;  %v217_v35 = vld [vmem:[%s629_s20 + $0x158] sm:$0xff]  ;;  %v218_v36 = vld [vmem:[%s629_s20 + $0x160] sm:$0xff] }
  0x24   : > { %466 = vst [vmem:[%s657_s25 + $0xb0] sm:$0xff] %v402_v41  ;;  %v342_v52 = vadd.f32 %v634_v1, %v271_v44  ;;  %v275_v53 = vmul.f32 %v624_v0, %v204_v40  ;;  %v343_v54 = vadd.f32 %v634_v1, %v272_v47  ;;  %v344_v55 = vadd.f32 %v634_v1, %v273_v48  ;;  %v219_v37 = vld [vmem:[%s629_s20 + $0x168] sm:$0xff]  ;;  %v220_v42 = vld [vmem:[%s629_s20 + $0x170] sm:$0xff]  ;;  %v221_v47 = vld [vmem:[%s629_s20 + $0x178] sm:$0xff] }
  0x25   : > { %467 = vst [vmem:[%s657_s25 + $0xb8] sm:$0xff] %v403_v46  ;;  %v345_v56 = vadd.f32 %v634_v1, %v274_v49  ;;  %v276_v57 = vmul.f32 %v624_v0, %v205_v45  ;;  %v404_v61 = vmax.f32 %v340_v50, 0.0  ;;  %v405_v62 = vmax.f32 %v341_v51, 0.0 }
  0x26   : > { %v406_v63 = vmax.f32 %v342_v52, 0.0  ;;  %v346_v2 = vadd.f32 %v634_v1, %v275_v53  ;;  %v407_v6 = vmax.f32 %v343_v54, 0.0  ;;  %v408_v7 = vmax.f32 %v344_v55, 0.0 }
  0x27   : > { %v409_v8 = vmax.f32 %v345_v56, 0.0  ;;  %v347_v9 = vadd.f32 %v634_v1, %v276_v57  ;;  %468 = vst [vmem:[%s657_s25 + $0xc0] sm:$0xff] %v404_v61  ;;  %469 = vst [vmem:[%s657_s25 + $0xc8] sm:$0xff] %v405_v62  ;;  %v277_v12 = vmul.f32 %v624_v0, %v206_v58  ;;  %v278_v13 = vmul.f32 %v624_v0, %v207_v59  ;;  %v223_v61 = vld [vmem:[%s629_s20 + $0x188] sm:$0xff]  ;;  %v224_v62 = vld [vmem:[%s629_s20 + $0x190] sm:$0xff] }
  0x28   : > { %470 = vst [vmem:[%s657_s25 + $0xd0] sm:$0xff] %v406_v63  ;;  %v410_v11 = vmax.f32 %v346_v2, 0.0  ;;  %v279_v14 = vmul.f32 %v624_v0, %v208_v60  ;;  %471 = vst [vmem:[%s657_s25 + $0xd8] sm:$0xff] %v407_v6  ;;  %v280_v17 = vmul.f32 %v624_v0, %v209_v3  ;;  %v281_v18 = vmul.f32 %v624_v0, %v210_v4  ;;  %v222_v60 = vld [vmem:[%s629_s20 + $0x180] sm:$0xff] }
  0x29   : > { %472 = vst [vmem:[%s657_s25 + $0xe0] sm:$0xff] %v408_v7  ;;  %473 = vst [vmem:[%s657_s25 + $0xe8] sm:$0xff] %v409_v8  ;;  %v411_v16 = vmax.f32 %v347_v9, 0.0  ;;  %v282_v19 = vmul.f32 %v624_v0, %v211_v5  ;;  %v348_v20 = vadd.f32 %v634_v1, %v277_v12  ;;  %v349_v21 = vadd.f32 %v634_v1, %v278_v13  ;;  %v225_v5 = vld [vmem:[%s629_s20 + $0x198] sm:$0xff]  ;;  %v226_v6 = vld [vmem:[%s629_s20 + $0x1a0] sm:$0xff] }
  0x2a   : > { %474 = vst [vmem:[%s657_s25 + $0xf0] sm:$0xff] %v410_v11  ;;  %v350_v22 = vadd.f32 %v634_v1, %v279_v14  ;;  %v283_v23 = vmul.f32 %v624_v0, %v212_v10  ;;  %v351_v24 = vadd.f32 %v634_v1, %v280_v17  ;;  %v352_v25 = vadd.f32 %v634_v1, %v281_v18  ;;  %v227_v7 = vld [vmem:[%s629_s20 + $0x1a8] sm:$0xff]  ;;  %v228_v12 = vld [vmem:[%s629_s20 + $0x1b0] sm:$0xff]  ;;  %v229_v17 = vld [vmem:[%s629_s20 + $0x1b8] sm:$0xff] }
  0x2b   : > { %475 = vst [vmem:[%s657_s25 + $0xf8] sm:$0xff] %v411_v16  ;;  %v353_v26 = vadd.f32 %v634_v1, %v282_v19  ;;  %v284_v27 = vmul.f32 %v624_v0, %v213_v15  ;;  %v412_v31 = vmax.f32 %v348_v20, 0.0  ;;  %v413_v32 = vmax.f32 %v349_v21, 0.0 }
  0x2c   : > { %v414_v33 = vmax.f32 %v350_v22, 0.0  ;;  %v354_v34 = vadd.f32 %v634_v1, %v283_v23  ;;  %v415_v38 = vmax.f32 %v351_v24, 0.0  ;;  %v416_v39 = vmax.f32 %v352_v25, 0.0 }
  0x2d   : > { %v417_v40 = vmax.f32 %v353_v26, 0.0  ;;  %v355_v41 = vadd.f32 %v634_v1, %v284_v27  ;;  %476 = vst [vmem:[%s657_s25 + $0x100] sm:$0xff] %v412_v31  ;;  %477 = vst [vmem:[%s657_s25 + $0x108] sm:$0xff] %v413_v32  ;;  %v285_v44 = vmul.f32 %v624_v0, %v214_v28  ;;  %v286_v45 = vmul.f32 %v624_v0, %v215_v29  ;;  %v231_v31 = vld [vmem:[%s629_s20 + $0x1c8] sm:$0xff]  ;;  %v232_v32 = vld [vmem:[%s629_s20 + $0x1d0] sm:$0xff] }
  0x2e   : > { %478 = vst [vmem:[%s657_s25 + $0x110] sm:$0xff] %v414_v33  ;;  %v418_v43 = vmax.f32 %v354_v34, 0.0  ;;  %v287_v46 = vmul.f32 %v624_v0, %v216_v30  ;;  %479 = vst [vmem:[%s657_s25 + $0x118] sm:$0xff] %v415_v38  ;;  %v288_v49 = vmul.f32 %v624_v0, %v217_v35  ;;  %v289_v50 = vmul.f32 %v624_v0, %v218_v36  ;;  %v230_v30 = vld [vmem:[%s629_s20 + $0x1c0] sm:$0xff] }
  0x2f   : > { %480 = vst [vmem:[%s657_s25 + $0x120] sm:$0xff] %v416_v39  ;;  %481 = vst [vmem:[%s657_s25 + $0x128] sm:$0xff] %v417_v40  ;;  %v419_v48 = vmax.f32 %v355_v41, 0.0  ;;  %v290_v51 = vmul.f32 %v624_v0, %v219_v37  ;;  %v356_v52 = vadd.f32 %v634_v1, %v285_v44  ;;  %v357_v53 = vadd.f32 %v634_v1, %v286_v45  ;;  %v233_v37 = vld [vmem:[%s629_s20 + $0x1d8] sm:$0xff]  ;;  %v234_v38 = vld [vmem:[%s629_s20 + $0x1e0] sm:$0xff] }
  0x30   : > { %482 = vst [vmem:[%s657_s25 + $0x130] sm:$0xff] %v418_v43  ;;  %v358_v54 = vadd.f32 %v634_v1, %v287_v46  ;;  %v291_v55 = vmul.f32 %v624_v0, %v220_v42  ;;  %v359_v56 = vadd.f32 %v634_v1, %v288_v49  ;;  %v360_v57 = vadd.f32 %v634_v1, %v289_v50  ;;  %v235_v39 = vld [vmem:[%s629_s20 + $0x1e8] sm:$0xff]  ;;  %v236_v44 = vld [vmem:[%s629_s20 + $0x1f0] sm:$0xff]  ;;  %v237_v49 = vld [vmem:[%s629_s20 + $0x1f8] sm:$0xff] }
  0x31   : > { %483 = vst [vmem:[%s657_s25 + $0x138] sm:$0xff] %v419_v48  ;;  %v361_v58 = vadd.f32 %v634_v1, %v290_v51  ;;  %v292_v59 = vmul.f32 %v624_v0, %v221_v47  ;;  %v420_v63 = vmax.f32 %v356_v52, 0.0  ;;  %v421_v2 = vmax.f32 %v357_v53, 0.0 }
  0x32   : > { %v422_v3 = vmax.f32 %v358_v54, 0.0  ;;  %v362_v4 = vadd.f32 %v634_v1, %v291_v55  ;;  %v423_v8 = vmax.f32 %v359_v56, 0.0  ;;  %v424_v9 = vmax.f32 %v360_v57, 0.0 }
  0x33   : > { %v425_v10 = vmax.f32 %v361_v58, 0.0  ;;  %v363_v11 = vadd.f32 %v634_v1, %v292_v59  ;;  %484 = vst [vmem:[%s657_s25 + $0x140] sm:$0xff] %v420_v63  ;;  %485 = vst [vmem:[%s657_s25 + $0x148] sm:$0xff] %v421_v2  ;;  %v293_v14 = vmul.f32 %v624_v0, %v222_v60  ;;  %v294_v15 = vmul.f32 %v624_v0, %v223_v61 }
  0x34   : > { %486 = vst [vmem:[%s657_s25 + $0x150] sm:$0xff] %v422_v3  ;;  %v426_v13 = vmax.f32 %v362_v4, 0.0  ;;  %v295_v16 = vmul.f32 %v624_v0, %v224_v62  ;;  %487 = vst [vmem:[%s657_s25 + $0x158] sm:$0xff] %v423_v8  ;;  %v296_v19 = vmul.f32 %v624_v0, %v225_v5  ;;  %v297_v20 = vmul.f32 %v624_v0, %v226_v6 }
  0x35   : > { %488 = vst [vmem:[%s657_s25 + $0x160] sm:$0xff] %v424_v9  ;;  %489 = vst [vmem:[%s657_s25 + $0x168] sm:$0xff] %v425_v10  ;;  %v427_v18 = vmax.f32 %v363_v11, 0.0  ;;  %v298_v21 = vmul.f32 %v624_v0, %v227_v7  ;;  %v364_v22 = vadd.f32 %v634_v1, %v293_v14  ;;  %v365_v23 = vadd.f32 %v634_v1, %v294_v15 }
  0x36   : > { %490 = vst [vmem:[%s657_s25 + $0x170] sm:$0xff] %v426_v13  ;;  %v366_v24 = vadd.f32 %v634_v1, %v295_v16  ;;  %v299_v25 = vmul.f32 %v624_v0, %v228_v12  ;;  %v367_v26 = vadd.f32 %v634_v1, %v296_v19  ;;  %v368_v27 = vadd.f32 %v634_v1, %v297_v20 }
  0x37   : > { %491 = vst [vmem:[%s657_s25 + $0x178] sm:$0xff] %v427_v18  ;;  %v369_v28 = vadd.f32 %v634_v1, %v298_v21  ;;  %v300_v29 = vmul.f32 %v624_v0, %v229_v17  ;;  %v428_v33 = vmax.f32 %v364_v22, 0.0  ;;  %v429_v34 = vmax.f32 %v365_v23, 0.0 }
  0x38   : > { %v430_v35 = vmax.f32 %v366_v24, 0.0  ;;  %v370_v36 = vadd.f32 %v634_v1, %v299_v25  ;;  %v431_v40 = vmax.f32 %v367_v26, 0.0  ;;  %v432_v41 = vmax.f32 %v368_v27, 0.0 }
  0x39   : > { %v433_v42 = vmax.f32 %v369_v28, 0.0  ;;  %v371_v43 = vadd.f32 %v634_v1, %v300_v29  ;;  %492 = vst [vmem:[%s657_s25 + $0x180] sm:$0xff] %v428_v33  ;;  %493 = vst [vmem:[%s657_s25 + $0x188] sm:$0xff] %v429_v34  ;;  %v301_v46 = vmul.f32 %v624_v0, %v230_v30  ;;  %v302_v47 = vmul.f32 %v624_v0, %v231_v31 }
  0x3a   : > { %494 = vst [vmem:[%s657_s25 + $0x190] sm:$0xff] %v430_v35  ;;  %v434_v45 = vmax.f32 %v370_v36, 0.0  ;;  %v303_v48 = vmul.f32 %v624_v0, %v232_v32  ;;  %495 = vst [vmem:[%s657_s25 + $0x198] sm:$0xff] %v431_v40  ;;  %v304_v51 = vmul.f32 %v624_v0, %v233_v37  ;;  %v305_v52 = vmul.f32 %v624_v0, %v234_v38 }
  0x3b   : > { %496 = vst [vmem:[%s657_s25 + $0x1a0] sm:$0xff] %v432_v41  ;;  %497 = vst [vmem:[%s657_s25 + $0x1a8] sm:$0xff] %v433_v42  ;;  %v435_v50 = vmax.f32 %v371_v43, 0.0  ;;  %v306_v53 = vmul.f32 %v624_v0, %v235_v39  ;;  %v372_v54 = vadd.f32 %v634_v1, %v301_v46  ;;  %v373_v55 = vadd.f32 %v634_v1, %v302_v47 }
  0x3c   : > { %498 = vst [vmem:[%s657_s25 + $0x1b0] sm:$0xff] %v434_v45  ;;  %v374_v56 = vadd.f32 %v634_v1, %v303_v48  ;;  %v307_v57 = vmul.f32 %v624_v0, %v236_v44  ;;  %v375_v58 = vadd.f32 %v634_v1, %v304_v51  ;;  %v376_v59 = vadd.f32 %v634_v1, %v305_v52 }
  0x3d   : > { %499 = vst [vmem:[%s657_s25 + $0x1b8] sm:$0xff] %v435_v50  ;;  %v377_v60 = vadd.f32 %v634_v1, %v306_v53  ;;  %v308_v61 = vmul.f32 %v624_v0, %v237_v49  ;;  %v436_v62 = vmax.f32 %v372_v54, 0.0  ;;  %v437_v63 = vmax.f32 %v373_v55, 0.0 }
  0x3e   : > { %v438_v2 = vmax.f32 %v374_v56, 0.0  ;;  %v378_v3 = vadd.f32 %v634_v1, %v307_v57  ;;  %v439_v4 = vmax.f32 %v375_v58, 0.0  ;;  %v440_v5 = vmax.f32 %v376_v59, 0.0 }
  0x3f   : > { %v441_v6 = vmax.f32 %v377_v60, 0.0  ;;  %v379_v7 = vadd.f32 %v634_v1, %v308_v61  ;;  %500 = vst [vmem:[%s657_s25 + $0x1c0] sm:$0xff] %v436_v62  ;;  %501 = vst [vmem:[%s657_s25 + $0x1c8] sm:$0xff] %v437_v63 }
  0x40   : > { %502 = vst [vmem:[%s657_s25 + $0x1d0] sm:$0xff] %v438_v2  ;;  %v442_v8 = vmax.f32 %v378_v3, 0.0  ;;  %503 = vst [vmem:[%s657_s25 + $0x1d8] sm:$0xff] %v439_v4 }
  0x41   : > { %504 = vst [vmem:[%s657_s25 + $0x1e0] sm:$0xff] %v440_v5  ;;  %505 = vst [vmem:[%s657_s25 + $0x1e8] sm:$0xff] %v441_v6  ;;  %v443_v0 = vmax.f32 %v379_v7, 0.0 }
  0x42   : > { %506 = vst [vmem:[%s657_s25 + $0x1f0] sm:$0xff] %v442_v8 }
  0x43   : > { %507 = vst [vmem:[%s657_s25 + $0x1f8] sm:$0xff] %v443_v0 }
  0x44 PF: > { %s13_s12 = sadd.s32 1, %s591_s12  }
  0x45   : > { %p10_p4 = scmp.ge.s32.totalorder %s13_s12, 6  }
  0x47   :  { %12 = sbr.rel (!%p10_p4) target bundleno = 1 (0x1), region = 62 }

// kernel: decoder_ir_forward.17
= control target key start
LH: loop header
LB: loop body
LE: loop exit
PB: predicated region body
PF: predicated region fallthrough
CT: control target
= control target key end

     0   :  { %s1484_s15 = smov 0   ;;  %s1486_s16 = smov 0   ;;  %s1695_s0 = inlined_call_operand.vmem [shape: bf16[4,2048,16], index: 0, kind: input, shape index: {}]   ;;  %s1696_s1 = inlined_call_operand.vmem [shape: bf16[4,16,128], index: 1, kind: input, shape index: {}]   ;;  %s1697_s2 = inlined_call_operand.vmem [shape: f32[4,2048,128], index: 2, kind: output, shape index: {0}]   ;;  %s1698_s3 = inlined_call_operand.vmem [shape: f32[4,64,128], index: 3, kind: output, shape index: {1}]   ;;  %s1699_s4 = inlined_call_operand.vmem [shape: f32[4,64,128], index: 4, kind: output, shape index: {2}]  }
   0x1   :  { %s1488_s17 = smov 0   ;;  %s1490_s18 = smov 0  }
   0x2   :  { %s1492_s19 = smov 0  }
   0x3 LB: > { %s37_s20 = sadd.s32 1, %s1449_s17  ;;  %s41_s21 = sadd.s32 1, %s1453_s18  ;;  %s1457_s19 = sphi %s1492_s19, %s15_s19   ;;  %s1453_s18 = sphi %s1490_s18, %s1703_s18   ;;  %s1449_s17 = sphi %s1488_s17, %s1702_s17   ;;  %s1445_s16 = sphi %s1486_s16, %s1701_s16   ;;  %s1441_s15 = sphi %s1484_s15, %s1700_s15  }
   0x4   : > { %p39_p0 = scmp.ge.s32.totalorder %s37_s20, 8  ;;  %p1260_p1 = scmp.ge.s32.totalorder %s1457_s19, 1 }
   0x5   : > { %p239_p2 = scmp.lt.s32.totalorder %s1457_s19, 33 }
   0x6   : > { %s1705_s20 = smov (%p39_p0, %s37_s20), 0  ;;  %s1707_s21 = smov (!%p39_p0, %s41_s21), %s1453_s18 }
   0x7   : > { %p240_p3 = pnand %p1260_p1, %p239_p2  ;;  %p43_p4 = scmp.ge.s32.totalorder %s1707_s21, 4 }
   0x8   : > { %s1261_s22 = sshll.u32 (!%p240_p3), %s1441_s15, 5  ;;  %p314_p5 = scmp.lt.s32.totalorder (!%p240_p3), %s1445_s16, 3 }
   0x9   : > { %s1709_s21 = smov (%p43_p4, %s1707_s21), 0  ;;  %243 = sbr.rel (%p240_p3) target bundleno = 298 (0x12a), region = 28 }
   0xa   : > { %p316_p6 = scmp.lt.s32.totalorder (!%p240_p3), %s1261_s22, 255  ;;  %p354_p7 = scmp.lt.s32.totalorder (!%p240_p3), %s1441_s15, 7 }
   0xe   : > { %s1711_s16 = smov (!%p314_p5, %s1445_s16), 3  ;;  %s1713_s22 = smov (!%p316_p6, %s1261_s22), 255  ;;  %vm563_vm0 = vcmask 130048  }
   0xf   : > { %s1262_s23 = sshll.u32 %s1711_s16, 8  ;;  %s1308_s24 = sshll.u32 %s1711_s16, 3 }
  0x10   : > { %s1521_s25 = sadd.s32 %s1262_s23, %s1713_s22  ;;  %s337_s28 = scalar_lea.vmem %s1696_s1, %s1308_s24 }
  0x11   : > { %s1263_s29 = sshll.u32 %s1521_s25, 2  ;;  %v1402_v0 = vld [vmem:[%s337_s28] sm:$0xff]   ;;  %s1268_s7 = sshll.u32 %s1521_s25, 3 }
  0x12   : > { %s1532_s6 = scalar_lea.vmem %s1695_s0, %s1263_s29  ;;  %1326 = vmatprep.subr.bf16.mxu0 %v1402_v0  ;;  %1360 = vmatprep.subr.bf16.mxu1 %v1402_v0  ;;  %s1570_s10 = scalar_lea.vmem %s1697_s2, %s1268_s7 }
  0x13   : > { %v1403_v1 = vld [vmem:[%s1532_s6] sm:$0xff]   ;;  %v1404_v2 = vld [vmem:[%s1532_s6 + $0x8] sm:$0xff]   ;;  %1327 = vmatpush3.bf16.msra.mxu0 %v1402_v0  ;;  %v1405_v3 = vld [vmem:[%s1532_s6 + $0x10] sm:$0xff]   ;;  %1361 = vmatpush3.bf16.msra.mxu1 %v1402_v0  ;;  %s1715_s15 = smov (!%p354_p7, %s1441_s15), 7 }
  0x14   : > { %1328 = vmatprep.mubr.msk.bf16.mxu0 %vm563_vm0, %v1403_v1  ;;  %v1406_v4 = vld [vmem:[%s1532_s6 + $0x18] sm:$0xff]   ;;  %v1407_v5 = vld [vmem:[%s1532_s6 + $0x20] sm:$0xff]   ;;  %v1412_v7 = vld [vmem:[%s1532_s6 + $0x48] sm:$0xff]   ;;  %s360_s11 = sadd.s32 %s1308_s24, %s1715_s15 }
  0x15   : > { %v1411_v6 = vld [vmem:[%s1532_s6 + $0x40] sm:$0xff]   ;;  %v1413_v8 = vld [vmem:[%s1532_s6 + $0x50] sm:$0xff]   ;;  %v1414_v9 = vld [vmem:[%s1532_s6 + $0x58] sm:$0xff]   ;;  %s1270_s12 = sshll.u32 %s360_s11, 3 }
  0x16   : > { %1329 = vmatmul.mubr.msk.bf16.vlgmr.msra.gmra.mxu0 %vm563_vm0, %v1404_v2  ;;  %1344 = vmatprep.mubr.msk.bf16.mxu1 %vm563_vm0, %v1411_v6  ;;  %v1415_v10 = vld [vmem:[%s1532_s6 + $0x60] sm:$0xff]   ;;  %v1408_v11 = vld [vmem:[%s1532_s6 + $0x28] sm:$0xff]   ;;  %v1409_v12 = vld [vmem:[%s1532_s6 + $0x30] sm:$0xff]   ;;  %s362_s22 = scalar_lea.vmem %s1698_s3, %s1270_s12  ;;  %s373_s26 = scalar_lea.vmem %s1699_s4, %s1270_s12 }
  0x17   : > { %1332 = vmatprep.mubr.msk.bf16.mxu0 %vm563_vm0, %v1405_v3  ;;  %1345 = vmatmul.mubr.msk.bf16.vlgmr.msra.gmra.mxu1 %vm563_vm0, %v1412_v7  ;;  %v1416_v13 = vld [vmem:[%s1532_s6 + $0x68] sm:$0xff]   ;;  %v1417_v14 = vld [vmem:[%s1532_s6 + $0x70] sm:$0xff]   ;;  %v1410_v15 = vld [vmem:[%s1532_s6 + $0x38] sm:$0xff]  }
  0x18   : > { %1348 = vmatprep.mubr.msk.bf16.mxu1 %vm563_vm0, %v1413_v8  ;;  %v1418_v16 = vld [vmem:[%s1532_s6 + $0x78] sm:$0xff]  }
  0x1e   : > { %1333 = vmatmul.mubr.msk.bf16.gmra.mxu0 %vm563_vm0, %v1406_v4 }
  0x1f   : > { %1336 = vmatprep.mubr.msk.bf16.mxu0 %vm563_vm0, %v1407_v5  ;;  %1349 = vmatmul.mubr.msk.bf16.gmra.mxu1 %vm563_vm0, %v1414_v9 }
  0x20   : > { %1352 = vmatprep.mubr.msk.bf16.mxu1 %vm563_vm0, %v1415_v10 }
  0x26   : > { %1337 = vmatmul.mubr.msk.bf16.gmra.mxu0 %vm563_vm0, %v1408_v11 }
  0x27   : > { %1340 = vmatprep.mubr.msk.bf16.mxu0 %vm563_vm0, %v1409_v12  ;;  %1353 = vmatmul.mubr.msk.bf16.gmra.mxu1 %vm563_vm0, %v1416_v13 }
  0x28   : > { %1356 = vmatprep.mubr.msk.bf16.mxu1 %vm563_vm0, %v1417_v14 }
  0x2e   : > { %1341 = vmatmul.mubr.msk.bf16.gmra.mxu0 %vm563_vm0, %v1410_v15 }
  0x2f   : > { %1357 = vmatmul.mubr.msk.bf16.gmra.mxu1 %vm563_vm0, %v1418_v16 }
  0xd6   : > { %v1330_v17 = vpop.f32.mrf.mxu0 }
  0xd7   : > { %874 = vst [vmem:[%s1570_s10 + $0x10] sm:$0xff] %v1330_v17  ;;  %v1575_v21 = vpop.f32.mrf.mxu1  ;;  %v943_v27 = vmul.f32 %v1330_v17, %v1330_v17 }
  0xd8   : > { %v646_v18 = vpop.f32.mrf.mxu0  ;;  %890 = vst [vmem:[%s1570_s10 + $0x90] sm:$0xff] %v1575_v21 }
  0xd9   : > { %872 = vst [vmem:[%s1570_s10] sm:$0xff] %v646_v18  ;;  %v941_v22 = vmul.f32 %v646_v18, %v646_v18  ;;  %v1580_v26 = vpop.f32.mrf.mxu1 }
  0xda   : > { %v1331_v19 = vpop.f32.mrf.mxu0  ;;  %888 = vst [vmem:[%s1570_s10 + $0x80] sm:$0xff] %v1580_v26 }
  0xdb   : > { %875 = vst [vmem:[%s1570_s10 + $0x18] sm:$0xff] %v1331_v19  ;;  %v1585_v31 = vpop.f32.mrf.mxu1  ;;  %v944_v32 = vmul.f32 %v1331_v19, %v1331_v19 }
  0xdc   : > { %v649_v20 = vpop.f32.mrf.mxu0  ;;  %891 = vst [vmem:[%s1570_s10 + $0x98] sm:$0xff] %v1585_v31 }
  0xdd   : > { %873 = vst [vmem:[%s1570_s10 + $0x8] sm:$0xff] %v649_v20  ;;  %v904_v23 = vadd.f32 %v649_v20, %v646_v18  ;;  %v942_v24 = vmul.f32 %v649_v20, %v649_v20  ;;  %v1590_v36 = vpop.f32.mrf.mxu1 }
  0xde   : > { %v1334_v25 = vpop.f32.mrf.mxu0  ;;  %889 = vst [vmem:[%s1570_s10 + $0x88] sm:$0xff] %v1590_v36 }
  0xdf   : > { %v905_v28 = vadd.f32 %v1330_v17, %v904_v23  ;;  %v973_v29 = vadd.f32 %v942_v24, %v941_v22  ;;  %878 = vst [vmem:[%s1570_s10 + $0x30] sm:$0xff] %v1334_v25  ;;  %v1595_v41 = vpop.f32.mrf.mxu1  ;;  %v947_v47 = vmul.f32 %v1334_v25, %v1334_v25 }
  0xe0   : > { %v662_v30 = vpop.f32.mrf.mxu0  ;;  %894 = vst [vmem:[%s1570_s10 + $0xb0] sm:$0xff] %v1595_v41 }
  0xe1   : > { %v974_v33 = vadd.f32 %v973_v29, %v943_v27  ;;  %876 = vst [vmem:[%s1570_s10 + $0x20] sm:$0xff] %v662_v30  ;;  %v906_v34 = vadd.f32 %v1331_v19, %v905_v28  ;;  %v945_v38 = vmul.f32 %v662_v30, %v662_v30  ;;  %v1600_v46 = vpop.f32.mrf.mxu1 }
  0xe2   : > { %v1335_v35 = vpop.f32.mrf.mxu0  ;;  %892 = vst [vmem:[%s1570_s10 + $0xa0] sm:$0xff] %v1600_v46 }
  0xe3   : > { %v907_v37 = vadd.f32 %v906_v34, %v662_v30  ;;  %v975_v39 = vadd.f32 %v974_v33, %v944_v32  ;;  %879 = vst [vmem:[%s1570_s10 + $0x38] sm:$0xff] %v1335_v35  ;;  %v1605_v51 = vpop.f32.mrf.mxu1  ;;  %v948_v52 = vmul.f32 %v1335_v35, %v1335_v35  ;;  %v957_v33 = vmul.f32 %v1580_v26, %v1580_v26 }
  0xe4   : > { %v665_v40 = vpop.f32.mrf.mxu0  ;;  %895 = vst [vmem:[%s1570_s10 + $0xb8] sm:$0xff] %v1605_v51 }
  0xe5   : > { %v976_v42 = vadd.f32 %v975_v39, %v945_v38  ;;  %877 = vst [vmem:[%s1570_s10 + $0x28] sm:$0xff] %v665_v40  ;;  %v908_v43 = vadd.f32 %v907_v37, %v665_v40  ;;  %v946_v44 = vmul.f32 %v665_v40, %v665_v40  ;;  %v1610_v56 = vpop.f32.mrf.mxu1  ;;  %v958_v38 = vmul.f32 %v1590_v36, %v1590_v36 }
  0xe6   : > { %v1338_v45 = vpop.f32.mrf.mxu0  ;;  %893 = vst [vmem:[%s1570_s10 + $0xa8] sm:$0xff] %v1610_v56  ;;  %v959_v40 = vmul.f32 %v1575_v21, %v1575_v21 }
  0xe7   : > { %v909_v48 = vadd.f32 %v1334_v25, %v908_v43  ;;  %v977_v49 = vadd.f32 %v976_v42, %v946_v44  ;;  %882 = vst [vmem:[%s1570_s10 + $0x50] sm:$0xff] %v1338_v45  ;;  %v1615_v61 = vpop.f32.mrf.mxu1  ;;  %v951_v3 = vmul.f32 %v1338_v45, %v1338_v45  ;;  %v960_v44 = vmul.f32 %v1585_v31, %v1585_v31 }
  0xe8   : > { %v678_v50 = vpop.f32.mrf.mxu0  ;;  %898 = vst [vmem:[%s1570_s10 + $0xd0] sm:$0xff] %v1615_v61 }
  0xe9   : > { %v978_v53 = vadd.f32 %v977_v49, %v947_v47  ;;  %880 = vst [vmem:[%s1570_s10 + $0x40] sm:$0xff] %v678_v50  ;;  %v910_v54 = vadd.f32 %v1335_v35, %v909_v48  ;;  %v949_v58 = vmul.f32 %v678_v50, %v678_v50  ;;  %v1620_v2 = vpop.f32.mrf.mxu1  ;;  %v961_v48 = vmul.f32 %v1600_v46, %v1600_v46 }
  0xea   : > { %v1339_v55 = vpop.f32.mrf.mxu0  ;;  %896 = vst [vmem:[%s1570_s10 + $0xc0] sm:$0xff] %v1620_v2 }
  0xeb   : > { %v911_v57 = vadd.f32 %v910_v54, %v678_v50  ;;  %v979_v59 = vadd.f32 %v978_v53, %v948_v52  ;;  %883 = vst [vmem:[%s1570_s10 + $0x58] sm:$0xff] %v1339_v55  ;;  %v1625_v7 = vpop.f32.mrf.mxu1  ;;  %v952_v8 = vmul.f32 %v1339_v55, %v1339_v55  ;;  %v962_v52 = vmul.f32 %v1610_v56, %v1610_v56 }
  0xec   : > { %v681_v60 = vpop.f32.mrf.mxu0  ;;  %899 = vst [vmem:[%s1570_s10 + $0xd8] sm:$0xff] %v1625_v7 }
  0xed   : > { %v980_v62 = vadd.f32 %v979_v59, %v949_v58  ;;  %881 = vst [vmem:[%s1570_s10 + $0x48] sm:$0xff] %v681_v60  ;;  %v912_v63 = vadd.f32 %v911_v57, %v681_v60  ;;  %v950_v0 = vmul.f32 %v681_v60, %v681_v60  ;;  %v745_v12 = vpop.f32.mrf.mxu1  ;;  %v965_v58 = vmul.f32 %v1620_v2, %v1620_v2 }
  0xee   : > { %v1342_v1 = vpop.f32.mrf.mxu0  ;;  %897 = vst [vmem:[%s1570_s10 + $0xc8] sm:$0xff] %v745_v12 }
  0xef   : > { %v913_v4 = vadd.f32 %v1338_v45, %v912_v63  ;;  %v981_v5 = vadd.f32 %v980_v62, %v950_v0  ;;  %886 = vst [vmem:[%s1570_s10 + $0x70] sm:$0xff] %v1342_v1  ;;  %v1358_v17 = vpop.f32.mrf.mxu1  ;;  %v955_v23 = vmul.f32 %v1342_v1, %v1342_v1  ;;  %v966_v62 = vmul.f32 %v745_v12, %v745_v12 }
  0xf0   : > { %v694_v6 = vpop.f32.mrf.mxu0  ;;  %902 = vst [vmem:[%s1570_s10 + $0xf0] sm:$0xff] %v1358_v17 }
  0xf1   : > { %v982_v9 = vadd.f32 %v981_v5, %v951_v3  ;;  %884 = vst [vmem:[%s1570_s10 + $0x60] sm:$0xff] %v694_v6  ;;  %v914_v10 = vadd.f32 %v1339_v55, %v913_v4  ;;  %v953_v14 = vmul.f32 %v694_v6, %v694_v6  ;;  %v758_v22 = vpop.f32.mrf.mxu1 }
  0xf2   : > { %v1343_v11 = vpop.f32.mrf.mxu0  ;;  %900 = vst [vmem:[%s1570_s10 + $0xe0] sm:$0xff] %v758_v22 }
  0xf3   : > { %v915_v13 = vadd.f32 %v914_v10, %v694_v6  ;;  %v983_v15 = vadd.f32 %v982_v9, %v952_v8  ;;  %887 = vst [vmem:[%s1570_s10 + $0x78] sm:$0xff] %v1343_v11  ;;  %v1359_v27 = vpop.f32.mrf.mxu1  ;;  %v956_v28 = vmul.f32 %v1343_v11, %v1343_v11  ;;  %v971_v10 = vmul.f32 %v1358_v17, %v1358_v17 }
  0xf4   : > { %v697_v16 = vpop.f32.mrf.mxu0  ;;  %903 = vst [vmem:[%s1570_s10 + $0xf8] sm:$0xff] %v1359_v27 }
  0xf5   : > { %v984_v18 = vadd.f32 %v983_v15, %v953_v14  ;;  %885 = vst [vmem:[%s1570_s10 + $0x68] sm:$0xff] %v697_v16  ;;  %v916_v19 = vadd.f32 %v915_v13, %v697_v16  ;;  %v954_v20 = vmul.f32 %v697_v16, %v697_v16  ;;  %v761_v32 = vpop.f32.mrf.mxu1 }
  0xf6   : > { %901 = vst [vmem:[%s1570_s10 + $0xe8] sm:$0xff] %v761_v32  ;;  %v970_v9 = vmul.f32 %v761_v32, %v761_v32 }
  0xf7   : > { %v917_v24 = vadd.f32 %v1342_v1, %v916_v19  ;;  %v985_v25 = vadd.f32 %v984_v18, %v954_v20  ;;  %v968_v1 = vmul.f32 %v1625_v7, %v1625_v7 }
  0xf9   : > { %v918_v29 = vadd.f32 %v1343_v11, %v917_v24  ;;  %v986_v30 = vadd.f32 %v985_v25, %v955_v23 }
  0xfb   : > { %v987_v34 = vadd.f32 %v986_v30, %v956_v28  ;;  %v919_v35 = vadd.f32 %v918_v29, %v1580_v26 }
  0xfd   : > { %v920_v37 = vadd.f32 %v919_v35, %v1590_v36  ;;  %v988_v39 = vadd.f32 %v987_v34, %v957_v33 }
  0xff   : > { %v921_v42 = vadd.f32 %v1575_v21, %v920_v37  ;;  %v989_v43 = vadd.f32 %v988_v39, %v958_v38  ;;  %v963_v21 = vmul.f32 %v1595_v41, %v1595_v41 }
 0x101   : > { %v990_v45 = vadd.f32 %v989_v43, %v959_v40  ;;  %v922_v47 = vadd.f32 %v1585_v31, %v921_v42  ;;  %v964_v31 = vmul.f32 %v1605_v51, %v1605_v51 }
 0x103   : > { %v923_v26 = vadd.f32 %v922_v47, %v1600_v46  ;;  %v991_v49 = vadd.f32 %v990_v45, %v960_v44 }
 0x105   : > { %v992_v36 = vadd.f32 %v991_v49, %v961_v48  ;;  %v924_v50 = vadd.f32 %v923_v26, %v1610_v56 }
 0x107   : > { %v925_v53 = vadd.f32 %v1595_v41, %v924_v50  ;;  %v993_v54 = vadd.f32 %v992_v36, %v962_v52  ;;  %v967_v41 = vmul.f32 %v1615_v61, %v1615_v61 }
 0x109   : > { %v994_v55 = vadd.f32 %v993_v54, %v963_v21  ;;  %v926_v57 = vadd.f32 %v1605_v51, %v925_v53 }
 0x10b   : > { %v927_v46 = vadd.f32 %v926_v57, %v1620_v2  ;;  %v995_v59 = vadd.f32 %v994_v55, %v964_v31  ;;  %v969_v2 = vmul.f32 %v758_v22, %v758_v22 }
 0x10d   : > { %v996_v56 = vadd.f32 %v995_v59, %v965_v58  ;;  %v928_v60 = vadd.f32 %v927_v46, %v745_v12 }
 0x10f   : > { %v929_v63 = vadd.f32 %v1615_v61, %v928_v60  ;;  %v997_v0 = vadd.f32 %v996_v56, %v966_v62  ;;  %v972_v61 = vmul.f32 %v1359_v27, %v1359_v27 }
 0x111   : > { %v998_v51 = vadd.f32 %v997_v0, %v967_v41  ;;  %v930_v3 = vadd.f32 %v1625_v7, %v929_v63 }
 0x113   : > { %v931_v4 = vadd.f32 %v930_v3, %v758_v22  ;;  %v999_v5 = vadd.f32 %v998_v51, %v968_v1 }
 0x115   : > { %v1000_v6 = vadd.f32 %v999_v5, %v969_v2  ;;  %v932_v8 = vadd.f32 %v931_v4, %v761_v32 }
 0x117   : > { %v933_v11 = vadd.f32 %v1358_v17, %v932_v8  ;;  %v1001_v12 = vadd.f32 %v1000_v6, %v970_v9 }
 0x119   : > { %v934_v13 = vadd.f32 %v1359_v27, %v933_v11  ;;  %v1002_v14 = vadd.f32 %v1001_v12, %v971_v10 }
 0x11b   : > { %v935_v15 = vrot.slane %v934_v13, 4  ;;  %v1003_v16 = vadd.f32 %v1002_v14, %v972_v61 }
 0x11d   : > { %v936_v18 = vadd.f32 %v935_v15, %v934_v13  ;;  %v1004_v19 = vrot.slane %v1003_v16, 4 }
 0x11f   : > { %v937_v7 = vrot.slane %v936_v18, 2  ;;  %v1005_v20 = vadd.f32 %v1004_v19, %v1003_v16 }
 0x121   : > { %v938_v22 = vadd.f32 %v937_v7, %v936_v18  ;;  %v1006_v23 = vrot.slane %v1005_v20, 2 }
 0x123   : > { %v939_v24 = vrot.slane %v938_v22, 1  ;;  %v1007_v25 = vadd.f32 %v1006_v23, %v1005_v20 }
 0x125   : > { %v940_v17 = vadd.f32 %v939_v24, %v938_v22  ;;  %v1008_v27 = vrot.slane %v1007_v25, 1 }
 0x127   : > { %v1009_v28 = vadd.f32 %v1008_v27, %v1007_v25  ;;  %1010 = vst [vmem:[%s362_s22] sm:$0xff] %v940_v17 }
 0x129   : > { %1011 = vst [vmem:[%s373_s26] sm:$0xff] %v1009_v28 }
 0x12a PF: > { %s15_s19 = sadd.s32 1, %s1457_s19   ;;  %s1700_s15 = smov %s1449_s17 }
 0x12b   : > { %p12_p8 = scmp.ge.s32.totalorder %s15_s19, 34   ;;  %s1701_s16 = smov %s1453_s18 }
 0x12c   : > { %s1702_s17 = smov %s1705_s20  ;;  %s1703_s18 = smov %s1709_s21 }
 0x12d   :  { %14 = sbr.rel (!%p12_p8) target bundleno = 3 (0x3), region = 93 }

// kernel: decoder_ir_forward.18
= control target key start
LH: loop header
LB: loop body
LE: loop exit
PB: predicated region body
PF: predicated region fallthrough
CT: control target
= control target key end

     0   :  { %s613_s12 = smov 0   ;;  %s900_s0 = inlined_call_operand.vmem [shape: f32[8192,128], index: 0, kind: input, shape index: {}]   ;;  %s901_s1 = inlined_call_operand.vmem [shape: f32[1,128], index: 1, kind: input, shape index: {}]   ;;  %s902_s2 = inlined_call_operand.vmem [shape: f32[1,128], index: 2, kind: input, shape index: {}]   ;;  %s903_s3 = inlined_call_operand.vmem [shape: f32[8192,128], index: 3, kind: output, shape index: {}]  }
   0x1 LB: > { %s564_s13 = sadd.s32 4294967295, %s591_s12   ;;  %p568_p0 = scmp.ge.s32.totalorder %s591_s12, 1  ;;  %s591_s12 = sphi %s613_s12, %s13_s12  }
   0x2   : > { %p138_p1 = scmp.lt.s32.totalorder %s591_s12, 17 }
   0x4   : > { %p139_p2 = pnand %p568_p0, %p138_p1 }
   0x5   : > { %s569_s14 = sshll.u32 (!%p139_p2), %s564_s13, 6 }
   0x6   : > { %142 = sbr.rel (%p139_p2) target bundleno = 68 (0x44), region = 32  ;;  %p163_p3 = scmp.lt.s32.totalorder (!%p139_p2), %s569_s14, 1023 }
   0xb   : > { %s905_s14 = smov (!%p163_p3, %s569_s14), 1023  ;;  %v624_v0 = vld [vmem:[%s901_s1] ss:$0 sm:$0xff] }
   0xc   : > { %s570_s15 = sshll.u32 %s905_s14, 3  ;;  %v634_v1 = vld [vmem:[%s902_s2] ss:$0 sm:$0xff] }
   0xd   : > { %s629_s20 = scalar_lea.vmem %s900_s0, %s570_s15  ;;  %s657_s25 = scalar_lea.vmem %s903_s3, %s570_s15 }
   0xe   : > { %v174_v2 = vld [vmem:[%s629_s20] sm:$0xff]  ;;  %v175_v3 = vld [vmem:[%s629_s20 + $0x8] sm:$0xff]  ;;  %v176_v4 = vld [vmem:[%s629_s20 + $0x10] sm:$0xff] }
   0xf   : > { %v245_v5 = vmul.f32 %v624_v0, %v174_v2  ;;  %v246_v6 = vmul.f32 %v624_v0, %v175_v3  ;;  %v247_v7 = vmul.f32 %v624_v0, %v176_v4  ;;  %v177_v8 = vld [vmem:[%s629_s20 + $0x18] sm:$0xff]  ;;  %v178_v9 = vld [vmem:[%s629_s20 + $0x20] sm:$0xff]  ;;  %v179_v10 = vld [vmem:[%s629_s20 + $0x28] sm:$0xff] }
  0x10   : > { %v248_v11 = vmul.f32 %v624_v0, %v177_v8  ;;  %v249_v12 = vmul.f32 %v624_v0, %v178_v9  ;;  %v250_v13 = vmul.f32 %v624_v0, %v179_v10  ;;  %v180_v14 = vld [vmem:[%s629_s20 + $0x30] sm:$0xff]  ;;  %v181_v15 = vld [vmem:[%s629_s20 + $0x38] sm:$0xff]  ;;  %v182_v24 = vld [vmem:[%s629_s20 + $0x40] sm:$0xff] }
  0x11   : > { %v316_v16 = vadd.f32 %v634_v1, %v245_v5  ;;  %v317_v17 = vadd.f32 %v634_v1, %v246_v6  ;;  %v318_v18 = vadd.f32 %v634_v1, %v247_v7  ;;  %v251_v19 = vmul.f32 %v624_v0, %v180_v14  ;;  %v183_v25 = vld [vmem:[%s629_s20 + $0x48] sm:$0xff]  ;;  %v184_v26 = vld [vmem:[%s629_s20 + $0x50] sm:$0xff]  ;;  %v185_v31 = vld [vmem:[%s629_s20 + $0x58] sm:$0xff] }
  0x12   : > { %v319_v20 = vadd.f32 %v634_v1, %v248_v11  ;;  %v320_v21 = vadd.f32 %v634_v1, %v249_v12  ;;  %v321_v22 = vadd.f32 %v634_v1, %v250_v13  ;;  %v252_v23 = vmul.f32 %v624_v0, %v181_v15  ;;  %v186_v32 = vld [vmem:[%s629_s20 + $0x60] sm:$0xff]  ;;  %v187_v33 = vld [vmem:[%s629_s20 + $0x68] sm:$0xff]  ;;  %v188_v38 = vld [vmem:[%s629_s20 + $0x70] sm:$0xff] }
  0x13   : > { %v380_v27 = vmax.f32 %v316_v16, 0.0  ;;  %v381_v28 = vmax.f32 %v317_v17, 0.0  ;;  %v382_v29 = vmax.f32 %v318_v18, 0.0  ;;  %v322_v30 = vadd.f32 %v634_v1, %v251_v19  ;;  %v189_v43 = vld [vmem:[%s629_s20 + $0x78] sm:$0xff]  ;;  %v190_v56 = vld [vmem:[%s629_s20 + $0x80] sm:$0xff]  ;;  %v191_v57 = vld [vmem:[%s629_s20 + $0x88] sm:$0xff] }
  0x14   : > { %v383_v34 = vmax.f32 %v319_v20, 0.0  ;;  %v384_v35 = vmax.f32 %v320_v21, 0.0  ;;  %v385_v36 = vmax.f32 %v321_v22, 0.0  ;;  %v323_v37 = vadd.f32 %v634_v1, %v252_v23  ;;  %v192_v58 = vld [vmem:[%s629_s20 + $0x90] sm:$0xff]  ;;  %v193_v63 = vld [vmem:[%s629_s20 + $0x98] sm:$0xff]  ;;  %v194_v2 = vld [vmem:[%s629_s20 + $0xa0] sm:$0xff] }
  0x15   : > { %444 = vst [vmem:[%s657_s25] sm:$0xff] %v380_v27  ;;  %445 = vst [vmem:[%s657_s25 + $0x8] sm:$0xff] %v381_v28  ;;  %v386_v39 = vmax.f32 %v322_v30, 0.0  ;;  %v253_v40 = vmul.f32 %v624_v0, %v182_v24  ;;  %v254_v41 = vmul.f32 %v624_v0, %v183_v25  ;;  %v255_v42 = vmul.f32 %v624_v0, %v184_v26  ;;  %v195_v3 = vld [vmem:[%s629_s20 + $0xa8] sm:$0xff]  ;;  %v196_v8 = vld [vmem:[%s629_s20 + $0xb0] sm:$0xff] }
  0x16   : > { %446 = vst [vmem:[%s657_s25 + $0x10] sm:$0xff] %v382_v29  ;;  %447 = vst [vmem:[%s657_s25 + $0x18] sm:$0xff] %v383_v34  ;;  %v387_v44 = vmax.f32 %v323_v37, 0.0  ;;  %v256_v45 = vmul.f32 %v624_v0, %v185_v31  ;;  %v257_v46 = vmul.f32 %v624_v0, %v186_v32  ;;  %v258_v47 = vmul.f32 %v624_v0, %v187_v33  ;;  %v197_v13 = vld [vmem:[%s629_s20 + $0xb8] sm:$0xff]  ;;  %v198_v26 = vld [vmem:[%s629_s20 + $0xc0] sm:$0xff] }
  0x17   : > { %448 = vst [vmem:[%s657_s25 + $0x20] sm:$0xff] %v384_v35  ;;  %449 = vst [vmem:[%s657_s25 + $0x28] sm:$0xff] %v385_v36  ;;  %v324_v48 = vadd.f32 %v634_v1, %v253_v40  ;;  %v325_v49 = vadd.f32 %v634_v1, %v254_v41  ;;  %v326_v50 = vadd.f32 %v634_v1, %v255_v42  ;;  %v199_v27 = vld [vmem:[%s629_s20 + $0xc8] sm:$0xff]  ;;  %v200_v28 = vld [vmem:[%s629_s20 + $0xd0] sm:$0xff] }
  0x18   : > { %450 = vst [vmem:[%s657_s25 + $0x30] sm:$0xff] %v386_v39  ;;  %v259_v51 = vmul.f32 %v624_v0, %v188_v38  ;;  %451 = vst [vmem:[%s657_s25 + $0x38] sm:$0xff] %v387_v44  ;;  %v327_v52 = vadd.f32 %v634_v1, %v256_v45  ;;  %v328_v53 = vadd.f32 %v634_v1, %v257_v46  ;;  %v201_v33 = vld [vmem:[%s629_s20 + $0xd8] sm:$0xff]  ;;  %v202_v34 = vld [vmem:[%s629_s20 + $0xe0] sm:$0xff] }
  0x19   : > { %v329_v54 = vadd.f32 %v634_v1, %v258_v47  ;;  %v260_v55 = vmul.f32 %v624_v0, %v189_v43  ;;  %v388_v59 = vmax.f32 %v324_v48, 0.0  ;;  %v389_v60 = vmax.f32 %v325_v49, 0.0  ;;  %v203_v35 = vld [vmem:[%s629_s20 + $0xe8] sm:$0xff]  ;;  %v204_v40 = vld [vmem:[%s629_s20 + $0xf0] sm:$0xff]  ;;  %v205_v45 = vld [vmem:[%s629_s20 + $0xf8] sm:$0xff] }
  0x1a   : > { %v390_v61 = vmax.f32 %v326_v50, 0.0  ;;  %v330_v62 = vadd.f32 %v634_v1, %v259_v51  ;;  %v391_v4 = vmax.f32 %v327_v52, 0.0  ;;  %v392_v5 = vmax.f32 %v328_v53, 0.0 }
  0x1b   : > { %v393_v6 = vmax.f32 %v329_v54, 0.0  ;;  %v331_v7 = vadd.f32 %v634_v1, %v260_v55  ;;  %452 = vst [vmem:[%s657_s25 + $0x40] sm:$0xff] %v388_v59  ;;  %453 = vst [vmem:[%s657_s25 + $0x48] sm:$0xff] %v389_v60  ;;  %v261_v10 = vmul.f32 %v624_v0, %v190_v56  ;;  %v262_v11 = vmul.f32 %v624_v0, %v191_v57  ;;  %v207_v59 = vld [vmem:[%s629_s20 + $0x108] sm:$0xff]  ;;  %v208_v60 = vld [vmem:[%s629_s20 + $0x110] sm:$0xff] }
  0x1c   : > { %454 = vst [vmem:[%s657_s25 + $0x50] sm:$0xff] %v390_v61  ;;  %v394_v9 = vmax.f32 %v330_v62, 0.0  ;;  %v263_v12 = vmul.f32 %v624_v0, %v192_v58  ;;  %455 = vst [vmem:[%s657_s25 + $0x58] sm:$0xff] %v391_v4  ;;  %v264_v15 = vmul.f32 %v624_v0, %v193_v63  ;;  %v265_v16 = vmul.f32 %v624_v0, %v194_v2  ;;  %v206_v58 = vld [vmem:[%s629_s20 + $0x100] sm:$0xff] }
  0x1d   : > { %456 = vst [vmem:[%s657_s25 + $0x60] sm:$0xff] %v392_v5  ;;  %457 = vst [vmem:[%s657_s25 + $0x68] sm:$0xff] %v393_v6  ;;  %v395_v14 = vmax.f32 %v331_v7, 0.0  ;;  %v266_v17 = vmul.f32 %v624_v0, %v195_v3  ;;  %v332_v18 = vadd.f32 %v634_v1, %v261_v10  ;;  %v333_v19 = vadd.f32 %v634_v1, %v262_v11  ;;  %v209_v3 = vld [vmem:[%s629_s20 + $0x118] sm:$0xff]  ;;  %v210_v4 = vld [vmem:[%s629_s20 + $0x120] sm:$0xff] }
  0x1e   : > { %458 = vst [vmem:[%s657_s25 + $0x70] sm:$0xff] %v394_v9  ;;  %v334_v20 = vadd.f32 %v634_v1, %v263_v12  ;;  %v267_v21 = vmul.f32 %v624_v0, %v196_v8  ;;  %v335_v22 = vadd.f32 %v634_v1, %v264_v15  ;;  %v336_v23 = vadd.f32 %v634_v1, %v265_v16  ;;  %v211_v5 = vld [vmem:[%s629_s20 + $0x128] sm:$0xff]  ;;  %v212_v10 = vld [vmem:[%s629_s20 + $0x130] sm:$0xff]  ;;  %v213_v15 = vld [vmem:[%s629_s20 + $0x138] sm:$0xff] }
  0x1f   : > { %459 = vst [vmem:[%s657_s25 + $0x78] sm:$0xff] %v395_v14  ;;  %v337_v24 = vadd.f32 %v634_v1, %v266_v17  ;;  %v268_v25 = vmul.f32 %v624_v0, %v197_v13  ;;  %v396_v29 = vmax.f32 %v332_v18, 0.0  ;;  %v397_v30 = vmax.f32 %v333_v19, 0.0 }
  0x20   : > { %v398_v31 = vmax.f32 %v334_v20, 0.0  ;;  %v338_v32 = vadd.f32 %v634_v1, %v267_v21  ;;  %v399_v36 = vmax.f32 %v335_v22, 0.0  ;;  %v400_v37 = vmax.f32 %v336_v23, 0.0 }
  0x21   : > { %v401_v38 = vmax.f32 %v337_v24, 0.0  ;;  %v339_v39 = vadd.f32 %v634_v1, %v268_v25  ;;  %460 = vst [vmem:[%s657_s25 + $0x80] sm:$0xff] %v396_v29  ;;  %461 = vst [vmem:[%s657_s25 + $0x88] sm:$0xff] %v397_v30  ;;  %v269_v42 = vmul.f32 %v624_v0, %v198_v26  ;;  %v270_v43 = vmul.f32 %v624_v0, %v199_v27  ;;  %v215_v29 = vld [vmem:[%s629_s20 + $0x148] sm:$0xff]  ;;  %v216_v30 = vld [vmem:[%s629_s20 + $0x150] sm:$0xff] }
  0x22   : > { %462 = vst [vmem:[%s657_s25 + $0x90] sm:$0xff] %v398_v31  ;;  %v402_v41 = vmax.f32 %v338_v32, 0.0  ;;  %v271_v44 = vmul.f32 %v624_v0, %v200_v28  ;;  %463 = vst [vmem:[%s657_s25 + $0x98] sm:$0xff] %v399_v36  ;;  %v272_v47 = vmul.f32 %v624_v0, %v201_v33  ;;  %v273_v48 = vmul.f32 %v624_v0, %v202_v34  ;;  %v214_v28 = vld [vmem:[%s629_s20 + $0x140] sm:$0xff] }
  0x23   : > { %464 = vst [vmem:[%s657_s25 + $0xa0] sm:$0xff] %v400_v37  ;;  %465 = vst [vmem:[%s657_s25 + $0xa8] sm:$0xff] %v401_v38  ;;  %v403_v46 = vmax.f32 %v339_v39, 0.0  ;;  %v274_v49 = vmul.f32 %v624_v0, %v203_v35  ;;  %v340_v50 = vadd.f32 %v634_v1, %v269_v42  ;;  %v341_v51 = vadd.f32 %v634_v1, %v270_v43  ;;  %v217_v35 = vld [vmem:[%s629_s20 + $0x158] sm:$0xff]  ;;  %v218_v36 = vld [vmem:[%s629_s20 + $0x160] sm:$0xff] }
  0x24   : > { %466 = vst [vmem:[%s657_s25 + $0xb0] sm:$0xff] %v402_v41  ;;  %v342_v52 = vadd.f32 %v634_v1, %v271_v44  ;;  %v275_v53 = vmul.f32 %v624_v0, %v204_v40  ;;  %v343_v54 = vadd.f32 %v634_v1, %v272_v47  ;;  %v344_v55 = vadd.f32 %v634_v1, %v273_v48  ;;  %v219_v37 = vld [vmem:[%s629_s20 + $0x168] sm:$0xff]  ;;  %v220_v42 = vld [vmem:[%s629_s20 + $0x170] sm:$0xff]  ;;  %v221_v47 = vld [vmem:[%s629_s20 + $0x178] sm:$0xff] }
  0x25   : > { %467 = vst [vmem:[%s657_s25 + $0xb8] sm:$0xff] %v403_v46  ;;  %v345_v56 = vadd.f32 %v634_v1, %v274_v49  ;;  %v276_v57 = vmul.f32 %v624_v0, %v205_v45  ;;  %v404_v61 = vmax.f32 %v340_v50, 0.0  ;;  %v405_v62 = vmax.f32 %v341_v51, 0.0 }
  0x26   : > { %v406_v63 = vmax.f32 %v342_v52, 0.0  ;;  %v346_v2 = vadd.f32 %v634_v1, %v275_v53  ;;  %v407_v6 = vmax.f32 %v343_v54, 0.0  ;;  %v408_v7 = vmax.f32 %v344_v55, 0.0 }
  0x27   : > { %v409_v8 = vmax.f32 %v345_v56, 0.0  ;;  %v347_v9 = vadd.f32 %v634_v1, %v276_v57  ;;  %468 = vst [vmem:[%s657_s25 + $0xc0] sm:$0xff] %v404_v61  ;;  %469 = vst [vmem:[%s657_s25 + $0xc8] sm:$0xff] %v405_v62  ;;  %v277_v12 = vmul.f32 %v624_v0, %v206_v58  ;;  %v278_v13 = vmul.f32 %v624_v0, %v207_v59  ;;  %v223_v61 = vld [vmem:[%s629_s20 + $0x188] sm:$0xff]  ;;  %v224_v62 = vld [vmem:[%s629_s20 + $0x190] sm:$0xff] }
  0x28   : > { %470 = vst [vmem:[%s657_s25 + $0xd0] sm:$0xff] %v406_v63  ;;  %v410_v11 = vmax.f32 %v346_v2, 0.0  ;;  %v279_v14 = vmul.f32 %v624_v0, %v208_v60  ;;  %471 = vst [vmem:[%s657_s25 + $0xd8] sm:$0xff] %v407_v6  ;;  %v280_v17 = vmul.f32 %v624_v0, %v209_v3  ;;  %v281_v18 = vmul.f32 %v624_v0, %v210_v4  ;;  %v222_v60 = vld [vmem:[%s629_s20 + $0x180] sm:$0xff] }
  0x29   : > { %472 = vst [vmem:[%s657_s25 + $0xe0] sm:$0xff] %v408_v7  ;;  %473 = vst [vmem:[%s657_s25 + $0xe8] sm:$0xff] %v409_v8  ;;  %v411_v16 = vmax.f32 %v347_v9, 0.0  ;;  %v282_v19 = vmul.f32 %v624_v0, %v211_v5  ;;  %v348_v20 = vadd.f32 %v634_v1, %v277_v12  ;;  %v349_v21 = vadd.f32 %v634_v1, %v278_v13  ;;  %v225_v5 = vld [vmem:[%s629_s20 + $0x198] sm:$0xff]  ;;  %v226_v6 = vld [vmem:[%s629_s20 + $0x1a0] sm:$0xff] }
  0x2a   : > { %474 = vst [vmem:[%s657_s25 + $0xf0] sm:$0xff] %v410_v11  ;;  %v350_v22 = vadd.f32 %v634_v1, %v279_v14  ;;  %v283_v23 = vmul.f32 %v624_v0, %v212_v10  ;;  %v351_v24 = vadd.f32 %v634_v1, %v280_v17  ;;  %v352_v25 = vadd.f32 %v634_v1, %v281_v18  ;;  %v227_v7 = vld [vmem:[%s629_s20 + $0x1a8] sm:$0xff]  ;;  %v228_v12 = vld [vmem:[%s629_s20 + $0x1b0] sm:$0xff]  ;;  %v229_v17 = vld [vmem:[%s629_s20 + $0x1b8] sm:$0xff] }
  0x2b   : > { %475 = vst [vmem:[%s657_s25 + $0xf8] sm:$0xff] %v411_v16  ;;  %v353_v26 = vadd.f32 %v634_v1, %v282_v19  ;;  %v284_v27 = vmul.f32 %v624_v0, %v213_v15  ;;  %v412_v31 = vmax.f32 %v348_v20, 0.0  ;;  %v413_v32 = vmax.f32 %v349_v21, 0.0 }
  0x2c   : > { %v414_v33 = vmax.f32 %v350_v22, 0.0  ;;  %v354_v34 = vadd.f32 %v634_v1, %v283_v23  ;;  %v415_v38 = vmax.f32 %v351_v24, 0.0  ;;  %v416_v39 = vmax.f32 %v352_v25, 0.0 }
  0x2d   : > { %v417_v40 = vmax.f32 %v353_v26, 0.0  ;;  %v355_v41 = vadd.f32 %v634_v1, %v284_v27  ;;  %476 = vst [vmem:[%s657_s25 + $0x100] sm:$0xff] %v412_v31  ;;  %477 = vst [vmem:[%s657_s25 + $0x108] sm:$0xff] %v413_v32  ;;  %v285_v44 = vmul.f32 %v624_v0, %v214_v28  ;;  %v286_v45 = vmul.f32 %v624_v0, %v215_v29  ;;  %v231_v31 = vld [vmem:[%s629_s20 + $0x1c8] sm:$0xff]  ;;  %v232_v32 = vld [vmem:[%s629_s20 + $0x1d0] sm:$0xff] }
  0x2e   : > { %478 = vst [vmem:[%s657_s25 + $0x110] sm:$0xff] %v414_v33  ;;  %v418_v43 = vmax.f32 %v354_v34, 0.0  ;;  %v287_v46 = vmul.f32 %v624_v0, %v216_v30  ;;  %479 = vst [vmem:[%s657_s25 + $0x118] sm:$0xff] %v415_v38  ;;  %v288_v49 = vmul.f32 %v624_v0, %v217_v35  ;;  %v289_v50 = vmul.f32 %v624_v0, %v218_v36  ;;  %v230_v30 = vld [vmem:[%s629_s20 + $0x1c0] sm:$0xff] }
  0x2f   : > { %480 = vst [vmem:[%s657_s25 + $0x120] sm:$0xff] %v416_v39  ;;  %481 = vst [vmem:[%s657_s25 + $0x128] sm:$0xff] %v417_v40  ;;  %v419_v48 = vmax.f32 %v355_v41, 0.0  ;;  %v290_v51 = vmul.f32 %v624_v0, %v219_v37  ;;  %v356_v52 = vadd.f32 %v634_v1, %v285_v44  ;;  %v357_v53 = vadd.f32 %v634_v1, %v286_v45  ;;  %v233_v37 = vld [vmem:[%s629_s20 + $0x1d8] sm:$0xff]  ;;  %v234_v38 = vld [vmem:[%s629_s20 + $0x1e0] sm:$0xff] }
  0x30   : > { %482 = vst [vmem:[%s657_s25 + $0x130] sm:$0xff] %v418_v43  ;;  %v358_v54 = vadd.f32 %v634_v1, %v287_v46  ;;  %v291_v55 = vmul.f32 %v624_v0, %v220_v42  ;;  %v359_v56 = vadd.f32 %v634_v1, %v288_v49  ;;  %v360_v57 = vadd.f32 %v634_v1, %v289_v50  ;;  %v235_v39 = vld [vmem:[%s629_s20 + $0x1e8] sm:$0xff]  ;;  %v236_v44 = vld [vmem:[%s629_s20 + $0x1f0] sm:$0xff]  ;;  %v237_v49 = vld [vmem:[%s629_s20 + $0x1f8] sm:$0xff] }
  0x31   : > { %483 = vst [vmem:[%s657_s25 + $0x138] sm:$0xff] %v419_v48  ;;  %v361_v58 = vadd.f32 %v634_v1, %v290_v51  ;;  %v292_v59 = vmul.f32 %v624_v0, %v221_v47  ;;  %v420_v63 = vmax.f32 %v356_v52, 0.0  ;;  %v421_v2 = vmax.f32 %v357_v53, 0.0 }
  0x32   : > { %v422_v3 = vmax.f32 %v358_v54, 0.0  ;;  %v362_v4 = vadd.f32 %v634_v1, %v291_v55  ;;  %v423_v8 = vmax.f32 %v359_v56, 0.0  ;;  %v424_v9 = vmax.f32 %v360_v57, 0.0 }
  0x33   : > { %v425_v10 = vmax.f32 %v361_v58, 0.0  ;;  %v363_v11 = vadd.f32 %v634_v1, %v292_v59  ;;  %484 = vst [vmem:[%s657_s25 + $0x140] sm:$0xff] %v420_v63  ;;  %485 = vst [vmem:[%s657_s25 + $0x148] sm:$0xff] %v421_v2  ;;  %v293_v14 = vmul.f32 %v624_v0, %v222_v60  ;;  %v294_v15 = vmul.f32 %v624_v0, %v223_v61 }
  0x34   : > { %486 = vst [vmem:[%s657_s25 + $0x150] sm:$0xff] %v422_v3  ;;  %v426_v13 = vmax.f32 %v362_v4, 0.0  ;;  %v295_v16 = vmul.f32 %v624_v0, %v224_v62  ;;  %487 = vst [vmem:[%s657_s25 + $0x158] sm:$0xff] %v423_v8  ;;  %v296_v19 = vmul.f32 %v624_v0, %v225_v5  ;;  %v297_v20 = vmul.f32 %v624_v0, %v226_v6 }
  0x35   : > { %488 = vst [vmem:[%s657_s25 + $0x160] sm:$0xff] %v424_v9  ;;  %489 = vst [vmem:[%s657_s25 + $0x168] sm:$0xff] %v425_v10  ;;  %v427_v18 = vmax.f32 %v363_v11, 0.0  ;;  %v298_v21 = vmul.f32 %v624_v0, %v227_v7  ;;  %v364_v22 = vadd.f32 %v634_v1, %v293_v14  ;;  %v365_v23 = vadd.f32 %v634_v1, %v294_v15 }
  0x36   : > { %490 = vst [vmem:[%s657_s25 + $0x170] sm:$0xff] %v426_v13  ;;  %v366_v24 = vadd.f32 %v634_v1, %v295_v16  ;;  %v299_v25 = vmul.f32 %v624_v0, %v228_v12  ;;  %v367_v26 = vadd.f32 %v634_v1, %v296_v19  ;;  %v368_v27 = vadd.f32 %v634_v1, %v297_v20 }
  0x37   : > { %491 = vst [vmem:[%s657_s25 + $0x178] sm:$0xff] %v427_v18  ;;  %v369_v28 = vadd.f32 %v634_v1, %v298_v21  ;;  %v300_v29 = vmul.f32 %v624_v0, %v229_v17  ;;  %v428_v33 = vmax.f32 %v364_v22, 0.0  ;;  %v429_v34 = vmax.f32 %v365_v23, 0.0 }
  0x38   : > { %v430_v35 = vmax.f32 %v366_v24, 0.0  ;;  %v370_v36 = vadd.f32 %v634_v1, %v299_v25  ;;  %v431_v40 = vmax.f32 %v367_v26, 0.0  ;;  %v432_v41 = vmax.f32 %v368_v27, 0.0 }
  0x39   : > { %v433_v42 = vmax.f32 %v369_v28, 0.0  ;;  %v371_v43 = vadd.f32 %v634_v1, %v300_v29  ;;  %492 = vst [vmem:[%s657_s25 + $0x180] sm:$0xff] %v428_v33  ;;  %493 = vst [vmem:[%s657_s25 + $0x188] sm:$0xff] %v429_v34  ;;  %v301_v46 = vmul.f32 %v624_v0, %v230_v30  ;;  %v302_v47 = vmul.f32 %v624_v0, %v231_v31 }
  0x3a   : > { %494 = vst [vmem:[%s657_s25 + $0x190] sm:$0xff] %v430_v35  ;;  %v434_v45 = vmax.f32 %v370_v36, 0.0  ;;  %v303_v48 = vmul.f32 %v624_v0, %v232_v32  ;;  %495 = vst [vmem:[%s657_s25 + $0x198] sm:$0xff] %v431_v40  ;;  %v304_v51 = vmul.f32 %v624_v0, %v233_v37  ;;  %v305_v52 = vmul.f32 %v624_v0, %v234_v38 }
  0x3b   : > { %496 = vst [vmem:[%s657_s25 + $0x1a0] sm:$0xff] %v432_v41  ;;  %497 = vst [vmem:[%s657_s25 + $0x1a8] sm:$0xff] %v433_v42  ;;  %v435_v50 = vmax.f32 %v371_v43, 0.0  ;;  %v306_v53 = vmul.f32 %v624_v0, %v235_v39  ;;  %v372_v54 = vadd.f32 %v634_v1, %v301_v46  ;;  %v373_v55 = vadd.f32 %v634_v1, %v302_v47 }
  0x3c   : > { %498 = vst [vmem:[%s657_s25 + $0x1b0] sm:$0xff] %v434_v45  ;;  %v374_v56 = vadd.f32 %v634_v1, %v303_v48  ;;  %v307_v57 = vmul.f32 %v624_v0, %v236_v44  ;;  %v375_v58 = vadd.f32 %v634_v1, %v304_v51  ;;  %v376_v59 = vadd.f32 %v634_v1, %v305_v52 }
  0x3d   : > { %499 = vst [vmem:[%s657_s25 + $0x1b8] sm:$0xff] %v435_v50  ;;  %v377_v60 = vadd.f32 %v634_v1, %v306_v53  ;;  %v308_v61 = vmul.f32 %v624_v0, %v237_v49  ;;  %v436_v62 = vmax.f32 %v372_v54, 0.0  ;;  %v437_v63 = vmax.f32 %v373_v55, 0.0 }
  0x3e   : > { %v438_v2 = vmax.f32 %v374_v56, 0.0  ;;  %v378_v3 = vadd.f32 %v634_v1, %v307_v57  ;;  %v439_v4 = vmax.f32 %v375_v58, 0.0  ;;  %v440_v5 = vmax.f32 %v376_v59, 0.0 }
  0x3f   : > { %v441_v6 = vmax.f32 %v377_v60, 0.0  ;;  %v379_v7 = vadd.f32 %v634_v1, %v308_v61  ;;  %500 = vst [vmem:[%s657_s25 + $0x1c0] sm:$0xff] %v436_v62  ;;  %501 = vst [vmem:[%s657_s25 + $0x1c8] sm:$0xff] %v437_v63 }
  0x40   : > { %502 = vst [vmem:[%s657_s25 + $0x1d0] sm:$0xff] %v438_v2  ;;  %v442_v8 = vmax.f32 %v378_v3, 0.0  ;;  %503 = vst [vmem:[%s657_s25 + $0x1d8] sm:$0xff] %v439_v4 }
  0x41   : > { %504 = vst [vmem:[%s657_s25 + $0x1e0] sm:$0xff] %v440_v5  ;;  %505 = vst [vmem:[%s657_s25 + $0x1e8] sm:$0xff] %v441_v6  ;;  %v443_v0 = vmax.f32 %v379_v7, 0.0 }
  0x42   : > { %506 = vst [vmem:[%s657_s25 + $0x1f0] sm:$0xff] %v442_v8 }
  0x43   : > { %507 = vst [vmem:[%s657_s25 + $0x1f8] sm:$0xff] %v443_v0 }
  0x44 PF: > { %s13_s12 = sadd.s32 1, %s591_s12  }
  0x45   : > { %p10_p4 = scmp.ge.s32.totalorder %s13_s12, 18  }
  0x47   :  { %12 = sbr.rel (!%p10_p4) target bundleno = 1 (0x1), region = 62 }

// kernel: decoder_ir_forward.19
= control target key start
LH: loop header
LB: loop body
LE: loop exit
PB: predicated region body
PF: predicated region fallthrough
CT: control target
= control target key end

     0   :  { %s1468_s15 = smov 0   ;;  %s1470_s16 = smov 0   ;;  %s1664_s0 = inlined_call_operand.vmem [shape: bf16[4,8192,8], index: 0, kind: input, shape index: {}]   ;;  %s1665_s1 = inlined_call_operand.vmem [shape: bf16[4,8,128], index: 1, kind: input, shape index: {}]   ;;  %s1666_s2 = inlined_call_operand.vmem [shape: f32[4,8192,128], index: 2, kind: output, shape index: {0}]   ;;  %s1667_s3 = inlined_call_operand.vmem [shape: f32[4,256,128], index: 3, kind: output, shape index: {1}]   ;;  %s1668_s4 = inlined_call_operand.vmem [shape: f32[4,256,128], index: 4, kind: output, shape index: {2}]  }
   0x1   :  { %s1472_s17 = smov 0   ;;  %s1474_s18 = smov 0  }
   0x2   :  { %s1476_s19 = smov 0  }
   0x3 LB: > { %s37_s20 = sadd.s32 1, %s1433_s17  ;;  %s41_s21 = sadd.s32 1, %s1437_s18  ;;  %s1441_s19 = sphi %s1476_s19, %s15_s19   ;;  %s1437_s18 = sphi %s1474_s18, %s1672_s18   ;;  %s1433_s17 = sphi %s1472_s17, %s1671_s17   ;;  %s1429_s16 = sphi %s1470_s16, %s1670_s16   ;;  %s1425_s15 = sphi %s1468_s15, %s1669_s15  }
   0x4   : > { %p39_p0 = scmp.ge.s32.totalorder %s37_s20, 32  ;;  %p1246_p1 = scmp.ge.s32.totalorder %s1441_s19, 1 }
   0x5   : > { %p236_p2 = scmp.lt.s32.totalorder %s1441_s19, 129 }
   0x6   : > { %s1674_s20 = smov (%p39_p0, %s37_s20), 0  ;;  %s1676_s21 = smov (!%p39_p0, %s41_s21), %s1437_s18 }
   0x7   : > { %p237_p3 = pnand %p1246_p1, %p236_p2  ;;  %p43_p4 = scmp.ge.s32.totalorder %s1676_s21, 4 }
   0x8   : > { %s1247_s22 = sshll.u32 (!%p237_p3), %s1425_s15, 5  ;;  %p309_p5 = scmp.lt.s32.totalorder (!%p237_p3), %s1429_s16, 3 }
   0x9   : > { %s1678_s21 = smov (%p43_p4, %s1676_s21), 0  ;;  %240 = sbr.rel (%p237_p3) target bundleno = 298 (0x12a), region = 28 }
   0xa   : > { %p311_p6 = scmp.lt.s32.totalorder (!%p237_p3), %s1247_s22, 1023  ;;  %p346_p7 = scmp.lt.s32.totalorder (!%p237_p3), %s1425_s15, 31 }
   0xe   : > { %s1680_s16 = smov (!%p309_p5, %s1429_s16), 3  ;;  %s1682_s22 = smov (!%p311_p6, %s1247_s22), 1023  ;;  %vm597_vm0 = vcmask 1043456   ;;  %vm548_vm1 = vcmask 64512  }
   0xf   : > { %s1248_s23 = sshll.u32 %s1680_s16, 10  ;;  %s1250_s24 = sshll.u32 %s1680_s16, 2 }
  0x10   : > { %s1505_s25 = sadd.s32 %s1248_s23, %s1682_s22  ;;  %s330_s28 = scalar_lea.vmem %s1665_s1, %s1250_s24 }
  0x11   : > { %s1249_s29 = sshll.u32 %s1505_s25, 2  ;;  %v467_v0 = vld [vmem:[%s330_s28] sm:$0xf]  ;;  %s1253_s7 = sshll.u32 %s1505_s25, 3 }
  0x12   : > { %s1514_s6 = scalar_lea.vmem %s1664_s0, %s1249_s29  ;;  %1345 = vmatprep.subr.msk.bf16.mxu0 %vm597_vm0, %v467_v0  ;;  %v599_v1 = vsel %vm597_vm0, %v467_v0, 0  ;;  %1346 = vmatprep.subr.msk.bf16.mxu1 %vm597_vm0, %v467_v0  ;;  %s1552_s10 = scalar_lea.vmem %s1666_s2, %s1253_s7 }
  0x13   : > { %1310 = vmatpush3.bf16.msra.mxu0 %v599_v1  ;;  %v1387_v2 = vld [vmem:[%s1514_s6] sm:$0xff]   ;;  %1344 = vmatpush3.bf16.msra.mxu1 %v599_v1  ;;  %v1388_v3 = vld [vmem:[%s1514_s6 + $0x8] sm:$0xff]   ;;  %v1389_v4 = vld [vmem:[%s1514_s6 + $0x10] sm:$0xff]   ;;  %s1684_s15 = smov (!%p346_p7, %s1425_s15), 31  ;;  %s1254_s11 = sshll.u32 %s1680_s16, 5 }
  0x14   : > { %1311 = vmatprep.mubr.msk.bf16.mxu0 %vm548_vm1, %v1387_v2  ;;  %v1390_v5 = vld [vmem:[%s1514_s6 + $0x18] sm:$0xff]   ;;  %v1391_v6 = vld [vmem:[%s1514_s6 + $0x20] sm:$0xff]   ;;  %v1396_v8 = vld [vmem:[%s1514_s6 + $0x48] sm:$0xff]   ;;  %s352_s12 = sadd.s32 %s1254_s11, %s1684_s15 }
  0x15   : > { %v1395_v7 = vld [vmem:[%s1514_s6 + $0x40] sm:$0xff]   ;;  %v1397_v9 = vld [vmem:[%s1514_s6 + $0x50] sm:$0xff]   ;;  %v1392_v10 = vld [vmem:[%s1514_s6 + $0x28] sm:$0xff]   ;;  %s1255_s13 = sshll.u32 %s352_s12, 3 }
  0x16   : > { %1312 = vmatmul.mubr.msk.bf16.vlgmr.msra.gmra.mxu0 %vm548_vm1, %v1388_v3  ;;  %1327 = vmatprep.mubr.msk.bf16.mxu1 %vm548_vm1, %v1395_v7  ;;  %v1398_v11 = vld [vmem:[%s1514_s6 + $0x58] sm:$0xff]   ;;  %v1393_v12 = vld [vmem:[%s1514_s6 + $0x30] sm:$0xff]   ;;  %v1399_v13 = vld [vmem:[%s1514_s6 + $0x60] sm:$0xff]   ;;  %s354_s23 = scalar_lea.vmem %s1667_s3, %s1255_s13  ;;  %s365_s25 = scalar_lea.vmem %s1668_s4, %s1255_s13 }
  0x17   : > { %1315 = vmatprep.mubr.msk.bf16.mxu0 %vm548_vm1, %v1389_v4  ;;  %1328 = vmatmul.mubr.msk.bf16.vlgmr.msra.gmra.mxu1 %vm548_vm1, %v1396_v8  ;;  %v1394_v14 = vld [vmem:[%s1514_s6 + $0x38] sm:$0xff]   ;;  %v1400_v15 = vld [vmem:[%s1514_s6 + $0x68] sm:$0xff]   ;;  %v1401_v16 = vld [vmem:[%s1514_s6 + $0x70] sm:$0xff]  }
  0x18   : > { %1331 = vmatprep.mubr.msk.bf16.mxu1 %vm548_vm1, %v1397_v9  ;;  %v1402_v17 = vld [vmem:[%s1514_s6 + $0x78] sm:$0xff]  }
  0x1e   : > { %1316 = vmatmul.mubr.msk.bf16.gmra.mxu0 %vm548_vm1, %v1390_v5 }
  0x1f   : > { %1319 = vmatprep.mubr.msk.bf16.mxu0 %vm548_vm1, %v1391_v6  ;;  %1332 = vmatmul.mubr.msk.bf16.gmra.mxu1 %vm548_vm1, %v1398_v11 }
  0x20   : > { %1335 = vmatprep.mubr.msk.bf16.mxu1 %vm548_vm1, %v1399_v13 }
  0x26   : > { %1320 = vmatmul.mubr.msk.bf16.gmra.mxu0 %vm548_vm1, %v1392_v10 }
  0x27   : > { %1323 = vmatprep.mubr.msk.bf16.mxu0 %vm548_vm1, %v1393_v12  ;;  %1336 = vmatmul.mubr.msk.bf16.gmra.mxu1 %vm548_vm1, %v1400_v15 }
  0x28   : > { %1339 = vmatprep.mubr.msk.bf16.mxu1 %vm548_vm1, %v1401_v16 }
  0x2e   : > { %1324 = vmatmul.mubr.msk.bf16.gmra.mxu0 %vm548_vm1, %v1394_v14 }
  0x2f   : > { %1340 = vmatmul.mubr.msk.bf16.gmra.mxu1 %vm548_vm1, %v1402_v17 }
  0xd6   : > { %v1313_v18 = vpop.f32.mrf.mxu0 }
  0xd7   : > { %863 = vst [vmem:[%s1552_s10 + $0x10] sm:$0xff] %v1313_v18  ;;  %v1558_v26 = vpop.f32.mrf.mxu1  ;;  %v932_v27 = vmul.f32 %v1313_v18, %v1313_v18 }
  0xd8   : > { %v635_v19 = vpop.f32.mrf.mxu0  ;;  %879 = vst [vmem:[%s1552_s10 + $0x90] sm:$0xff] %v1558_v26 }
  0xd9   : > { %861 = vst [vmem:[%s1552_s10] sm:$0xff] %v635_v19  ;;  %v930_v22 = vmul.f32 %v635_v19, %v635_v19  ;;  %v1563_v31 = vpop.f32.mrf.mxu1 }
  0xda   : > { %v1314_v20 = vpop.f32.mrf.mxu0  ;;  %877 = vst [vmem:[%s1552_s10 + $0x80] sm:$0xff] %v1563_v31 }
  0xdb   : > { %864 = vst [vmem:[%s1552_s10 + $0x18] sm:$0xff] %v1314_v20  ;;  %v933_v32 = vmul.f32 %v1314_v20, %v1314_v20  ;;  %v1568_v36 = vpop.f32.mrf.mxu1 }
  0xdc   : > { %v638_v21 = vpop.f32.mrf.mxu0  ;;  %880 = vst [vmem:[%s1552_s10 + $0x98] sm:$0xff] %v1568_v36 }
  0xdd   : > { %862 = vst [vmem:[%s1552_s10 + $0x8] sm:$0xff] %v638_v21  ;;  %v893_v23 = vadd.f32 %v638_v21, %v635_v19  ;;  %v931_v24 = vmul.f32 %v638_v21, %v638_v21  ;;  %v1573_v41 = vpop.f32.mrf.mxu1 }
  0xde   : > { %v1317_v25 = vpop.f32.mrf.mxu0  ;;  %878 = vst [vmem:[%s1552_s10 + $0x88] sm:$0xff] %v1573_v41 }
  0xdf   : > { %v894_v28 = vadd.f32 %v1313_v18, %v893_v23  ;;  %v962_v29 = vadd.f32 %v931_v24, %v930_v22  ;;  %867 = vst [vmem:[%s1552_s10 + $0x30] sm:$0xff] %v1317_v25  ;;  %v1578_v46 = vpop.f32.mrf.mxu1  ;;  %v936_v47 = vmul.f32 %v1317_v25, %v1317_v25 }
  0xe0   : > { %v651_v30 = vpop.f32.mrf.mxu0  ;;  %883 = vst [vmem:[%s1552_s10 + $0xb0] sm:$0xff] %v1578_v46 }
  0xe1   : > { %v963_v33 = vadd.f32 %v962_v29, %v932_v27  ;;  %865 = vst [vmem:[%s1552_s10 + $0x20] sm:$0xff] %v651_v30  ;;  %v895_v34 = vadd.f32 %v1314_v20, %v894_v28  ;;  %v934_v38 = vmul.f32 %v651_v30, %v651_v30  ;;  %v1583_v51 = vpop.f32.mrf.mxu1 }
  0xe2   : > { %v1318_v35 = vpop.f32.mrf.mxu0  ;;  %881 = vst [vmem:[%s1552_s10 + $0xa0] sm:$0xff] %v1583_v51 }
  0xe3   : > { %v896_v37 = vadd.f32 %v895_v34, %v651_v30  ;;  %v964_v39 = vadd.f32 %v963_v33, %v933_v32  ;;  %868 = vst [vmem:[%s1552_s10 + $0x38] sm:$0xff] %v1318_v35  ;;  %v937_v52 = vmul.f32 %v1318_v35, %v1318_v35  ;;  %v1588_v56 = vpop.f32.mrf.mxu1  ;;  %v946_v32 = vmul.f32 %v1563_v31, %v1563_v31 }
  0xe4   : > { %v654_v40 = vpop.f32.mrf.mxu0  ;;  %884 = vst [vmem:[%s1552_s10 + $0xb8] sm:$0xff] %v1588_v56 }
  0xe5   : > { %v965_v42 = vadd.f32 %v964_v39, %v934_v38  ;;  %866 = vst [vmem:[%s1552_s10 + $0x28] sm:$0xff] %v654_v40  ;;  %v897_v43 = vadd.f32 %v896_v37, %v654_v40  ;;  %v935_v44 = vmul.f32 %v654_v40, %v654_v40  ;;  %v1593_v61 = vpop.f32.mrf.mxu1  ;;  %v947_v38 = vmul.f32 %v1573_v41, %v1573_v41 }
  0xe6   : > { %v1321_v45 = vpop.f32.mrf.mxu0  ;;  %882 = vst [vmem:[%s1552_s10 + $0xa8] sm:$0xff] %v1593_v61  ;;  %v948_v40 = vmul.f32 %v1558_v26, %v1558_v26 }
  0xe7   : > { %v898_v48 = vadd.f32 %v1317_v25, %v897_v43  ;;  %v966_v49 = vadd.f32 %v965_v42, %v935_v44  ;;  %871 = vst [vmem:[%s1552_s10 + $0x50] sm:$0xff] %v1321_v45  ;;  %v1598_v2 = vpop.f32.mrf.mxu1  ;;  %v940_v3 = vmul.f32 %v1321_v45, %v1321_v45  ;;  %v949_v44 = vmul.f32 %v1568_v36, %v1568_v36 }
  0xe8   : > { %v667_v50 = vpop.f32.mrf.mxu0  ;;  %887 = vst [vmem:[%s1552_s10 + $0xd0] sm:$0xff] %v1598_v2 }
  0xe9   : > { %v967_v53 = vadd.f32 %v966_v49, %v936_v47  ;;  %869 = vst [vmem:[%s1552_s10 + $0x40] sm:$0xff] %v667_v50  ;;  %v899_v54 = vadd.f32 %v1318_v35, %v898_v48  ;;  %v938_v58 = vmul.f32 %v667_v50, %v667_v50  ;;  %v731_v7 = vpop.f32.mrf.mxu1  ;;  %v950_v48 = vmul.f32 %v1583_v51, %v1583_v51 }
  0xea   : > { %v1322_v55 = vpop.f32.mrf.mxu0  ;;  %885 = vst [vmem:[%s1552_s10 + $0xc0] sm:$0xff] %v731_v7 }
  0xeb   : > { %v900_v57 = vadd.f32 %v899_v54, %v667_v50  ;;  %v968_v59 = vadd.f32 %v967_v53, %v937_v52  ;;  %872 = vst [vmem:[%s1552_s10 + $0x58] sm:$0xff] %v1322_v55  ;;  %v941_v8 = vmul.f32 %v1322_v55, %v1322_v55  ;;  %v1338_v12 = vpop.f32.mrf.mxu1  ;;  %v951_v52 = vmul.f32 %v1593_v61, %v1593_v61 }
  0xec   : > { %v670_v60 = vpop.f32.mrf.mxu0  ;;  %888 = vst [vmem:[%s1552_s10 + $0xd8] sm:$0xff] %v1338_v12 }
  0xed   : > { %v969_v62 = vadd.f32 %v968_v59, %v938_v58  ;;  %870 = vst [vmem:[%s1552_s10 + $0x48] sm:$0xff] %v670_v60  ;;  %v901_v63 = vadd.f32 %v900_v57, %v670_v60  ;;  %v939_v0 = vmul.f32 %v670_v60, %v670_v60  ;;  %v734_v17 = vpop.f32.mrf.mxu1  ;;  %v954_v58 = vmul.f32 %v731_v7, %v731_v7 }
  0xee   : > { %v1325_v1 = vpop.f32.mrf.mxu0  ;;  %886 = vst [vmem:[%s1552_s10 + $0xc8] sm:$0xff] %v734_v17 }
  0xef   : > { %v902_v4 = vadd.f32 %v1321_v45, %v901_v63  ;;  %v970_v5 = vadd.f32 %v969_v62, %v939_v0  ;;  %875 = vst [vmem:[%s1552_s10 + $0x70] sm:$0xff] %v1325_v1  ;;  %v1341_v21 = vpop.f32.mrf.mxu1  ;;  %v944_v22 = vmul.f32 %v1325_v1, %v1325_v1  ;;  %v955_v63 = vmul.f32 %v734_v17, %v734_v17 }
  0xf0   : > { %v683_v6 = vpop.f32.mrf.mxu0  ;;  %891 = vst [vmem:[%s1552_s10 + $0xf0] sm:$0xff] %v1341_v21 }
  0xf1   : > { %v971_v9 = vadd.f32 %v970_v5, %v940_v3  ;;  %873 = vst [vmem:[%s1552_s10 + $0x60] sm:$0xff] %v683_v6  ;;  %v903_v10 = vadd.f32 %v1322_v55, %v902_v4  ;;  %v942_v14 = vmul.f32 %v683_v6, %v683_v6  ;;  %v747_v25 = vpop.f32.mrf.mxu1 }
  0xf2   : > { %v1326_v11 = vpop.f32.mrf.mxu0  ;;  %889 = vst [vmem:[%s1552_s10 + $0xe0] sm:$0xff] %v747_v25 }
  0xf3   : > { %v904_v13 = vadd.f32 %v903_v10, %v683_v6  ;;  %v972_v15 = vadd.f32 %v971_v9, %v941_v8  ;;  %876 = vst [vmem:[%s1552_s10 + $0x78] sm:$0xff] %v1326_v11  ;;  %v945_v27 = vmul.f32 %v1326_v11, %v1326_v11  ;;  %v1342_v30 = vpop.f32.mrf.mxu1  ;;  %v960_v10 = vmul.f32 %v1341_v21, %v1341_v21 }
  0xf4   : > { %v686_v16 = vpop.f32.mrf.mxu0  ;;  %892 = vst [vmem:[%s1552_s10 + $0xf8] sm:$0xff] %v1342_v30 }
  0xf5   : > { %v973_v18 = vadd.f32 %v972_v15, %v942_v14  ;;  %874 = vst [vmem:[%s1552_s10 + $0x68] sm:$0xff] %v686_v16  ;;  %v905_v19 = vadd.f32 %v904_v13, %v686_v16  ;;  %v943_v20 = vmul.f32 %v686_v16, %v686_v16  ;;  %v750_v35 = vpop.f32.mrf.mxu1  ;;  %v961_v14 = vmul.f32 %v1342_v30, %v1342_v30 }
  0xf6   : > { %890 = vst [vmem:[%s1552_s10 + $0xe8] sm:$0xff] %v750_v35  ;;  %v959_v9 = vmul.f32 %v750_v35, %v750_v35 }
  0xf7   : > { %v906_v23 = vadd.f32 %v1325_v1, %v905_v19  ;;  %v974_v24 = vadd.f32 %v973_v18, %v943_v20  ;;  %v957_v1 = vmul.f32 %v1338_v12, %v1338_v12 }
  0xf9   : > { %v907_v28 = vadd.f32 %v1326_v11, %v906_v23  ;;  %v975_v29 = vadd.f32 %v974_v24, %v944_v22 }
  0xfb   : > { %v976_v33 = vadd.f32 %v975_v29, %v945_v27  ;;  %v908_v34 = vadd.f32 %v907_v28, %v1563_v31 }
  0xfd   : > { %v909_v37 = vadd.f32 %v908_v34, %v1573_v41  ;;  %v977_v39 = vadd.f32 %v976_v33, %v946_v32 }
  0xff   : > { %v910_v42 = vadd.f32 %v1558_v26, %v909_v37  ;;  %v978_v43 = vadd.f32 %v977_v39, %v947_v38  ;;  %v952_v26 = vmul.f32 %v1578_v46, %v1578_v46 }
 0x101   : > { %v979_v45 = vadd.f32 %v978_v43, %v948_v40  ;;  %v911_v31 = vadd.f32 %v1568_v36, %v910_v42  ;;  %v953_v36 = vmul.f32 %v1588_v56, %v1588_v56 }
 0x103   : > { %v912_v47 = vadd.f32 %v911_v31, %v1583_v51  ;;  %v980_v41 = vadd.f32 %v979_v45, %v949_v44 }
 0x105   : > { %v981_v49 = vadd.f32 %v980_v41, %v950_v48  ;;  %v913_v50 = vadd.f32 %v912_v47, %v1593_v61  ;;  %v956_v61 = vmul.f32 %v1598_v2, %v1598_v2 }
 0x107   : > { %v914_v53 = vadd.f32 %v1578_v46, %v913_v50  ;;  %v982_v54 = vadd.f32 %v981_v49, %v951_v52 }
 0x109   : > { %v983_v55 = vadd.f32 %v982_v54, %v952_v26  ;;  %v915_v57 = vadd.f32 %v1588_v56, %v914_v53  ;;  %v958_v56 = vmul.f32 %v747_v25, %v747_v25 }
 0x10b   : > { %v916_v51 = vadd.f32 %v915_v57, %v731_v7  ;;  %v984_v59 = vadd.f32 %v983_v55, %v953_v36 }
 0x10d   : > { %v985_v60 = vadd.f32 %v984_v59, %v954_v58  ;;  %v917_v62 = vadd.f32 %v916_v51, %v734_v17 }
 0x10f   : > { %v918_v0 = vadd.f32 %v1598_v2, %v917_v62  ;;  %v986_v46 = vadd.f32 %v985_v60, %v955_v63 }
 0x111   : > { %v987_v3 = vadd.f32 %v986_v46, %v956_v61  ;;  %v919_v4 = vadd.f32 %v1338_v12, %v918_v0 }
 0x113   : > { %v920_v5 = vadd.f32 %v919_v4, %v747_v25  ;;  %v988_v6 = vadd.f32 %v987_v3, %v957_v1 }
 0x115   : > { %v989_v7 = vadd.f32 %v988_v6, %v958_v56  ;;  %v921_v8 = vadd.f32 %v920_v5, %v750_v35 }
 0x117   : > { %v922_v11 = vadd.f32 %v1341_v21, %v921_v8  ;;  %v990_v13 = vadd.f32 %v989_v7, %v959_v9 }
 0x119   : > { %v923_v15 = vadd.f32 %v1342_v30, %v922_v11  ;;  %v991_v16 = vadd.f32 %v990_v13, %v960_v10 }
 0x11b   : > { %v924_v2 = vrot.slane %v923_v15, 4  ;;  %v992_v17 = vadd.f32 %v991_v16, %v961_v14 }
 0x11d   : > { %v925_v18 = vadd.f32 %v924_v2, %v923_v15  ;;  %v993_v19 = vrot.slane %v992_v17, 4 }
 0x11f   : > { %v926_v12 = vrot.slane %v925_v18, 2  ;;  %v994_v20 = vadd.f32 %v993_v19, %v992_v17 }
 0x121   : > { %v927_v22 = vadd.f32 %v926_v12, %v925_v18  ;;  %v995_v23 = vrot.slane %v994_v20, 2 }
 0x123   : > { %v928_v24 = vrot.slane %v927_v22, 1  ;;  %v996_v25 = vadd.f32 %v995_v23, %v994_v20 }
 0x125   : > { %v929_v21 = vadd.f32 %v928_v24, %v927_v22  ;;  %v997_v27 = vrot.slane %v996_v25, 1 }
 0x127   : > { %v998_v28 = vadd.f32 %v997_v27, %v996_v25  ;;  %999 = vst [vmem:[%s354_s23] sm:$0xff] %v929_v21 }
 0x129   : > { %1000 = vst [vmem:[%s365_s25] sm:$0xff] %v998_v28 }
 0x12a PF: > { %s15_s19 = sadd.s32 1, %s1441_s19   ;;  %s1669_s15 = smov %s1433_s17 }
 0x12b   : > { %p12_p8 = scmp.ge.s32.totalorder %s15_s19, 130   ;;  %s1670_s16 = smov %s1437_s18 }
 0x12c   : > { %s1671_s17 = smov %s1674_s20  ;;  %s1672_s18 = smov %s1678_s21 }
 0x12d   :  { %14 = sbr.rel (!%p12_p8) target bundleno = 3 (0x3), region = 93 }

// kernel: decoder_ir_forward.20
= control target key start
LH: loop header
LB: loop body
LE: loop exit
PB: predicated region body
PF: predicated region fallthrough
CT: control target
= control target key end

     0   :  { %s613_s12 = smov 0   ;;  %s900_s0 = inlined_call_operand.vmem [shape: f32[32768,128], index: 0, kind: input, shape index: {}]   ;;  %s901_s1 = inlined_call_operand.vmem [shape: f32[1,128], index: 1, kind: input, shape index: {}]   ;;  %s902_s2 = inlined_call_operand.vmem [shape: f32[1,128], index: 2, kind: input, shape index: {}]   ;;  %s903_s3 = inlined_call_operand.vmem [shape: f32[32768,128], index: 3, kind: output, shape index: {}]  }
   0x1 LB: > { %s564_s13 = sadd.s32 4294967295, %s591_s12   ;;  %p568_p0 = scmp.ge.s32.totalorder %s591_s12, 1  ;;  %s591_s12 = sphi %s613_s12, %s13_s12  }
   0x2   : > { %p138_p1 = scmp.lt.s32.totalorder %s591_s12, 65 }
   0x4   : > { %p139_p2 = pnand %p568_p0, %p138_p1 }
   0x5   : > { %s569_s14 = sshll.u32 (!%p139_p2), %s564_s13, 6 }
   0x6   : > { %142 = sbr.rel (%p139_p2) target bundleno = 68 (0x44), region = 32  ;;  %p163_p3 = scmp.lt.s32.totalorder (!%p139_p2), %s569_s14, 4095 }
   0xb   : > { %s905_s14 = smov (!%p163_p3, %s569_s14), 4095  ;;  %v624_v0 = vld [vmem:[%s901_s1] ss:$0 sm:$0xff] }
   0xc   : > { %s570_s15 = sshll.u32 %s905_s14, 3  ;;  %v634_v1 = vld [vmem:[%s902_s2] ss:$0 sm:$0xff] }
   0xd   : > { %s629_s20 = scalar_lea.vmem %s900_s0, %s570_s15  ;;  %s657_s25 = scalar_lea.vmem %s903_s3, %s570_s15 }
   0xe   : > { %v174_v2 = vld [vmem:[%s629_s20] sm:$0xff]  ;;  %v175_v3 = vld [vmem:[%s629_s20 + $0x8] sm:$0xff]  ;;  %v176_v4 = vld [vmem:[%s629_s20 + $0x10] sm:$0xff] }
   0xf   : > { %v245_v5 = vmul.f32 %v624_v0, %v174_v2  ;;  %v246_v6 = vmul.f32 %v624_v0, %v175_v3  ;;  %v247_v7 = vmul.f32 %v624_v0, %v176_v4  ;;  %v177_v8 = vld [vmem:[%s629_s20 + $0x18] sm:$0xff]  ;;  %v178_v9 = vld [vmem:[%s629_s20 + $0x20] sm:$0xff]  ;;  %v179_v10 = vld [vmem:[%s629_s20 + $0x28] sm:$0xff] }
  0x10   : > { %v248_v11 = vmul.f32 %v624_v0, %v177_v8  ;;  %v249_v12 = vmul.f32 %v624_v0, %v178_v9  ;;  %v250_v13 = vmul.f32 %v624_v0, %v179_v10  ;;  %v180_v14 = vld [vmem:[%s629_s20 + $0x30] sm:$0xff]  ;;  %v181_v15 = vld [vmem:[%s629_s20 + $0x38] sm:$0xff]  ;;  %v182_v24 = vld [vmem:[%s629_s20 + $0x40] sm:$0xff] }
  0x11   : > { %v316_v16 = vadd.f32 %v634_v1, %v245_v5  ;;  %v317_v17 = vadd.f32 %v634_v1, %v246_v6  ;;  %v318_v18 = vadd.f32 %v634_v1, %v247_v7  ;;  %v251_v19 = vmul.f32 %v624_v0, %v180_v14  ;;  %v183_v25 = vld [vmem:[%s629_s20 + $0x48] sm:$0xff]  ;;  %v184_v26 = vld [vmem:[%s629_s20 + $0x50] sm:$0xff]  ;;  %v185_v31 = vld [vmem:[%s629_s20 + $0x58] sm:$0xff] }
  0x12   : > { %v319_v20 = vadd.f32 %v634_v1, %v248_v11  ;;  %v320_v21 = vadd.f32 %v634_v1, %v249_v12  ;;  %v321_v22 = vadd.f32 %v634_v1, %v250_v13  ;;  %v252_v23 = vmul.f32 %v624_v0, %v181_v15  ;;  %v186_v32 = vld [vmem:[%s629_s20 + $0x60] sm:$0xff]  ;;  %v187_v33 = vld [vmem:[%s629_s20 + $0x68] sm:$0xff]  ;;  %v188_v38 = vld [vmem:[%s629_s20 + $0x70] sm:$0xff] }
  0x13   : > { %v380_v27 = vmax.f32 %v316_v16, 0.0  ;;  %v381_v28 = vmax.f32 %v317_v17, 0.0  ;;  %v382_v29 = vmax.f32 %v318_v18, 0.0  ;;  %v322_v30 = vadd.f32 %v634_v1, %v251_v19  ;;  %v189_v43 = vld [vmem:[%s629_s20 + $0x78] sm:$0xff]  ;;  %v190_v56 = vld [vmem:[%s629_s20 + $0x80] sm:$0xff]  ;;  %v191_v57 = vld [vmem:[%s629_s20 + $0x88] sm:$0xff] }
  0x14   : > { %v383_v34 = vmax.f32 %v319_v20, 0.0  ;;  %v384_v35 = vmax.f32 %v320_v21, 0.0  ;;  %v385_v36 = vmax.f32 %v321_v22, 0.0  ;;  %v323_v37 = vadd.f32 %v634_v1, %v252_v23  ;;  %v192_v58 = vld [vmem:[%s629_s20 + $0x90] sm:$0xff]  ;;  %v193_v63 = vld [vmem:[%s629_s20 + $0x98] sm:$0xff]  ;;  %v194_v2 = vld [vmem:[%s629_s20 + $0xa0] sm:$0xff] }
  0x15   : > { %444 = vst [vmem:[%s657_s25] sm:$0xff] %v380_v27  ;;  %445 = vst [vmem:[%s657_s25 + $0x8] sm:$0xff] %v381_v28  ;;  %v386_v39 = vmax.f32 %v322_v30, 0.0  ;;  %v253_v40 = vmul.f32 %v624_v0, %v182_v24  ;;  %v254_v41 = vmul.f32 %v624_v0, %v183_v25  ;;  %v255_v42 = vmul.f32 %v624_v0, %v184_v26  ;;  %v195_v3 = vld [vmem:[%s629_s20 + $0xa8] sm:$0xff]  ;;  %v196_v8 = vld [vmem:[%s629_s20 + $0xb0] sm:$0xff] }
  0x16   : > { %446 = vst [vmem:[%s657_s25 + $0x10] sm:$0xff] %v382_v29  ;;  %447 = vst [vmem:[%s657_s25 + $0x18] sm:$0xff] %v383_v34  ;;  %v387_v44 = vmax.f32 %v323_v37, 0.0  ;;  %v256_v45 = vmul.f32 %v624_v0, %v185_v31  ;;  %v257_v46 = vmul.f32 %v624_v0, %v186_v32  ;;  %v258_v47 = vmul.f32 %v624_v0, %v187_v33  ;;  %v197_v13 = vld [vmem:[%s629_s20 + $0xb8] sm:$0xff]  ;;  %v198_v26 = vld [vmem:[%s629_s20 + $0xc0] sm:$0xff] }
  0x17   : > { %448 = vst [vmem:[%s657_s25 + $0x20] sm:$0xff] %v384_v35  ;;  %449 = vst [vmem:[%s657_s25 + $0x28] sm:$0xff] %v385_v36  ;;  %v324_v48 = vadd.f32 %v634_v1, %v253_v40  ;;  %v325_v49 = vadd.f32 %v634_v1, %v254_v41  ;;  %v326_v50 = vadd.f32 %v634_v1, %v255_v42  ;;  %v199_v27 = vld [vmem:[%s629_s20 + $0xc8] sm:$0xff]  ;;  %v200_v28 = vld [vmem:[%s629_s20 + $0xd0] sm:$0xff] }
  0x18   : > { %450 = vst [vmem:[%s657_s25 + $0x30] sm:$0xff] %v386_v39  ;;  %v259_v51 = vmul.f32 %v624_v0, %v188_v38  ;;  %451 = vst [vmem:[%s657_s25 + $0x38] sm:$0xff] %v387_v44  ;;  %v327_v52 = vadd.f32 %v634_v1, %v256_v45  ;;  %v328_v53 = vadd.f32 %v634_v1, %v257_v46  ;;  %v201_v33 = vld [vmem:[%s629_s20 + $0xd8] sm:$0xff]  ;;  %v202_v34 = vld [vmem:[%s629_s20 + $0xe0] sm:$0xff] }
  0x19   : > { %v329_v54 = vadd.f32 %v634_v1, %v258_v47  ;;  %v260_v55 = vmul.f32 %v624_v0, %v189_v43  ;;  %v388_v59 = vmax.f32 %v324_v48, 0.0  ;;  %v389_v60 = vmax.f32 %v325_v49, 0.0  ;;  %v203_v35 = vld [vmem:[%s629_s20 + $0xe8] sm:$0xff]  ;;  %v204_v40 = vld [vmem:[%s629_s20 + $0xf0] sm:$0xff]  ;;  %v205_v45 = vld [vmem:[%s629_s20 + $0xf8] sm:$0xff] }
  0x1a   : > { %v390_v61 = vmax.f32 %v326_v50, 0.0  ;;  %v330_v62 = vadd.f32 %v634_v1, %v259_v51  ;;  %v391_v4 = vmax.f32 %v327_v52, 0.0  ;;  %v392_v5 = vmax.f32 %v328_v53, 0.0 }
  0x1b   : > { %v393_v6 = vmax.f32 %v329_v54, 0.0  ;;  %v331_v7 = vadd.f32 %v634_v1, %v260_v55  ;;  %452 = vst [vmem:[%s657_s25 + $0x40] sm:$0xff] %v388_v59  ;;  %453 = vst [vmem:[%s657_s25 + $0x48] sm:$0xff] %v389_v60  ;;  %v261_v10 = vmul.f32 %v624_v0, %v190_v56  ;;  %v262_v11 = vmul.f32 %v624_v0, %v191_v57  ;;  %v207_v59 = vld [vmem:[%s629_s20 + $0x108] sm:$0xff]  ;;  %v208_v60 = vld [vmem:[%s629_s20 + $0x110] sm:$0xff] }
  0x1c   : > { %454 = vst [vmem:[%s657_s25 + $0x50] sm:$0xff] %v390_v61  ;;  %v394_v9 = vmax.f32 %v330_v62, 0.0  ;;  %v263_v12 = vmul.f32 %v624_v0, %v192_v58  ;;  %455 = vst [vmem:[%s657_s25 + $0x58] sm:$0xff] %v391_v4  ;;  %v264_v15 = vmul.f32 %v624_v0, %v193_v63  ;;  %v265_v16 = vmul.f32 %v624_v0, %v194_v2  ;;  %v206_v58 = vld [vmem:[%s629_s20 + $0x100] sm:$0xff] }
  0x1d   : > { %456 = vst [vmem:[%s657_s25 + $0x60] sm:$0xff] %v392_v5  ;;  %457 = vst [vmem:[%s657_s25 + $0x68] sm:$0xff] %v393_v6  ;;  %v395_v14 = vmax.f32 %v331_v7, 0.0  ;;  %v266_v17 = vmul.f32 %v624_v0, %v195_v3  ;;  %v332_v18 = vadd.f32 %v634_v1, %v261_v10  ;;  %v333_v19 = vadd.f32 %v634_v1, %v262_v11  ;;  %v209_v3 = vld [vmem:[%s629_s20 + $0x118] sm:$0xff]  ;;  %v210_v4 = vld [vmem:[%s629_s20 + $0x120] sm:$0xff] }
  0x1e   : > { %458 = vst [vmem:[%s657_s25 + $0x70] sm:$0xff] %v394_v9  ;;  %v334_v20 = vadd.f32 %v634_v1, %v263_v12  ;;  %v267_v21 = vmul.f32 %v624_v0, %v196_v8  ;;  %v335_v22 = vadd.f32 %v634_v1, %v264_v15  ;;  %v336_v23 = vadd.f32 %v634_v1, %v265_v16  ;;  %v211_v5 = vld [vmem:[%s629_s20 + $0x128] sm:$0xff]  ;;  %v212_v10 = vld [vmem:[%s629_s20 + $0x130] sm:$0xff]  ;;  %v213_v15 = vld [vmem:[%s629_s20 + $0x138] sm:$0xff] }
  0x1f   : > { %459 = vst [vmem:[%s657_s25 + $0x78] sm:$0xff] %v395_v14  ;;  %v337_v24 = vadd.f32 %v634_v1, %v266_v17  ;;  %v268_v25 = vmul.f32 %v624_v0, %v197_v13  ;;  %v396_v29 = vmax.f32 %v332_v18, 0.0  ;;  %v397_v30 = vmax.f32 %v333_v19, 0.0 }
  0x20   : > { %v398_v31 = vmax.f32 %v334_v20, 0.0  ;;  %v338_v32 = vadd.f32 %v634_v1, %v267_v21  ;;  %v399_v36 = vmax.f32 %v335_v22, 0.0  ;;  %v400_v37 = vmax.f32 %v336_v23, 0.0 }
  0x21   : > { %v401_v38 = vmax.f32 %v337_v24, 0.0  ;;  %v339_v39 = vadd.f32 %v634_v1, %v268_v25  ;;  %460 = vst [vmem:[%s657_s25 + $0x80] sm:$0xff] %v396_v29  ;;  %461 = vst [vmem:[%s657_s25 + $0x88] sm:$0xff] %v397_v30  ;;  %v269_v42 = vmul.f32 %v624_v0, %v198_v26  ;;  %v270_v43 = vmul.f32 %v624_v0, %v199_v27  ;;  %v215_v29 = vld [vmem:[%s629_s20 + $0x148] sm:$0xff]  ;;  %v216_v30 = vld [vmem:[%s629_s20 + $0x150] sm:$0xff] }
  0x22   : > { %462 = vst [vmem:[%s657_s25 + $0x90] sm:$0xff] %v398_v31  ;;  %v402_v41 = vmax.f32 %v338_v32, 0.0  ;;  %v271_v44 = vmul.f32 %v624_v0, %v200_v28  ;;  %463 = vst [vmem:[%s657_s25 + $0x98] sm:$0xff] %v399_v36  ;;  %v272_v47 = vmul.f32 %v624_v0, %v201_v33  ;;  %v273_v48 = vmul.f32 %v624_v0, %v202_v34  ;;  %v214_v28 = vld [vmem:[%s629_s20 + $0x140] sm:$0xff] }
  0x23   : > { %464 = vst [vmem:[%s657_s25 + $0xa0] sm:$0xff] %v400_v37  ;;  %465 = vst [vmem:[%s657_s25 + $0xa8] sm:$0xff] %v401_v38  ;;  %v403_v46 = vmax.f32 %v339_v39, 0.0  ;;  %v274_v49 = vmul.f32 %v624_v0, %v203_v35  ;;  %v340_v50 = vadd.f32 %v634_v1, %v269_v42  ;;  %v341_v51 = vadd.f32 %v634_v1, %v270_v43  ;;  %v217_v35 = vld [vmem:[%s629_s20 + $0x158] sm:$0xff]  ;;  %v218_v36 = vld [vmem:[%s629_s20 + $0x160] sm:$0xff] }
  0x24   : > { %466 = vst [vmem:[%s657_s25 + $0xb0] sm:$0xff] %v402_v41  ;;  %v342_v52 = vadd.f32 %v634_v1, %v271_v44  ;;  %v275_v53 = vmul.f32 %v624_v0, %v204_v40  ;;  %v343_v54 = vadd.f32 %v634_v1, %v272_v47  ;;  %v344_v55 = vadd.f32 %v634_v1, %v273_v48  ;;  %v219_v37 = vld [vmem:[%s629_s20 + $0x168] sm:$0xff]  ;;  %v220_v42 = vld [vmem:[%s629_s20 + $0x170] sm:$0xff]  ;;  %v221_v47 = vld [vmem:[%s629_s20 + $0x178] sm:$0xff] }
  0x25   : > { %467 = vst [vmem:[%s657_s25 + $0xb8] sm:$0xff] %v403_v46  ;;  %v345_v56 = vadd.f32 %v634_v1, %v274_v49  ;;  %v276_v57 = vmul.f32 %v624_v0, %v205_v45  ;;  %v404_v61 = vmax.f32 %v340_v50, 0.0  ;;  %v405_v62 = vmax.f32 %v341_v51, 0.0 }
  0x26   : > { %v406_v63 = vmax.f32 %v342_v52, 0.0  ;;  %v346_v2 = vadd.f32 %v634_v1, %v275_v53  ;;  %v407_v6 = vmax.f32 %v343_v54, 0.0  ;;  %v408_v7 = vmax.f32 %v344_v55, 0.0 }
  0x27   : > { %v409_v8 = vmax.f32 %v345_v56, 0.0  ;;  %v347_v9 = vadd.f32 %v634_v1, %v276_v57  ;;  %468 = vst [vmem:[%s657_s25 + $0xc0] sm:$0xff] %v404_v61  ;;  %469 = vst [vmem:[%s657_s25 + $0xc8] sm:$0xff] %v405_v62  ;;  %v277_v12 = vmul.f32 %v624_v0, %v206_v58  ;;  %v278_v13 = vmul.f32 %v624_v0, %v207_v59  ;;  %v223_v61 = vld [vmem:[%s629_s20 + $0x188] sm:$0xff]  ;;  %v224_v62 = vld [vmem:[%s629_s20 + $0x190] sm:$0xff] }
  0x28   : > { %470 = vst [vmem:[%s657_s25 + $0xd0] sm:$0xff] %v406_v63  ;;  %v410_v11 = vmax.f32 %v346_v2, 0.0  ;;  %v279_v14 = vmul.f32 %v624_v0, %v208_v60  ;;  %471 = vst [vmem:[%s657_s25 + $0xd8] sm:$0xff] %v407_v6  ;;  %v280_v17 = vmul.f32 %v624_v0, %v209_v3  ;;  %v281_v18 = vmul.f32 %v624_v0, %v210_v4  ;;  %v222_v60 = vld [vmem:[%s629_s20 + $0x180] sm:$0xff] }
  0x29   : > { %472 = vst [vmem:[%s657_s25 + $0xe0] sm:$0xff] %v408_v7  ;;  %473 = vst [vmem:[%s657_s25 + $0xe8] sm:$0xff] %v409_v8  ;;  %v411_v16 = vmax.f32 %v347_v9, 0.0  ;;  %v282_v19 = vmul.f32 %v624_v0, %v211_v5  ;;  %v348_v20 = vadd.f32 %v634_v1, %v277_v12  ;;  %v349_v21 = vadd.f32 %v634_v1, %v278_v13  ;;  %v225_v5 = vld [vmem:[%s629_s20 + $0x198] sm:$0xff]  ;;  %v226_v6 = vld [vmem:[%s629_s20 + $0x1a0] sm:$0xff] }
  0x2a   : > { %474 = vst [vmem:[%s657_s25 + $0xf0] sm:$0xff] %v410_v11  ;;  %v350_v22 = vadd.f32 %v634_v1, %v279_v14  ;;  %v283_v23 = vmul.f32 %v624_v0, %v212_v10  ;;  %v351_v24 = vadd.f32 %v634_v1, %v280_v17  ;;  %v352_v25 = vadd.f32 %v634_v1, %v281_v18  ;;  %v227_v7 = vld [vmem:[%s629_s20 + $0x1a8] sm:$0xff]  ;;  %v228_v12 = vld [vmem:[%s629_s20 + $0x1b0] sm:$0xff]  ;;  %v229_v17 = vld [vmem:[%s629_s20 + $0x1b8] sm:$0xff] }
  0x2b   : > { %475 = vst [vmem:[%s657_s25 + $0xf8] sm:$0xff] %v411_v16  ;;  %v353_v26 = vadd.f32 %v634_v1, %v282_v19  ;;  %v284_v27 = vmul.f32 %v624_v0, %v213_v15  ;;  %v412_v31 = vmax.f32 %v348_v20, 0.0  ;;  %v413_v32 = vmax.f32 %v349_v21, 0.0 }
  0x2c   : > { %v414_v33 = vmax.f32 %v350_v22, 0.0  ;;  %v354_v34 = vadd.f32 %v634_v1, %v283_v23  ;;  %v415_v38 = vmax.f32 %v351_v24, 0.0  ;;  %v416_v39 = vmax.f32 %v352_v25, 0.0 }
  0x2d   : > { %v417_v40 = vmax.f32 %v353_v26, 0.0  ;;  %v355_v41 = vadd.f32 %v634_v1, %v284_v27  ;;  %476 = vst [vmem:[%s657_s25 + $0x100] sm:$0xff] %v412_v31  ;;  %477 = vst [vmem:[%s657_s25 + $0x108] sm:$0xff] %v413_v32  ;;  %v285_v44 = vmul.f32 %v624_v0, %v214_v28  ;;  %v286_v45 = vmul.f32 %v624_v0, %v215_v29  ;;  %v231_v31 = vld [vmem:[%s629_s20 + $0x1c8] sm:$0xff]  ;;  %v232_v32 = vld [vmem:[%s629_s20 + $0x1d0] sm:$0xff] }
  0x2e   : > { %478 = vst [vmem:[%s657_s25 + $0x110] sm:$0xff] %v414_v33  ;;  %v418_v43 = vmax.f32 %v354_v34, 0.0  ;;  %v287_v46 = vmul.f32 %v624_v0, %v216_v30  ;;  %479 = vst [vmem:[%s657_s25 + $0x118] sm:$0xff] %v415_v38  ;;  %v288_v49 = vmul.f32 %v624_v0, %v217_v35  ;;  %v289_v50 = vmul.f32 %v624_v0, %v218_v36  ;;  %v230_v30 = vld [vmem:[%s629_s20 + $0x1c0] sm:$0xff] }
  0x2f   : > { %480 = vst [vmem:[%s657_s25 + $0x120] sm:$0xff] %v416_v39  ;;  %481 = vst [vmem:[%s657_s25 + $0x128] sm:$0xff] %v417_v40  ;;  %v419_v48 = vmax.f32 %v355_v41, 0.0  ;;  %v290_v51 = vmul.f32 %v624_v0, %v219_v37  ;;  %v356_v52 = vadd.f32 %v634_v1, %v285_v44  ;;  %v357_v53 = vadd.f32 %v634_v1, %v286_v45  ;;  %v233_v37 = vld [vmem:[%s629_s20 + $0x1d8] sm:$0xff]  ;;  %v234_v38 = vld [vmem:[%s629_s20 + $0x1e0] sm:$0xff] }
  0x30   : > { %482 = vst [vmem:[%s657_s25 + $0x130] sm:$0xff] %v418_v43  ;;  %v358_v54 = vadd.f32 %v634_v1, %v287_v46  ;;  %v291_v55 = vmul.f32 %v624_v0, %v220_v42  ;;  %v359_v56 = vadd.f32 %v634_v1, %v288_v49  ;;  %v360_v57 = vadd.f32 %v634_v1, %v289_v50  ;;  %v235_v39 = vld [vmem:[%s629_s20 + $0x1e8] sm:$0xff]  ;;  %v236_v44 = vld [vmem:[%s629_s20 + $0x1f0] sm:$0xff]  ;;  %v237_v49 = vld [vmem:[%s629_s20 + $0x1f8] sm:$0xff] }
  0x31   : > { %483 = vst [vmem:[%s657_s25 + $0x138] sm:$0xff] %v419_v48  ;;  %v361_v58 = vadd.f32 %v634_v1, %v290_v51  ;;  %v292_v59 = vmul.f32 %v624_v0, %v221_v47  ;;  %v420_v63 = vmax.f32 %v356_v52, 0.0  ;;  %v421_v2 = vmax.f32 %v357_v53, 0.0 }
  0x32   : > { %v422_v3 = vmax.f32 %v358_v54, 0.0  ;;  %v362_v4 = vadd.f32 %v634_v1, %v291_v55  ;;  %v423_v8 = vmax.f32 %v359_v56, 0.0  ;;  %v424_v9 = vmax.f32 %v360_v57, 0.0 }
  0x33   : > { %v425_v10 = vmax.f32 %v361_v58, 0.0  ;;  %v363_v11 = vadd.f32 %v634_v1, %v292_v59  ;;  %484 = vst [vmem:[%s657_s25 + $0x140] sm:$0xff] %v420_v63  ;;  %485 = vst [vmem:[%s657_s25 + $0x148] sm:$0xff] %v421_v2  ;;  %v293_v14 = vmul.f32 %v624_v0, %v222_v60  ;;  %v294_v15 = vmul.f32 %v624_v0, %v223_v61 }
  0x34   : > { %486 = vst [vmem:[%s657_s25 + $0x150] sm:$0xff] %v422_v3  ;;  %v426_v13 = vmax.f32 %v362_v4, 0.0  ;;  %v295_v16 = vmul.f32 %v624_v0, %v224_v62  ;;  %487 = vst [vmem:[%s657_s25 + $0x158] sm:$0xff] %v423_v8  ;;  %v296_v19 = vmul.f32 %v624_v0, %v225_v5  ;;  %v297_v20 = vmul.f32 %v624_v0, %v226_v6 }
  0x35   : > { %488 = vst [vmem:[%s657_s25 + $0x160] sm:$0xff] %v424_v9  ;;  %489 = vst [vmem:[%s657_s25 + $0x168] sm:$0xff] %v425_v10  ;;  %v427_v18 = vmax.f32 %v363_v11, 0.0  ;;  %v298_v21 = vmul.f32 %v624_v0, %v227_v7  ;;  %v364_v22 = vadd.f32 %v634_v1, %v293_v14  ;;  %v365_v23 = vadd.f32 %v634_v1, %v294_v15 }
  0x36   : > { %490 = vst [vmem:[%s657_s25 + $0x170] sm:$0xff] %v426_v13  ;;  %v366_v24 = vadd.f32 %v634_v1, %v295_v16  ;;  %v299_v25 = vmul.f32 %v624_v0, %v228_v12  ;;  %v367_v26 = vadd.f32 %v634_v1, %v296_v19  ;;  %v368_v27 = vadd.f32 %v634_v1, %v297_v20 }
  0x37   : > { %491 = vst [vmem:[%s657_s25 + $0x178] sm:$0xff] %v427_v18  ;;  %v369_v28 = vadd.f32 %v634_v1, %v298_v21  ;;  %v300_v29 = vmul.f32 %v624_v0, %v229_v17  ;;  %v428_v33 = vmax.f32 %v364_v22, 0.0  ;;  %v429_v34 = vmax.f32 %v365_v23, 0.0 }
  0x38   : > { %v430_v35 = vmax.f32 %v366_v24, 0.0  ;;  %v370_v36 = vadd.f32 %v634_v1, %v299_v25  ;;  %v431_v40 = vmax.f32 %v367_v26, 0.0  ;;  %v432_v41 = vmax.f32 %v368_v27, 0.0 }
  0x39   : > { %v433_v42 = vmax.f32 %v369_v28, 0.0  ;;  %v371_v43 = vadd.f32 %v634_v1, %v300_v29  ;;  %492 = vst [vmem:[%s657_s25 + $0x180] sm:$0xff] %v428_v33  ;;  %493 = vst [vmem:[%s657_s25 + $0x188] sm:$0xff] %v429_v34  ;;  %v301_v46 = vmul.f32 %v624_v0, %v230_v30  ;;  %v302_v47 = vmul.f32 %v624_v0, %v231_v31 }
  0x3a   : > { %494 = vst [vmem:[%s657_s25 + $0x190] sm:$0xff] %v430_v35  ;;  %v434_v45 = vmax.f32 %v370_v36, 0.0  ;;  %v303_v48 = vmul.f32 %v624_v0, %v232_v32  ;;  %495 = vst [vmem:[%s657_s25 + $0x198] sm:$0xff] %v431_v40  ;;  %v304_v51 = vmul.f32 %v624_v0, %v233_v37  ;;  %v305_v52 = vmul.f32 %v624_v0, %v234_v38 }
  0x3b   : > { %496 = vst [vmem:[%s657_s25 + $0x1a0] sm:$0xff] %v432_v41  ;;  %497 = vst [vmem:[%s657_s25 + $0x1a8] sm:$0xff] %v433_v42  ;;  %v435_v50 = vmax.f32 %v371_v43, 0.0  ;;  %v306_v53 = vmul.f32 %v624_v0, %v235_v39  ;;  %v372_v54 = vadd.f32 %v634_v1, %v301_v46  ;;  %v373_v55 = vadd.f32 %v634_v1, %v302_v47 }
  0x3c   : > { %498 = vst [vmem:[%s657_s25 + $0x1b0] sm:$0xff] %v434_v45  ;;  %v374_v56 = vadd.f32 %v634_v1, %v303_v48  ;;  %v307_v57 = vmul.f32 %v624_v0, %v236_v44  ;;  %v375_v58 = vadd.f32 %v634_v1, %v304_v51  ;;  %v376_v59 = vadd.f32 %v634_v1, %v305_v52 }
  0x3d   : > { %499 = vst [vmem:[%s657_s25 + $0x1b8] sm:$0xff] %v435_v50  ;;  %v377_v60 = vadd.f32 %v634_v1, %v306_v53  ;;  %v308_v61 = vmul.f32 %v624_v0, %v237_v49  ;;  %v436_v62 = vmax.f32 %v372_v54, 0.0  ;;  %v437_v63 = vmax.f32 %v373_v55, 0.0 }
  0x3e   : > { %v438_v2 = vmax.f32 %v374_v56, 0.0  ;;  %v378_v3 = vadd.f32 %v634_v1, %v307_v57  ;;  %v439_v4 = vmax.f32 %v375_v58, 0.0  ;;  %v440_v5 = vmax.f32 %v376_v59, 0.0 }
  0x3f   : > { %v441_v6 = vmax.f32 %v377_v60, 0.0  ;;  %v379_v7 = vadd.f32 %v634_v1, %v308_v61  ;;  %500 = vst [vmem:[%s657_s25 + $0x1c0] sm:$0xff] %v436_v62  ;;  %501 = vst [vmem:[%s657_s25 + $0x1c8] sm:$0xff] %v437_v63 }
  0x40   : > { %502 = vst [vmem:[%s657_s25 + $0x1d0] sm:$0xff] %v438_v2  ;;  %v442_v8 = vmax.f32 %v378_v3, 0.0  ;;  %503 = vst [vmem:[%s657_s25 + $0x1d8] sm:$0xff] %v439_v4 }
  0x41   : > { %504 = vst [vmem:[%s657_s25 + $0x1e0] sm:$0xff] %v440_v5  ;;  %505 = vst [vmem:[%s657_s25 + $0x1e8] sm:$0xff] %v441_v6  ;;  %v443_v0 = vmax.f32 %v379_v7, 0.0 }
  0x42   : > { %506 = vst [vmem:[%s657_s25 + $0x1f0] sm:$0xff] %v442_v8 }
  0x43   : > { %507 = vst [vmem:[%s657_s25 + $0x1f8] sm:$0xff] %v443_v0 }
  0x44 PF: > { %s13_s12 = sadd.s32 1, %s591_s12  }
  0x45   : > { %p10_p4 = scmp.ge.s32.totalorder %s13_s12, 66  }
  0x47   :  { %12 = sbr.rel (!%p10_p4) target bundleno = 1 (0x1), region = 62 }

// kernel: decoder_ir_forward.21
= control target key start
LH: loop header
LB: loop body
LE: loop exit
PB: predicated region body
PF: predicated region fallthrough
CT: control target
= control target key end

     0   :  { %s1246_s9 = smov 0   ;;  %s1248_s10 = smov 0   ;;  %s1363_s0 = inlined_call_operand.vmem [shape: bf16[1,32768,49], index: 0, kind: input, shape index: {}]   ;;  %s1364_s1 = inlined_call_operand.vmem [shape: bf16[1,49,128], index: 1, kind: input, shape index: {}]   ;;  %s1365_s2 = inlined_call_operand.vmem [shape: f32[1,32768,128], index: 2, kind: output, shape index: {}]  }
   0x1   :  { %s1250_s11 = smov 0  }
   0x2 LB: > { %s34_s12 = sadd.s32 1, %s1224_s10  ;;  %p986_p0 = scmp.ge.s32.totalorder %s1228_s11, 1  ;;  %s1228_s11 = sphi %s1250_s11, %s12_s11   ;;  %s1224_s10 = sphi %s1248_s10, %s1367_s10   ;;  %s1220_s9 = sphi %s1246_s9, %s1366_s9  }
   0x3   : > { %p36_p1 = scmp.ge.s32.totalorder %s34_s12, 128  ;;  %p176_p2 = scmp.lt.s32.totalorder %s1228_s11, 129 }
   0x5   : > { %s1369_s12 = smov (%p36_p1, %s34_s12), 0  ;;  %p177_p3 = pnand %p986_p0, %p176_p2 }
   0x6   : > { %s987_s17 = sshll.u32 (!%p177_p3), %s1220_s9, 5 }
   0x7   : > { %180 = sbr.rel (%p177_p3) target bundleno = 271 (0x10f), region = 28  ;;  %p227_p4 = scmp.lt.s32.totalorder (!%p177_p3), %s987_s17, 4095 }
   0xc   : > { %v1122_v0 = vld [vmem:[%s1364_s1 + $0x18] ss:$0 sps:$4 sm:$0x11]   ;;  %vm521_vm0 = vcmask 1040384   ;;  %v1230_v1 = vmov 0   ;;  %v1123_v4 = vld [vmem:[%s1364_s1 + $0x10] sm:$0xff]  }
   0xd   : > { %v523_v2 = vsel %vm521_vm0, 65535, %v1230_v1  ;;  %s1371_s17 = smov (!%p227_p4, %s987_s17), 4095  ;;  %v1124_v5 = vld [vmem:[%s1364_s1 + $0x8] sm:$0xff]   ;;  %v1125_v6 = vld [vmem:[%s1364_s1] sm:$0xff]   ;;  %vm472_vm1 = vcmask 400384  }
   0xe   : > { %v525_v3 = vand.u32 %v1122_v0, %v523_v2  ;;  %s988_s20 = sshll.u32 %s1371_s17, 2  ;;  %s990_s26 = sshll.u32 %s1371_s17, 3 }
   0xf   : > { %s1282_s25 = scalar_lea.vmem %s1363_s0, %s988_s20  ;;  %s1320_s29 = scalar_lea.vmem %s1365_s2, %s990_s26 }
  0x10   : > { %1049 = vmatprep.subr.bf16.mxu0 %v525_v3  ;;  %1089 = vmatprep.subr.bf16.mxu1 %v525_v3  ;;  %v1126_v7 = vld [vmem:[%s1282_s25] sm:$0xff]   ;;  %v1128_v9 = vld [vmem:[%s1282_s25 + $0x8] sm:$0xff]   ;;  %v1130_v11 = vld [vmem:[%s1282_s25 + $0x10] sm:$0xff]  }
  0x11   : > { %1050 = vmatpush3.bf16.msra.mxu0 %v525_v3  ;;  %1093 = vmatpush3.bf16.msra.mxu1 %v525_v3  ;;  %v1127_v8 = vld [vmem:[%s1282_s25 + $0x40] sm:$0xff]   ;;  %v1129_v10 = vld [vmem:[%s1282_s25 + $0x48] sm:$0xff]   ;;  %v1131_v12 = vld [vmem:[%s1282_s25 + $0x50] sm:$0xff]  }
  0x12   : > { %1051 = vmatprep.subr.bf16.mxu0 %v1123_v4  ;;  %1090 = vmatprep.subr.bf16.mxu1 %v1123_v4  ;;  %v1132_v13 = vld [vmem:[%s1282_s25 + $0x18] sm:$0xff]   ;;  %v1134_v15 = vld [vmem:[%s1282_s25 + $0x20] sm:$0xff]   ;;  %v1136_v17 = vld [vmem:[%s1282_s25 + $0x28] sm:$0xff]  }
  0x13   : > { %1057 = vmatprep.mubr.msk.bf16.mxu0 %vm472_vm1, %v1126_v7  ;;  %1073 = vmatprep.mubr.msk.bf16.mxu1 %vm472_vm1, %v1127_v8  ;;  %v1133_v14 = vld [vmem:[%s1282_s25 + $0x58] sm:$0xff]   ;;  %v1135_v16 = vld [vmem:[%s1282_s25 + $0x60] sm:$0xff]   ;;  %v1137_v18 = vld [vmem:[%s1282_s25 + $0x68] sm:$0xff]  }
  0x14   : > { %v1138_v19 = vld [vmem:[%s1282_s25 + $0x30] sm:$0xff]   ;;  %v1140_v21 = vld [vmem:[%s1282_s25 + $0x38] sm:$0xff]  }
  0x15   : > { %1052 = vmatpush3.bf16.msra.mxu0 %v1123_v4  ;;  %1094 = vmatpush3.bf16.msra.mxu1 %v1123_v4  ;;  %v1139_v20 = vld [vmem:[%s1282_s25 + $0x70] sm:$0xff]   ;;  %v1141_v22 = vld [vmem:[%s1282_s25 + $0x78] sm:$0xff]  }
  0x16   : > { %1053 = vmatprep.subr.bf16.mxu0 %v1124_v5  ;;  %1091 = vmatprep.subr.bf16.mxu1 %v1124_v5 }
  0x19   : > { %1054 = vmatpush3.bf16.msra.mxu0 %v1124_v5  ;;  %1095 = vmatpush3.bf16.msra.mxu1 %v1124_v5 }
  0x1a   : > { %1055 = vmatprep.subr.bf16.mxu0 %v1125_v6  ;;  %1092 = vmatprep.subr.bf16.mxu1 %v1125_v6 }
  0x1d   : > { %1056 = vmatpush3.bf16.msra.mxu0 %v1125_v6  ;;  %1096 = vmatpush3.bf16.msra.mxu1 %v1125_v6 }
  0x20   : > { %1058 = vmatmul.mubr.msk.bf16.vlgmr.msra.gmra.mxu0 %vm472_vm1, %v1128_v9  ;;  %1074 = vmatmul.mubr.msk.bf16.vlgmr.msra.gmra.mxu1 %vm472_vm1, %v1129_v10 }
  0x21   : > { %1061 = vmatprep.mubr.msk.bf16.mxu0 %vm472_vm1, %v1130_v11  ;;  %1077 = vmatprep.mubr.msk.bf16.mxu1 %vm472_vm1, %v1131_v12 }
  0x28   : > { %1062 = vmatmul.mubr.msk.bf16.gmra.mxu0 %vm472_vm1, %v1132_v13  ;;  %1078 = vmatmul.mubr.msk.bf16.gmra.mxu1 %vm472_vm1, %v1133_v14 }
  0x29   : > { %1065 = vmatprep.mubr.msk.bf16.mxu0 %vm472_vm1, %v1134_v15  ;;  %1081 = vmatprep.mubr.msk.bf16.mxu1 %vm472_vm1, %v1135_v16 }
  0x30   : > { %1066 = vmatmul.mubr.msk.bf16.gmra.mxu0 %vm472_vm1, %v1136_v17  ;;  %1082 = vmatmul.mubr.msk.bf16.gmra.mxu1 %vm472_vm1, %v1137_v18 }
  0x31   : > { %1069 = vmatprep.mubr.msk.bf16.mxu0 %vm472_vm1, %v1138_v19  ;;  %1085 = vmatprep.mubr.msk.bf16.mxu1 %vm472_vm1, %v1139_v20 }
  0x38   : > { %1070 = vmatmul.mubr.msk.bf16.gmra.mxu0 %vm472_vm1, %v1140_v21  ;;  %1086 = vmatmul.mubr.msk.bf16.gmra.mxu1 %vm472_vm1, %v1141_v22 }
  0xe0   : > { %v1059_v23 = vpop.f32.mrf.mxu0  ;;  %v1075_v24 = vpop.f32.mrf.mxu1 }
  0xe1   : > { %1142 = vtanh.f32 %v1059_v23 }
  0xe2   : > { %1144 = vtanh.f32 %v1075_v24  ;;  %v561_v25 = vpop.f32.mrf.mxu0  ;;  %v625_v26 = vpop.f32.mrf.mxu1 }
  0xe3   : > { %1146 = vtanh.f32 %v561_v25 }
  0xe4   : > { %1148 = vtanh.f32 %v625_v26  ;;  %v1060_v27 = vpop.f32.mrf.mxu0  ;;  %v1076_v28 = vpop.f32.mrf.mxu1 }
  0xe5   : > { %1150 = vtanh.f32 %v1060_v27 }
  0xe6   : > { %1152 = vtanh.f32 %v1076_v28  ;;  %v564_v29 = vpop.f32.mrf.mxu0  ;;  %v628_v30 = vpop.f32.mrf.mxu1 }
  0xe7   : > { %1154 = vtanh.f32 %v564_v29 }
  0xe8   : > { %1156 = vtanh.f32 %v628_v30  ;;  %v1063_v31 = vpop.f32.mrf.mxu0  ;;  %v1079_v32 = vpop.f32.mrf.mxu1 }
  0xe9   : > { %1158 = vtanh.f32 %v1063_v31 }
  0xea   : > { %1160 = vtanh.f32 %v1079_v32  ;;  %v577_v33 = vpop.f32.mrf.mxu0  ;;  %v641_v34 = vpop.f32.mrf.mxu1 }
  0xeb   : > { %1162 = vtanh.f32 %v577_v33 }
  0xec   : > { %1164 = vtanh.f32 %v641_v34  ;;  %v1064_v35 = vpop.f32.mrf.mxu0  ;;  %v1080_v36 = vpop.f32.mrf.mxu1 }
  0xed   : > { %1166 = vtanh.f32 %v1064_v35 }
  0xee   : > { %v1143_v37 = vpop.eup %1142  ;;  %1168 = vtanh.f32 %v1080_v36  ;;  %v580_v38 = vpop.f32.mrf.mxu0 }
  0xef   : > { %v644_v39 = vpop.f32.mrf.mxu1  ;;  %v1145_v40 = vpop.eup %1144  ;;  %821 = vst [vmem:[%s1320_s29 + $0x10] sm:$0xff] %v1143_v37  ;;  %1170 = vtanh.f32 %v580_v38 }
  0xf0   : > { %v1147_v41 = vpop.eup %1146  ;;  %837 = vst [vmem:[%s1320_s29 + $0x90] sm:$0xff] %v1145_v40  ;;  %1172 = vtanh.f32 %v644_v39  ;;  %v1067_v42 = vpop.f32.mrf.mxu0 }
  0xf1   : > { %v1083_v43 = vpop.f32.mrf.mxu1  ;;  %v1149_v44 = vpop.eup %1148  ;;  %819 = vst [vmem:[%s1320_s29] sm:$0xff] %v1147_v41  ;;  %1174 = vtanh.f32 %v1067_v42 }
  0xf2   : > { %v1151_v45 = vpop.eup %1150  ;;  %835 = vst [vmem:[%s1320_s29 + $0x80] sm:$0xff] %v1149_v44  ;;  %1176 = vtanh.f32 %v1083_v43  ;;  %v593_v46 = vpop.f32.mrf.mxu0 }
  0xf3   : > { %v657_v47 = vpop.f32.mrf.mxu1  ;;  %v1153_v48 = vpop.eup %1152  ;;  %822 = vst [vmem:[%s1320_s29 + $0x18] sm:$0xff] %v1151_v45  ;;  %1178 = vtanh.f32 %v593_v46 }
  0xf4   : > { %v1155_v49 = vpop.eup %1154  ;;  %838 = vst [vmem:[%s1320_s29 + $0x98] sm:$0xff] %v1153_v48  ;;  %1180 = vtanh.f32 %v657_v47  ;;  %v1068_v50 = vpop.f32.mrf.mxu0 }
  0xf5   : > { %v1084_v51 = vpop.f32.mrf.mxu1  ;;  %v1157_v52 = vpop.eup %1156  ;;  %820 = vst [vmem:[%s1320_s29 + $0x8] sm:$0xff] %v1155_v49  ;;  %1182 = vtanh.f32 %v1068_v50 }
  0xf6   : > { %v1159_v53 = vpop.eup %1158  ;;  %836 = vst [vmem:[%s1320_s29 + $0x88] sm:$0xff] %v1157_v52  ;;  %1184 = vtanh.f32 %v1084_v51  ;;  %v596_v54 = vpop.f32.mrf.mxu0 }
  0xf7   : > { %v660_v55 = vpop.f32.mrf.mxu1  ;;  %v1161_v56 = vpop.eup %1160  ;;  %825 = vst [vmem:[%s1320_s29 + $0x30] sm:$0xff] %v1159_v53  ;;  %1186 = vtanh.f32 %v596_v54 }
  0xf8   : > { %v1163_v57 = vpop.eup %1162  ;;  %841 = vst [vmem:[%s1320_s29 + $0xb0] sm:$0xff] %v1161_v56  ;;  %1188 = vtanh.f32 %v660_v55  ;;  %v1071_v58 = vpop.f32.mrf.mxu0 }
  0xf9   : > { %v1087_v59 = vpop.f32.mrf.mxu1  ;;  %v1165_v60 = vpop.eup %1164  ;;  %823 = vst [vmem:[%s1320_s29 + $0x20] sm:$0xff] %v1163_v57  ;;  %1190 = vtanh.f32 %v1071_v58 }
  0xfa   : > { %v1167_v61 = vpop.eup %1166  ;;  %839 = vst [vmem:[%s1320_s29 + $0xa0] sm:$0xff] %v1165_v60  ;;  %1192 = vtanh.f32 %v1087_v59  ;;  %v609_v62 = vpop.f32.mrf.mxu0 }
  0xfb   : > { %v673_v63 = vpop.f32.mrf.mxu1  ;;  %v1169_v0 = vpop.eup %1168  ;;  %826 = vst [vmem:[%s1320_s29 + $0x38] sm:$0xff] %v1167_v61  ;;  %1194 = vtanh.f32 %v609_v62 }
  0xfc   : > { %v1171_v1 = vpop.eup %1170  ;;  %842 = vst [vmem:[%s1320_s29 + $0xb8] sm:$0xff] %v1169_v0  ;;  %1196 = vtanh.f32 %v673_v63  ;;  %v1072_v2 = vpop.f32.mrf.mxu0 }
  0xfd   : > { %v1088_v3 = vpop.f32.mrf.mxu1  ;;  %v1173_v4 = vpop.eup %1172  ;;  %824 = vst [vmem:[%s1320_s29 + $0x28] sm:$0xff] %v1171_v1  ;;  %1198 = vtanh.f32 %v1072_v2 }
  0xfe   : > { %v1175_v5 = vpop.eup %1174  ;;  %840 = vst [vmem:[%s1320_s29 + $0xa8] sm:$0xff] %v1173_v4  ;;  %1200 = vtanh.f32 %v1088_v3  ;;  %v612_v6 = vpop.f32.mrf.mxu0 }
  0xff   : > { %v676_v7 = vpop.f32.mrf.mxu1  ;;  %v1177_v8 = vpop.eup %1176  ;;  %829 = vst [vmem:[%s1320_s29 + $0x50] sm:$0xff] %v1175_v5  ;;  %1202 = vtanh.f32 %v612_v6 }
 0x100   : > { %v1179_v9 = vpop.eup %1178  ;;  %845 = vst [vmem:[%s1320_s29 + $0xd0] sm:$0xff] %v1177_v8  ;;  %1204 = vtanh.f32 %v676_v7 }
 0x101   : > { %v1181_v10 = vpop.eup %1180  ;;  %827 = vst [vmem:[%s1320_s29 + $0x40] sm:$0xff] %v1179_v9 }
 0x102   : > { %v1183_v11 = vpop.eup %1182  ;;  %843 = vst [vmem:[%s1320_s29 + $0xc0] sm:$0xff] %v1181_v10 }
 0x103   : > { %v1185_v12 = vpop.eup %1184  ;;  %830 = vst [vmem:[%s1320_s29 + $0x58] sm:$0xff] %v1183_v11 }
 0x104   : > { %v1187_v13 = vpop.eup %1186  ;;  %846 = vst [vmem:[%s1320_s29 + $0xd8] sm:$0xff] %v1185_v12 }
 0x105   : > { %v1189_v14 = vpop.eup %1188  ;;  %828 = vst [vmem:[%s1320_s29 + $0x48] sm:$0xff] %v1187_v13 }
 0x106   : > { %v1191_v15 = vpop.eup %1190  ;;  %844 = vst [vmem:[%s1320_s29 + $0xc8] sm:$0xff] %v1189_v14 }
 0x107   : > { %v1193_v16 = vpop.eup %1192  ;;  %833 = vst [vmem:[%s1320_s29 + $0x70] sm:$0xff] %v1191_v15 }
 0x108   : > { %v1195_v17 = vpop.eup %1194  ;;  %849 = vst [vmem:[%s1320_s29 + $0xf0] sm:$0xff] %v1193_v16 }
 0x109   : > { %v1197_v18 = vpop.eup %1196  ;;  %831 = vst [vmem:[%s1320_s29 + $0x60] sm:$0xff] %v1195_v17 }
 0x10a   : > { %v1199_v19 = vpop.eup %1198  ;;  %847 = vst [vmem:[%s1320_s29 + $0xe0] sm:$0xff] %v1197_v18 }
 0x10b   : > { %v1201_v20 = vpop.eup %1200  ;;  %834 = vst [vmem:[%s1320_s29 + $0x78] sm:$0xff] %v1199_v19 }
 0x10c   : > { %v1203_v21 = vpop.eup %1202  ;;  %850 = vst [vmem:[%s1320_s29 + $0xf8] sm:$0xff] %v1201_v20 }
 0x10d   : > { %v1205_v22 = vpop.eup %1204  ;;  %832 = vst [vmem:[%s1320_s29 + $0x68] sm:$0xff] %v1203_v21 }
 0x10e   : > { %848 = vst [vmem:[%s1320_s29 + $0xe8] sm:$0xff] %v1205_v22 }
 0x10f PF: > { %s12_s11 = sadd.s32 1, %s1228_s11   ;;  %s1366_s9 = smov %s1224_s10 }
 0x110   : > { %p9_p5 = scmp.ge.s32.totalorder %s12_s11, 130   ;;  %s1367_s10 = smov %s1369_s12 }
 0x112   :  { %11 = sbr.rel (!%p9_p5) target bundleno = 2 (0x2), region = 69 }

</bundles_post_ra>
